<compile_context>
chip_gen: v7x
topology: tpu7x:2x2x1
jax: 0.10.0
libtpu: 0.0.40
codegen_flags: <defaults>
</compile_context>

<pallas_src>
import math
from functools import partial

import jax
import jax.numpy as jnp
from jax.experimental import pallas as pl
from jax.experimental.pallas import tpu as pltpu

TWO_PI = 2.0 * math.pi
INV_TWO_PI = 1.0 / TWO_PI

_USE_XLU_ROLL = True   # pltpu.roll (XLU) vs slice+concat fallback (load/store path)


# ----------------------------------------------------------------------------
# small math helpers (shared by the kernel and the pure-JAX reference)
# ----------------------------------------------------------------------------
def _gelu_tanh(x):
    # tanh approximation of GELU (differences vs exact-erf GELU are ~1e-3)
    c = math.sqrt(2.0 / math.pi)
    return 0.5 * x * (1.0 + jnp.tanh(c * (x + 0.044715 * x * x * x)))


def _mod_2pi(v):
    # torch_mod(x) == torch.remainder(x, 2*pi)
    return v - TWO_PI * jnp.floor(v * INV_TWO_PI)


def _softplus(x):
    # numerically-stable softplus, matches torch.nn.Softplus(beta=1) to fp eps
    return jnp.maximum(x, 0.0) + jnp.log(1.0 + jnp.exp(-jnp.abs(x)))


def _recip(x):
    # EUP approximate reciprocal + one Newton step: keeps divides off the VALU
    # critical slot while retaining ~f32 accuracy.
    r = pl.reciprocal(x, approx=True)
    return r * (2.0 - x * r)


def _roll_lanes(a, shift, n):
    # circular roll along the last (lane) axis, jnp.roll convention:
    #   result[..., p] = a[..., (p - shift) % n]      (static shift)
    s = shift % n
    if s == 0:
        return a
    if _USE_XLU_ROLL:
        return pltpu.roll(a, s, axis=a.ndim - 1)     # XLU vrot, off the ld/st path
    return jnp.concatenate([a[..., n - s:], a[..., :n - s]], axis=-1)


# ----------------------------------------------------------------------------
# fused Pallas kernel: input prep + conv tower + circular RQ-spline coupling
# ----------------------------------------------------------------------------
def _fused_coupling_kernel(*refs, n_layers, n_bins, L, N, GN, conv_dtype):
    xcs_ref, mask_ref, tri_ref = refs[0], refs[1], refs[2]
    wb_refs = refs[3:3 + 2 * n_layers]
    fx_ref, logj_ref = refs[3 + 2 * n_layers], refs[4 + 2 * n_layers]

    blk = xcs_ref[0]                       # (3, GN): [x, cos(x), sin(x)]
    x = blk[0:1, :]
    cosx = blk[1:2, :]
    sinx = blk[2:3, :]

    active = mask_ref[0:1, :]              # plaquette masks (f32 {0,1})
    frozen = mask_ref[1:2, :]
    j_lo = mask_ref[2:3, :]                # lattice column j == 0
    j_hi = mask_ref[3:4, :]                # j == L-1
    i_lo = mask_ref[4:5, :]                # lattice row i == 0
    i_hi = mask_ref[5:6, :]                # i == L-1

    # ---- _prepare_u1_input: frozen-masked (cos, sin) channels -----------------
    h = jnp.concatenate([frozen * cosx, frozen * sinx], axis=0).astype(conv_dtype)

    # ---- on-chip circular shifts of the flattened torus (batch segments on lanes)
    # wanted: y[b, i, j] = a[b, (i+r)%L, (j+c)%L]; each nonzero shift is two
    # global lane rolls blended with a boolean boundary mask (no cross-batch mix).
    def shift_col(a, c, jlo_b, jhi_b):
        if c == 0:
            return a
        if c == 1:
            return jnp.where(jhi_b, _roll_lanes(a, L - 1, GN), _roll_lanes(a, -1, GN))
        return jnp.where(jlo_b, _roll_lanes(a, -(L - 1), GN), _roll_lanes(a, 1, GN))

    def shift_row(a, r, ilo_b, ihi_b):
        if r == 0:
            return a
        if r == 1:
            return jnp.where(ihi_b, _roll_lanes(a, N - L, GN), _roll_lanes(a, -L, GN))
        return jnp.where(ilo_b, _roll_lanes(a, -(N - L), GN), _roll_lanes(a, L, GN))

    # ---- conv tower: circular 3x3 conv == 9 accumulated MXU dots (no im2col buf)
    for layer in range(n_layers):
        w_ref, b_ref = wb_refs[2 * layer], wb_refs[2 * layer + 1]
        w_full = w_ref[...]                              # (Cout, 9*Cin)
        cin = h.shape[0]

        # boundary masks broadcast once per layer (hoisted out of per-tap blends)
        jlo_b = jnp.broadcast_to(j_lo, (cin, GN)) > 0.5
        jhi_b = jnp.broadcast_to(j_hi, (cin, GN)) > 0.5
        ilo_b = jnp.broadcast_to(i_lo, (cin, GN)) > 0.5
        ihi_b = jnp.broadcast_to(i_hi, (cin, GN)) > 0.5

        cols = {c: shift_col(h, c, jlo_b, jhi_b) for c in (-1, 0, 1)}
        acc = None
        t = 0
        # tap order (di, dj) row-major == weight layout (Cout, di, dj, Cin) flattened
        for r in (-1, 0, 1):
            for c in (-1, 0, 1):
                tap = shift_row(cols[c], r, ilo_b, ihi_b)           # (Cin, GN)
                wk = w_full[:, t * cin:(t + 1) * cin]               # (Cout, Cin)
                dpart = jnp.dot(wk, tap, preferred_element_type=jnp.float32)
                acc = dpart if acc is None else acc + dpart
                t += 1
        hout = acc + b_ref[...]                                     # (Cout, GN) f32
        if layer < n_layers - 1:
            h = _gelu_tanh(hout).astype(conv_dtype)
        else:
            h = hout.astype(jnp.float32)

    # ---- circular rational-quadratic spline coupling ---------------------------
    nb = n_bins
    no = h                                                          # (3*nb+1, GN)
    w_logits = no[0:nb, :]
    h_logits = no[nb:2 * nb, :]
    d_raw = no[2 * nb:3 * nb, :]
    t_shift = no[3 * nb:3 * nb + 1, :]                              # (1, GN)

    def softmax0(z):                       # softmax over the bin (sublane) axis
        z = z - jnp.max(z, axis=0, keepdims=True)
        ez = jnp.exp(z)
        return ez * _recip(jnp.sum(ez, axis=0, keepdims=True))

    wbins = softmax0(w_logits)             # (nb, GN) bin widths  (sum to 1)
    hbins = softmax0(h_logits)             # (nb, GN) bin heights (sum to 1)
    d = _softplus(d_raw)                   # (nb, GN) interior knot derivatives

    # circular knots (rs.make_circular_knots_array): kx/ky = 2*pi*cumsum.
    # cumsum over nb sublanes via a tiny lower-triangular MXU matmul; the
    # triangular matrix is a grid-constant input (not rebuilt every step).
    tri = tri_ref[...]                                              # (nb, nb)
    kx_hi = TWO_PI * jnp.dot(tri, wbins, preferred_element_type=jnp.float32)
    ky_hi = TWO_PI * jnp.dot(tri, hbins, preferred_element_type=jnp.float32)
    kx_lo = kx_hi - TWO_PI * wbins
    ky_lo = ky_hi - TWO_PI * hbins
    s_lo = d
    s_hi = jnp.concatenate([d[1:, :], d[0:1, :]], axis=0)           # s[k+1] circular

    # forward path (dir == 0): x1 = active * mod2pi(x - dir*t) == active*mod2pi(x)
    is_active = active > 0.0
    x1 = jnp.where(is_active, _mod_2pi(x), 0.0)

    # bin search over interior knots: ge[k] = [x1 >= kx_hi[k]]  (k = 0..nb-2).
    # pick(v) = v[bin] computed directly as v[0] + sum_k ge[k]*(v[k+1]-v[k]);
    # no iota plane, no one-hot materialization.
    ge = (x1 >= kx_hi[:nb - 1, :]).astype(jnp.float32)              # (nb-1, GN)

    def pick(v):                                                    # v: (nb, GN)
        return v[0:1, :] + jnp.sum(ge * (v[1:, :] - v[:-1, :]), axis=0, keepdims=True)

    kxl, kxh = pick(kx_lo), pick(kx_hi)
    kyl, kyh = pick(ky_lo), pick(ky_hi)
    sl, sh = pick(s_lo), pick(s_hi)

    wb = jnp.maximum(kxh - kxl, 1e-12)      # epsilon floor (robust _recip)
    hb = kyh - kyl
    inv_wb = _recip(wb)
    slope = hb * inv_wb
    xi = (x1 - kxl) * inv_wb
    om = 1.0 - xi
    denom = jnp.maximum(slope + (sh + sl - 2.0 * slope) * xi * om, 1e-12)
    inv_den = _recip(denom)
    fx1 = kyl + hb * (slope * xi * xi + sl * xi * om) * inv_den
    deriv = (slope * slope * (sh * xi * xi + 2.0 * slope * xi * om + sl * om * om)
             * inv_den * inv_den)

    # NaN-safe masking: inactive sites contribute exactly 0 to logJ, keep x.
    local_logj = jnp.where(is_active, jnp.log(deriv), 0.0)
    fx = jnp.where(is_active, _mod_2pi(fx1 + t_shift), x)           # (1-dir)*t, dir=0

    fx_ref[0] = fx
    logj_ref[0] = local_logj


# ----------------------------------------------------------------------------
# generation-aware tuning + batch -> lane folding
# ----------------------------------------------------------------------------
def _device_tuning():
    """(target_lanes, vmem_limit_bytes) per TPU generation."""
    kind = ""
    try:
        kind = jax.devices()[0].device_kind.lower()
    except Exception:
        pass
    if "v7" in kind:                       # 64 MiB physical VMEM: leave headroom
        return 8192, 48 * 1024 * 1024
    if "v6" in kind or "v5" in kind:       # 128 MiB physical VMEM
        return 16384, 64 * 1024 * 1024
    return 8192, None                      # unknown: don't force a scoped limit


def _pick_group(batch, n_sites, target_lanes):
    """Largest G | batch with G*n_sites <= target_lanes, preferring GN % 128 == 0,
    and capped so the batch-block grid has >= 2 steps when batch >= 2 (v7x TCs)."""
    gmax = max(1, min(batch, target_lanes // max(n_sites, 1)))
    if batch >= 2:
        gmax = max(1, min(gmax, batch // 2))
    divisors = [g for g in range(1, gmax + 1) if batch % g == 0]
    aligned = [g for g in divisors if (g * n_sites) % 128 == 0]
    return (aligned or divisors)[-1]


def rs_plaq_coupling_forward_pallas(x, plaq_mask, flat_params, *, n_bins,
                                    target_lanes=None, vmem_limit_bytes=None,
                                    conv_dtype=jnp.float32):
    """Fused forward pass: input prep + conv tower + circular RQ-spline coupling."""
    B, L, _ = x.shape
    N = L * L
    dflt_lanes, dflt_vmem = _device_tuning()
    if target_lanes is None:
        target_lanes = dflt_lanes
    if vmem_limit_bytes is None:
        vmem_limit_bytes = dflt_vmem

    G = _pick_group(B, N, target_lanes)    # batch elements folded onto lanes
    GN = G * N
    n_layers = len(flat_params)

    x_flat = x.reshape(B // G, GN).astype(jnp.float32)
    # cos/sin computed in XLA (one tiny fused elementwise op), packed with x
    xcs = jnp.stack([x_flat, jnp.cos(x_flat), jnp.sin(x_flat)], axis=1)  # (B//G, 3, GN)

    # static lane-position / plaquette masks (built host-side once per call)
    p = jnp.arange(GN, dtype=jnp.int32)
    jj = p % L
    ii = (p % N) // L
    lane_masks = jnp.stack([
        jnp.tile(plaq_mask["active"].reshape(-1).astype(jnp.float32), G),
        jnp.tile(plaq_mask["frozen"].reshape(-1).astype(jnp.float32), G),
        (jj == 0).astype(jnp.float32),
        (jj == L - 1).astype(jnp.float32),
        (ii == 0).astype(jnp.float32),
        (ii == L - 1).astype(jnp.float32),
    ], axis=0)                                                           # (6, GN)

    tri = jnp.tril(jnp.ones((n_bins, n_bins), jnp.float32))              # cumsum matrix

    inputs = [xcs, lane_masks, tri]
    in_specs = [pl.BlockSpec((1, 3, GN), lambda bi: (bi, 0, 0)),
                pl.BlockSpec((6, GN), lambda bi: (0, 0)),
                pl.BlockSpec((n_bins, n_bins), lambda bi: (0, 0))]
    # TODO(synk): once pl.Buffered(1) is verified on all targets, single-buffer the
    # grid-constant inputs (masks / tri / weights) to free VMEM on v7x.
    for (wf, bc) in flat_params:
        inputs += [wf, bc]
        in_specs += [pl.BlockSpec(tuple(wf.shape), lambda bi: (0, 0)),
                     pl.BlockSpec(tuple(bc.shape), lambda bi: (0, 0))]

    kernel = partial(_fused_coupling_kernel, n_layers=n_layers, n_bins=n_bins,
                     L=L, N=N, GN=GN, conv_dtype=conv_dtype)

    compiler_kwargs = dict(dimension_semantics=("parallel",))   # batch axis -> 2 TCs on v7x
    if vmem_limit_bytes is not None:
        compiler_kwargs["vmem_limit_bytes"] = vmem_limit_bytes

    fx_g, logj_site = pl.pallas_call(
        kernel,
        out_shape=(jax.ShapeDtypeStruct((B // G, 1, GN), jnp.float32),
                   jax.ShapeDtypeStruct((B // G, 1, GN), jnp.float32)),
        grid_spec=pltpu.PrefetchScalarGridSpec(
            num_scalar_prefetch=0,
            grid=(B // G,),
            in_specs=in_specs,
            out_specs=[pl.BlockSpec((1, 1, GN), lambda bi: (bi, 0, 0)),
                       pl.BlockSpec((1, 1, GN), lambda bi: (bi, 0, 0))],
        ),
        compiler_params=pltpu.CompilerParams(**compiler_kwargs),
    )(*inputs)

    fx = fx_g.reshape(B, L, L)
    # per-site logJ is stored lane-dense; per-sample reduction is a tiny XLA op
    logJ = jnp.sum(logj_site.reshape(B, N), axis=1)
    return fx, logJ


# ----------------------------------------------------------------------------
# module glue (masks, parameter init) — plain JAX
# ----------------------------------------------------------------------------
def make_plaq_masks(L):
    rows = jnp.arange(L)
    active = jnp.broadcast_to((rows % 4 == 0)[:, None], (L, L)).astype(jnp.float32)
    frozen = jnp.broadcast_to((rows % 4 == 2)[:, None], (L, L)).astype(jnp.float32)
    passive = 1.0 - active - frozen
    return {"active": active, "passive": passive, "frozen": frozen}


def init_net_params(key, channels):
    # channels e.g. [2, 16, 16, 3*n_bins+1]; 3x3 circular convs
    params = []
    for i in range(len(channels) - 1):
        key, kw, kb = jax.random.split(key, 3)
        cin, cout = channels[i], channels[i + 1]
        w = jax.random.normal(kw, (cout, cin, 3, 3), jnp.float32) / math.sqrt(cin * 9)
        b = 0.01 * jax.random.normal(kb, (cout,), jnp.float32)
        params.append((w, b))
    return params


class GenericRSPlaqCouplingLayerPallas:
    """JAX/Pallas port of GenericRSPlaqCouplingLayer (forward / dir=0 path).

    conv_dtype=jnp.bfloat16 halves conv-tower traffic on v6e/v7x (keep f32 on v5e).
    """

    def __init__(self, *, n_knots, net_params, masks, conv_dtype=jnp.float32,
                 target_lanes=None, vmem_limit_bytes=None):
        self.n_knots = n_knots
        self.n_bins = n_knots - 1
        self.plaq_mask = masks[0]
        self.loop_masks = masks[1:]
        self.conv_dtype = conv_dtype
        self.target_lanes = target_lanes
        self.vmem_limit_bytes = vmem_limit_bytes
        # pre-flatten conv weights to the in-kernel tap layout:
        #   K index = (di*3 + dj) * Cin + ci
        self.flat_params = [
            (jnp.transpose(w, (0, 2, 3, 1)).reshape(w.shape[0], -1).astype(conv_dtype),
             b.reshape(-1, 1).astype(jnp.float32))
            for (w, b) in net_params]

    def call(self, x, direction, *loops):
        if direction != 0:
            # TODO(synk): inverse spline branch (dir == 1, .reverse()) not implemented.
            raise NotImplementedError("only the forward (dir=0) path is implemented")
        if loops:
            # TODO(synk): extra masked loop inputs to the net are not fused yet.
            raise NotImplementedError("loop inputs are not supported by the fused kernel")
        return rs_plaq_coupling_forward_pallas(
            x, self.plaq_mask, self.flat_params, n_bins=self.n_bins,
            target_lanes=self.target_lanes, vmem_limit_bytes=self.vmem_limit_bytes,
            conv_dtype=self.conv_dtype)

    def forward(self, x, *loops):
        return self.call(x, 0, *loops)


# ----------------------------------------------------------------------------
# pure-JAX reference (same math, XLA ops) for a sanity check
# ----------------------------------------------------------------------------
def reference_forward(x, plaq_mask, params, n_bins, direction=0):
    B, L, _ = x.shape
    h = plaq_mask["frozen"] * jnp.stack([jnp.cos(x), jnp.sin(x)], axis=1)
    nlayers = len(params)
    for i, (w, b) in enumerate(params):
        C = h.shape[1]
        shifts = [jnp.roll(h, shift=(1 - di, 1 - dj), axis=(2, 3))
                  for di in range(3) for dj in range(3)]
        p = jnp.stack(shifts, axis=2)                                # (B, C, 9, L, L)
        w9 = w.reshape(w.shape[0], C, 9)
        h = jnp.einsum("ock,bckij->boij", w9, p) + b[None, :, None, None]
        if i < nlayers - 1:
            h = _gelu_tanh(h)
    no = h
    w = jax.nn.softmax(no[:, :n_bins], axis=1)
    hh = jax.nn.softmax(no[:, n_bins:2 * n_bins], axis=1)
    d = _softplus(no[:, 2 * n_bins:3 * n_bins])
    t = no[:, -1]
    z = jnp.zeros((B, 1, L, L), jnp.float32)
    kx = jnp.concatenate([z, TWO_PI * jnp.cumsum(w, axis=1)], axis=1)
    ky = jnp.concatenate([z, TWO_PI * jnp.cumsum(hh, axis=1)], axis=1)
    s = jnp.concatenate([d, d[:, :1]], axis=1)
    active, passive, frozen = plaq_mask["active"], plaq_mask["passive"], plaq_mask["frozen"]
    x1 = active * _mod_2pi(x - direction * t)
    idx = jnp.sum((x1[:, None] >= kx[:, 1:n_bins]).astype(x.dtype), axis=1)
    onehot = (idx[:, None] == jnp.arange(n_bins, dtype=x.dtype)[None, :, None, None]).astype(x.dtype)
    kxl = jnp.sum(onehot * kx[:, :n_bins], 1); kxh = jnp.sum(onehot * kx[:, 1:], 1)
    kyl = jnp.sum(onehot * ky[:, :n_bins], 1); kyh = jnp.sum(onehot * ky[:, 1:], 1)
    sl = jnp.sum(onehot * s[:, :n_bins], 1); sh = jnp.sum(onehot * s[:, 1:], 1)
    wbin = kxh - kxl
    hbin = kyh - kyl
    slope = hbin / wbin
    xi = (x1 - kxl) / wbin
    om = 1.0 - xi
    denom = slope + (sh + sl - 2.0 * slope) * xi * om
    fx1 = kyl + hbin * (slope * xi * xi + sl * xi * om) / denom
    deriv = slope * slope * (sh * xi * xi + 2.0 * slope * xi * om + sl * om * om) / (denom * denom)
    fx1 = active * fx1
    llj = active * jnp.log(deriv)
    fx = active * _mod_2pi(fx1 + (1.0 - direction) * t) + passive * x + frozen * x
    return fx, jnp.sum(llj, axis=(1, 2))


# ----------------------------------------------------------------------------
if __name__ == "__main__":
    key = jax.random.PRNGKey(0)
    B, L = 2, 16
    n_knots = 9
    n_bins = n_knots - 1

    kx_, kp_ = jax.random.split(key)
    x = jax.random.uniform(kx_, (B, L, L), jnp.float32, 0.0, TWO_PI)
    masks = [make_plaq_masks(L)]
    params = init_net_params(kp_, [2, 16, 16, 3 * n_bins + 1])

    layer = GenericRSPlaqCouplingLayerPallas(n_knots=n_knots, net_params=params, masks=masks)

    fx, logJ = layer.forward(x)
    fx = jax.block_until_ready(fx)
    logJ = jax.block_until_ready(logJ)

    fx_ref, logJ_ref = reference_forward(x, masks[0], params, n_bins)

    assert fx.shape == (B, L, L) and logJ.shape == (B,)
    assert bool(jnp.all(jnp.isfinite(fx))) and bool(jnp.all(jnp.isfinite(logJ)))
    assert bool(jnp.allclose(fx, fx_ref, atol=1e-2)), "fx mismatch vs reference"
    assert bool(jnp.allclose(logJ, logJ_ref, atol=1e-2)), "logJ mismatch vs reference"

    print("KERNEL_OK")
</pallas_src>

<mosaic_0001>
module attributes {stable_mosaic.version = 11 : i64} {
  func.func @_fused_coupling_kernel(%arg0: i32, %arg1: memref<1x3x256xf32, #tpu.memory_space<vmem>>, %arg2: memref<6x256xf32, #tpu.memory_space<vmem>>, %arg3: memref<8x8xf32, #tpu.memory_space<vmem>>, %arg4: memref<16x18xf32, #tpu.memory_space<vmem>>, %arg5: memref<16x1xf32, #tpu.memory_space<vmem>>, %arg6: memref<16x144xf32, #tpu.memory_space<vmem>>, %arg7: memref<16x1xf32, #tpu.memory_space<vmem>>, %arg8: memref<25x144xf32, #tpu.memory_space<vmem>>, %arg9: memref<25x1xf32, #tpu.memory_space<vmem>>, %arg10: memref<1x1x256xf32, #tpu.memory_space<vmem>>, %arg11: memref<1x1x256xf32, #tpu.memory_space<vmem>>) attributes {dimension_semantics = [#tpu.dimension_semantics<parallel>], iteration_bounds = array<i64: 2>, scalar_prefetch = 0 : i64, scratch_operands = 0 : i64, tpu.core_type = #tpu.core_type<tc>, window_params = [{transform_indices = @transform_0, window_bounds = array<i64: 1, 3, 256>}, {pipeline_mode = #tpu.pipeline_mode<synchronous>, transform_indices = @transform_1, window_bounds = array<i64: 6, 256>}, {pipeline_mode = #tpu.pipeline_mode<synchronous>, transform_indices = @transform_2, window_bounds = array<i64: 8, 8>}, {pipeline_mode = #tpu.pipeline_mode<synchronous>, transform_indices = @transform_3, window_bounds = array<i64: 16, 18>}, {pipeline_mode = #tpu.pipeline_mode<synchronous>, transform_indices = @transform_4, window_bounds = array<i64: 16, 1>}, {pipeline_mode = #tpu.pipeline_mode<synchronous>, transform_indices = @transform_5, window_bounds = array<i64: 16, 144>}, {pipeline_mode = #tpu.pipeline_mode<synchronous>, transform_indices = @transform_6, window_bounds = array<i64: 16, 1>}, {pipeline_mode = #tpu.pipeline_mode<synchronous>, transform_indices = @transform_7, window_bounds = array<i64: 25, 144>}, {pipeline_mode = #tpu.pipeline_mode<synchronous>, transform_indices = @transform_8, window_bounds = array<i64: 25, 1>}, {transform_indices = @transform_9, window_bounds = array<i64: 1, 1, 256>}, {transform_indices = @transform_10, window_bounds = array<i64: 1, 1, 256>}]} {
    %c0 = arith.constant 0 : index
    %c0_0 = arith.constant 0 : index
    %c0_1 = arith.constant 0 : index
    %0 = vector.load %arg1[%c0, %c0_0, %c0_1] : memref<1x3x256xf32, #tpu.memory_space<vmem>>, vector<1x3x256xf32>
    %1 = vector.shape_cast %0 : vector<1x3x256xf32> to vector<3x256xf32>
    %2 = vector.extract_strided_slice %1 {offsets = [0, 0], sizes = [1, 256], strides = [1, 1]} : vector<3x256xf32> to vector<1x256xf32>
    %3 = vector.extract_strided_slice %1 {offsets = [1, 0], sizes = [1, 256], strides = [1, 1]} : vector<3x256xf32> to vector<1x256xf32>
    %4 = vector.extract_strided_slice %1 {offsets = [2, 0], sizes = [1, 256], strides = [1, 1]} : vector<3x256xf32> to vector<1x256xf32>
    %c0_2 = arith.constant 0 : index
    %c0_3 = arith.constant 0 : index
    %5 = vector.load %arg2[%c0_2, %c0_3] : memref<6x256xf32, #tpu.memory_space<vmem>>, vector<1x256xf32>
    %c1 = arith.constant 1 : index
    %c0_4 = arith.constant 0 : index
    %6 = vector.load %arg2[%c1, %c0_4] : memref<6x256xf32, #tpu.memory_space<vmem>>, vector<1x256xf32>
    %c2 = arith.constant 2 : index
    %c0_5 = arith.constant 0 : index
    %7 = vector.load %arg2[%c2, %c0_5] : memref<6x256xf32, #tpu.memory_space<vmem>>, vector<1x256xf32>
    %c3 = arith.constant 3 : index
    %c0_6 = arith.constant 0 : index
    %8 = vector.load %arg2[%c3, %c0_6] : memref<6x256xf32, #tpu.memory_space<vmem>>, vector<1x256xf32>
    %c4 = arith.constant 4 : index
    %c0_7 = arith.constant 0 : index
    %9 = vector.load %arg2[%c4, %c0_7] : memref<6x256xf32, #tpu.memory_space<vmem>>, vector<1x256xf32>
    %c5 = arith.constant 5 : index
    %c0_8 = arith.constant 0 : index
    %10 = vector.load %arg2[%c5, %c0_8] : memref<6x256xf32, #tpu.memory_space<vmem>>, vector<1x256xf32>
    %11 = arith.mulf %6, %3 : vector<1x256xf32>
    %12 = arith.mulf %6, %4 : vector<1x256xf32>
    %13 = tpu.concatenate %11, %12 in 0 : vector<1x256xf32>, vector<1x256xf32> -> vector<2x256xf32>
    %c0_9 = arith.constant 0 : index
    %c0_10 = arith.constant 0 : index
    %14 = vector.load %arg4[%c0_9, %c0_10] : memref<16x18xf32, #tpu.memory_space<vmem>>, vector<16x18xf32>
    %15 = vector.shape_cast %7 : vector<1x256xf32> to vector<1x256xf32>
    %16 = vector.broadcast %15 : vector<1x256xf32> to vector<2x256xf32>
    %cst = arith.constant 5.000000e-01 : f32
    %17 = vector.broadcast %cst : f32 to vector<2x256xf32>
    %18 = arith.cmpf ogt, %16, %17 : vector<2x256xf32>
    %19 = vector.shape_cast %8 : vector<1x256xf32> to vector<1x256xf32>
    %20 = vector.broadcast %19 : vector<1x256xf32> to vector<2x256xf32>
    %cst_11 = arith.constant 5.000000e-01 : f32
    %21 = vector.broadcast %cst_11 : f32 to vector<2x256xf32>
    %22 = arith.cmpf ogt, %20, %21 : vector<2x256xf32>
    %23 = vector.shape_cast %9 : vector<1x256xf32> to vector<1x256xf32>
    %24 = vector.broadcast %23 : vector<1x256xf32> to vector<2x256xf32>
    %cst_12 = arith.constant 5.000000e-01 : f32
    %25 = vector.broadcast %cst_12 : f32 to vector<2x256xf32>
    %26 = arith.cmpf ogt, %24, %25 : vector<2x256xf32>
    %27 = vector.shape_cast %10 : vector<1x256xf32> to vector<1x256xf32>
    %28 = vector.broadcast %27 : vector<1x256xf32> to vector<2x256xf32>
    %cst_13 = arith.constant 5.000000e-01 : f32
    %29 = vector.broadcast %cst_13 : f32 to vector<2x256xf32>
    %30 = arith.cmpf ogt, %28, %29 : vector<2x256xf32>
    %c241_i32 = arith.constant 241 : i32
    %31 = tpu.dynamic_rotate %13 by %c241_i32 dim 1 : vector<2x256xf32>, i32 -> vector<2x256xf32>
    %c1_i32 = arith.constant 1 : i32
    %32 = tpu.dynamic_rotate %13 by %c1_i32 dim 1 : vector<2x256xf32>, i32 -> vector<2x256xf32>
    %33 = arith.select %18, %31, %32 : vector<2x256xi1>, vector<2x256xf32>
    %c15_i32 = arith.constant 15 : i32
    %34 = tpu.dynamic_rotate %13 by %c15_i32 dim 1 : vector<2x256xf32>, i32 -> vector<2x256xf32>
    %c255_i32 = arith.constant 255 : i32
    %35 = tpu.dynamic_rotate %13 by %c255_i32 dim 1 : vector<2x256xf32>, i32 -> vector<2x256xf32>
    %36 = arith.select %22, %34, %35 : vector<2x256xi1>, vector<2x256xf32>
    %c16_i32 = arith.constant 16 : i32
    %37 = tpu.dynamic_rotate %33 by %c16_i32 dim 1 : vector<2x256xf32>, i32 -> vector<2x256xf32>
    %c16_i32_14 = arith.constant 16 : i32
    %38 = tpu.dynamic_rotate %33 by %c16_i32_14 dim 1 : vector<2x256xf32>, i32 -> vector<2x256xf32>
    %39 = arith.select %26, %37, %38 : vector<2x256xi1>, vector<2x256xf32>
    %40 = vector.extract_strided_slice %14 {offsets = [0, 0], sizes = [16, 2], strides = [1, 1]} : vector<16x18xf32> to vector<16x2xf32>
    %cst_15 = arith.constant dense<0.000000e+00> : vector<16x256xf32>
    %41 = tpu.matmul %40, %39, %cst_15 {dimension_numbers = #tpu.dot_dimension_numbers<[1], [0], [0], [1], [0, 0, 1, 1], [], []>} : vector<16x2xf32>, vector<2x256xf32>, vector<16x256xf32> -> vector<16x256xf32>
    %c16_i32_16 = arith.constant 16 : i32
    %42 = tpu.dynamic_rotate %13 by %c16_i32_16 dim 1 : vector<2x256xf32>, i32 -> vector<2x256xf32>
    %c16_i32_17 = arith.constant 16 : i32
    %43 = tpu.dynamic_rotate %13 by %c16_i32_17 dim 1 : vector<2x256xf32>, i32 -> vector<2x256xf32>
    %44 = arith.select %26, %42, %43 : vector<2x256xi1>, vector<2x256xf32>
    %45 = vector.extract_strided_slice %14 {offsets = [0, 2], sizes = [16, 2], strides = [1, 1]} : vector<16x18xf32> to vector<16x2xf32>
    %cst_18 = arith.constant dense<0.000000e+00> : vector<16x256xf32>
    %46 = tpu.matmul %45, %44, %cst_18 {dimension_numbers = #tpu.dot_dimension_numbers<[1], [0], [0], [1], [0, 0, 1, 1], [], []>} : vector<16x2xf32>, vector<2x256xf32>, vector<16x256xf32> -> vector<16x256xf32>
    %47 = arith.addf %41, %46 : vector<16x256xf32>
    %c16_i32_19 = arith.constant 16 : i32
    %48 = tpu.dynamic_rotate %36 by %c16_i32_19 dim 1 : vector<2x256xf32>, i32 -> vector<2x256xf32>
    %c16_i32_20 = arith.constant 16 : i32
    %49 = tpu.dynamic_rotate %36 by %c16_i32_20 dim 1 : vector<2x256xf32>, i32 -> vector<2x256xf32>
    %50 = arith.select %26, %48, %49 : vector<2x256xi1>, vector<2x256xf32>
    %51 = vector.extract_strided_slice %14 {offsets = [0, 4], sizes = [16, 2], strides = [1, 1]} : vector<16x18xf32> to vector<16x2xf32>
    %cst_21 = arith.constant dense<0.000000e+00> : vector<16x256xf32>
    %52 = tpu.matmul %51, %50, %cst_21 {dimension_numbers = #tpu.dot_dimension_numbers<[1], [0], [0], [1], [0, 0, 1, 1], [], []>} : vector<16x2xf32>, vector<2x256xf32>, vector<16x256xf32> -> vector<16x256xf32>
    %53 = arith.addf %47, %52 : vector<16x256xf32>
    %54 = vector.extract_strided_slice %14 {offsets = [0, 6], sizes = [16, 2], strides = [1, 1]} : vector<16x18xf32> to vector<16x2xf32>
    %cst_22 = arith.constant dense<0.000000e+00> : vector<16x256xf32>
    %55 = tpu.matmul %54, %33, %cst_22 {dimension_numbers = #tpu.dot_dimension_numbers<[1], [0], [0], [1], [0, 0, 1, 1], [], []>} : vector<16x2xf32>, vector<2x256xf32>, vector<16x256xf32> -> vector<16x256xf32>
    %56 = arith.addf %53, %55 : vector<16x256xf32>
    %57 = vector.extract_strided_slice %14 {offsets = [0, 8], sizes = [16, 2], strides = [1, 1]} : vector<16x18xf32> to vector<16x2xf32>
    %cst_23 = arith.constant dense<0.000000e+00> : vector<16x256xf32>
    %58 = tpu.matmul %57, %13, %cst_23 {dimension_numbers = #tpu.dot_dimension_numbers<[1], [0], [0], [1], [0, 0, 1, 1], [], []>} : vector<16x2xf32>, vector<2x256xf32>, vector<16x256xf32> -> vector<16x256xf32>
    %59 = arith.addf %56, %58 : vector<16x256xf32>
    %60 = vector.extract_strided_slice %14 {offsets = [0, 10], sizes = [16, 2], strides = [1, 1]} : vector<16x18xf32> to vector<16x2xf32>
    %cst_24 = arith.constant dense<0.000000e+00> : vector<16x256xf32>
    %61 = tpu.matmul %60, %36, %cst_24 {dimension_numbers = #tpu.dot_dimension_numbers<[1], [0], [0], [1], [0, 0, 1, 1], [], []>} : vector<16x2xf32>, vector<2x256xf32>, vector<16x256xf32> -> vector<16x256xf32>
    %62 = arith.addf %59, %61 : vector<16x256xf32>
    %c240_i32 = arith.constant 240 : i32
    %63 = tpu.dynamic_rotate %33 by %c240_i32 dim 1 : vector<2x256xf32>, i32 -> vector<2x256xf32>
    %c240_i32_25 = arith.constant 240 : i32
    %64 = tpu.dynamic_rotate %33 by %c240_i32_25 dim 1 : vector<2x256xf32>, i32 -> vector<2x256xf32>
    %65 = arith.select %30, %63, %64 : vector<2x256xi1>, vector<2x256xf32>
    %66 = vector.extract_strided_slice %14 {offsets = [0, 12], sizes = [16, 2], strides = [1, 1]} : vector<16x18xf32> to vector<16x2xf32>
    %cst_26 = arith.constant dense<0.000000e+00> : vector<16x256xf32>
    %67 = tpu.matmul %66, %65, %cst_26 {dimension_numbers = #tpu.dot_dimension_numbers<[1], [0], [0], [1], [0, 0, 1, 1], [], []>} : vector<16x2xf32>, vector<2x256xf32>, vector<16x256xf32> -> vector<16x256xf32>
    %68 = arith.addf %62, %67 : vector<16x256xf32>
    %c240_i32_27 = arith.constant 240 : i32
    %69 = tpu.dynamic_rotate %13 by %c240_i32_27 dim 1 : vector<2x256xf32>, i32 -> vector<2x256xf32>
    %c240_i32_28 = arith.constant 240 : i32
    %70 = tpu.dynamic_rotate %13 by %c240_i32_28 dim 1 : vector<2x256xf32>, i32 -> vector<2x256xf32>
    %71 = arith.select %30, %69, %70 : vector<2x256xi1>, vector<2x256xf32>
    %72 = vector.extract_strided_slice %14 {offsets = [0, 14], sizes = [16, 2], strides = [1, 1]} : vector<16x18xf32> to vector<16x2xf32>
    %cst_29 = arith.constant dense<0.000000e+00> : vector<16x256xf32>
    %73 = tpu.matmul %72, %71, %cst_29 {dimension_numbers = #tpu.dot_dimension_numbers<[1], [0], [0], [1], [0, 0, 1, 1], [], []>} : vector<16x2xf32>, vector<2x256xf32>, vector<16x256xf32> -> vector<16x256xf32>
    %74 = arith.addf %68, %73 : vector<16x256xf32>
    %c240_i32_30 = arith.constant 240 : i32
    %75 = tpu.dynamic_rotate %36 by %c240_i32_30 dim 1 : vector<2x256xf32>, i32 -> vector<2x256xf32>
    %c240_i32_31 = arith.constant 240 : i32
    %76 = tpu.dynamic_rotate %36 by %c240_i32_31 dim 1 : vector<2x256xf32>, i32 -> vector<2x256xf32>
    %77 = arith.select %30, %75, %76 : vector<2x256xi1>, vector<2x256xf32>
    %78 = vector.extract_strided_slice %14 {offsets = [0, 16], sizes = [16, 2], strides = [1, 1]} : vector<16x18xf32> to vector<16x2xf32>
    %cst_32 = arith.constant dense<0.000000e+00> : vector<16x256xf32>
    %79 = tpu.matmul %78, %77, %cst_32 {dimension_numbers = #tpu.dot_dimension_numbers<[1], [0], [0], [1], [0, 0, 1, 1], [], []>} : vector<16x2xf32>, vector<2x256xf32>, vector<16x256xf32> -> vector<16x256xf32>
    %80 = arith.addf %74, %79 : vector<16x256xf32>
    %c0_33 = arith.constant 0 : index
    %c0_34 = arith.constant 0 : index
    %81 = vector.load %arg5[%c0_33, %c0_34] : memref<16x1xf32, #tpu.memory_space<vmem>>, vector<16x1xf32>
    %82 = vector.broadcast %81 : vector<16x1xf32> to vector<16x256xf32>
    %83 = arith.addf %80, %82 : vector<16x256xf32>
    %cst_35 = arith.constant 5.000000e-01 : f32
    %84 = vector.broadcast %cst_35 : f32 to vector<16x256xf32>
    %85 = arith.mulf %84, %83 : vector<16x256xf32>
    %cst_36 = arith.constant 4.471500e-02 : f32
    %86 = vector.broadcast %cst_36 : f32 to vector<16x256xf32>
    %87 = arith.mulf %86, %83 : vector<16x256xf32>
    %88 = arith.mulf %87, %83 : vector<16x256xf32>
    %89 = arith.mulf %88, %83 : vector<16x256xf32>
    %90 = arith.addf %83, %89 : vector<16x256xf32>
    %cst_37 = arith.constant 0.797884583 : f32
    %91 = vector.broadcast %cst_37 : f32 to vector<16x256xf32>
    %92 = arith.mulf %91, %90 : vector<16x256xf32>
    %93 = math.tanh %92 : vector<16x256xf32>
    %cst_38 = arith.constant 1.000000e+00 : f32
    %94 = vector.broadcast %cst_38 : f32 to vector<16x256xf32>
    %95 = arith.addf %94, %93 : vector<16x256xf32>
    %96 = arith.mulf %85, %95 : vector<16x256xf32>
    %c0_39 = arith.constant 0 : index
    %c0_40 = arith.constant 0 : index
    %97 = vector.load %arg6[%c0_39, %c0_40] : memref<16x144xf32, #tpu.memory_space<vmem>>, vector<16x144xf32>
    %98 = vector.shape_cast %7 : vector<1x256xf32> to vector<1x256xf32>
    %99 = vector.broadcast %98 : vector<1x256xf32> to vector<16x256xf32>
    %cst_41 = arith.constant 5.000000e-01 : f32
    %100 = vector.broadcast %cst_41 : f32 to vector<16x256xf32>
    %101 = arith.cmpf ogt, %99, %100 : vector<16x256xf32>
    %102 = vector.shape_cast %8 : vector<1x256xf32> to vector<1x256xf32>
    %103 = vector.broadcast %102 : vector<1x256xf32> to vector<16x256xf32>
    %cst_42 = arith.constant 5.000000e-01 : f32
    %104 = vector.broadcast %cst_42 : f32 to vector<16x256xf32>
    %105 = arith.cmpf ogt, %103, %104 : vector<16x256xf32>
    %106 = vector.shape_cast %9 : vector<1x256xf32> to vector<1x256xf32>
    %107 = vector.broadcast %106 : vector<1x256xf32> to vector<16x256xf32>
    %cst_43 = arith.constant 5.000000e-01 : f32
    %108 = vector.broadcast %cst_43 : f32 to vector<16x256xf32>
    %109 = arith.cmpf ogt, %107, %108 : vector<16x256xf32>
    %110 = vector.shape_cast %10 : vector<1x256xf32> to vector<1x256xf32>
    %111 = vector.broadcast %110 : vector<1x256xf32> to vector<16x256xf32>
    %cst_44 = arith.constant 5.000000e-01 : f32
    %112 = vector.broadcast %cst_44 : f32 to vector<16x256xf32>
    %113 = arith.cmpf ogt, %111, %112 : vector<16x256xf32>
    %c241_i32_45 = arith.constant 241 : i32
    %114 = tpu.dynamic_rotate %96 by %c241_i32_45 dim 1 : vector<16x256xf32>, i32 -> vector<16x256xf32>
    %c1_i32_46 = arith.constant 1 : i32
    %115 = tpu.dynamic_rotate %96 by %c1_i32_46 dim 1 : vector<16x256xf32>, i32 -> vector<16x256xf32>
    %116 = arith.select %101, %114, %115 : vector<16x256xi1>, vector<16x256xf32>
    %c15_i32_47 = arith.constant 15 : i32
    %117 = tpu.dynamic_rotate %96 by %c15_i32_47 dim 1 : vector<16x256xf32>, i32 -> vector<16x256xf32>
    %c255_i32_48 = arith.constant 255 : i32
    %118 = tpu.dynamic_rotate %96 by %c255_i32_48 dim 1 : vector<16x256xf32>, i32 -> vector<16x256xf32>
    %119 = arith.select %105, %117, %118 : vector<16x256xi1>, vector<16x256xf32>
    %c16_i32_49 = arith.constant 16 : i32
    %120 = tpu.dynamic_rotate %116 by %c16_i32_49 dim 1 : vector<16x256xf32>, i32 -> vector<16x256xf32>
    %c16_i32_50 = arith.constant 16 : i32
    %121 = tpu.dynamic_rotate %116 by %c16_i32_50 dim 1 : vector<16x256xf32>, i32 -> vector<16x256xf32>
    %122 = arith.select %109, %120, %121 : vector<16x256xi1>, vector<16x256xf32>
    %123 = vector.extract_strided_slice %97 {offsets = [0, 0], sizes = [16, 16], strides = [1, 1]} : vector<16x144xf32> to vector<16x16xf32>
    %cst_51 = arith.constant dense<0.000000e+00> : vector<16x256xf32>
    %124 = tpu.matmul %123, %122, %cst_51 {dimension_numbers = #tpu.dot_dimension_numbers<[1], [0], [0], [1], [0, 0, 1, 1], [], []>} : vector<16x16xf32>, vector<16x256xf32>, vector<16x256xf32> -> vector<16x256xf32>
    %c16_i32_52 = arith.constant 16 : i32
    %125 = tpu.dynamic_rotate %96 by %c16_i32_52 dim 1 : vector<16x256xf32>, i32 -> vector<16x256xf32>
    %c16_i32_53 = arith.constant 16 : i32
    %126 = tpu.dynamic_rotate %96 by %c16_i32_53 dim 1 : vector<16x256xf32>, i32 -> vector<16x256xf32>
    %127 = arith.select %109, %125, %126 : vector<16x256xi1>, vector<16x256xf32>
    %128 = vector.extract_strided_slice %97 {offsets = [0, 16], sizes = [16, 16], strides = [1, 1]} : vector<16x144xf32> to vector<16x16xf32>
    %cst_54 = arith.constant dense<0.000000e+00> : vector<16x256xf32>
    %129 = tpu.matmul %128, %127, %cst_54 {dimension_numbers = #tpu.dot_dimension_numbers<[1], [0], [0], [1], [0, 0, 1, 1], [], []>} : vector<16x16xf32>, vector<16x256xf32>, vector<16x256xf32> -> vector<16x256xf32>
    %130 = arith.addf %124, %129 : vector<16x256xf32>
    %c16_i32_55 = arith.constant 16 : i32
    %131 = tpu.dynamic_rotate %119 by %c16_i32_55 dim 1 : vector<16x256xf32>, i32 -> vector<16x256xf32>
    %c16_i32_56 = arith.constant 16 : i32
    %132 = tpu.dynamic_rotate %119 by %c16_i32_56 dim 1 : vector<16x256xf32>, i32 -> vector<16x256xf32>
    %133 = arith.select %109, %131, %132 : vector<16x256xi1>, vector<16x256xf32>
    %134 = vector.extract_strided_slice %97 {offsets = [0, 32], sizes = [16, 16], strides = [1, 1]} : vector<16x144xf32> to vector<16x16xf32>
    %cst_57 = arith.constant dense<0.000000e+00> : vector<16x256xf32>
    %135 = tpu.matmul %134, %133, %cst_57 {dimension_numbers = #tpu.dot_dimension_numbers<[1], [0], [0], [1], [0, 0, 1, 1], [], []>} : vector<16x16xf32>, vector<16x256xf32>, vector<16x256xf32> -> vector<16x256xf32>
    %136 = arith.addf %130, %135 : vector<16x256xf32>
    %137 = vector.extract_strided_slice %97 {offsets = [0, 48], sizes = [16, 16], strides = [1, 1]} : vector<16x144xf32> to vector<16x16xf32>
    %cst_58 = arith.constant dense<0.000000e+00> : vector<16x256xf32>
    %138 = tpu.matmul %137, %116, %cst_58 {dimension_numbers = #tpu.dot_dimension_numbers<[1], [0], [0], [1], [0, 0, 1, 1], [], []>} : vector<16x16xf32>, vector<16x256xf32>, vector<16x256xf32> -> vector<16x256xf32>
    %139 = arith.addf %136, %138 : vector<16x256xf32>
    %140 = vector.extract_strided_slice %97 {offsets = [0, 64], sizes = [16, 16], strides = [1, 1]} : vector<16x144xf32> to vector<16x16xf32>
    %cst_59 = arith.constant dense<0.000000e+00> : vector<16x256xf32>
    %141 = tpu.matmul %140, %96, %cst_59 {dimension_numbers = #tpu.dot_dimension_numbers<[1], [0], [0], [1], [0, 0, 1, 1], [], []>} : vector<16x16xf32>, vector<16x256xf32>, vector<16x256xf32> -> vector<16x256xf32>
    %142 = arith.addf %139, %141 : vector<16x256xf32>
    %143 = vector.extract_strided_slice %97 {offsets = [0, 80], sizes = [16, 16], strides = [1, 1]} : vector<16x144xf32> to vector<16x16xf32>
    %cst_60 = arith.constant dense<0.000000e+00> : vector<16x256xf32>
    %144 = tpu.matmul %143, %119, %cst_60 {dimension_numbers = #tpu.dot_dimension_numbers<[1], [0], [0], [1], [0, 0, 1, 1], [], []>} : vector<16x16xf32>, vector<16x256xf32>, vector<16x256xf32> -> vector<16x256xf32>
    %145 = arith.addf %142, %144 : vector<16x256xf32>
    %c240_i32_61 = arith.constant 240 : i32
    %146 = tpu.dynamic_rotate %116 by %c240_i32_61 dim 1 : vector<16x256xf32>, i32 -> vector<16x256xf32>
    %c240_i32_62 = arith.constant 240 : i32
    %147 = tpu.dynamic_rotate %116 by %c240_i32_62 dim 1 : vector<16x256xf32>, i32 -> vector<16x256xf32>
    %148 = arith.select %113, %146, %147 : vector<16x256xi1>, vector<16x256xf32>
    %149 = vector.extract_strided_slice %97 {offsets = [0, 96], sizes = [16, 16], strides = [1, 1]} : vector<16x144xf32> to vector<16x16xf32>
    %cst_63 = arith.constant dense<0.000000e+00> : vector<16x256xf32>
    %150 = tpu.matmul %149, %148, %cst_63 {dimension_numbers = #tpu.dot_dimension_numbers<[1], [0], [0], [1], [0, 0, 1, 1], [], []>} : vector<16x16xf32>, vector<16x256xf32>, vector<16x256xf32> -> vector<16x256xf32>
    %151 = arith.addf %145, %150 : vector<16x256xf32>
    %c240_i32_64 = arith.constant 240 : i32
    %152 = tpu.dynamic_rotate %96 by %c240_i32_64 dim 1 : vector<16x256xf32>, i32 -> vector<16x256xf32>
    %c240_i32_65 = arith.constant 240 : i32
    %153 = tpu.dynamic_rotate %96 by %c240_i32_65 dim 1 : vector<16x256xf32>, i32 -> vector<16x256xf32>
    %154 = arith.select %113, %152, %153 : vector<16x256xi1>, vector<16x256xf32>
    %155 = vector.extract_strided_slice %97 {offsets = [0, 112], sizes = [16, 16], strides = [1, 1]} : vector<16x144xf32> to vector<16x16xf32>
    %cst_66 = arith.constant dense<0.000000e+00> : vector<16x256xf32>
    %156 = tpu.matmul %155, %154, %cst_66 {dimension_numbers = #tpu.dot_dimension_numbers<[1], [0], [0], [1], [0, 0, 1, 1], [], []>} : vector<16x16xf32>, vector<16x256xf32>, vector<16x256xf32> -> vector<16x256xf32>
    %157 = arith.addf %151, %156 : vector<16x256xf32>
    %c240_i32_67 = arith.constant 240 : i32
    %158 = tpu.dynamic_rotate %119 by %c240_i32_67 dim 1 : vector<16x256xf32>, i32 -> vector<16x256xf32>
    %c240_i32_68 = arith.constant 240 : i32
    %159 = tpu.dynamic_rotate %119 by %c240_i32_68 dim 1 : vector<16x256xf32>, i32 -> vector<16x256xf32>
    %160 = arith.select %113, %158, %159 : vector<16x256xi1>, vector<16x256xf32>
    %161 = vector.extract_strided_slice %97 {offsets = [0, 128], sizes = [16, 16], strides = [1, 1]} : vector<16x144xf32> to vector<16x16xf32>
    %cst_69 = arith.constant dense<0.000000e+00> : vector<16x256xf32>
    %162 = tpu.matmul %161, %160, %cst_69 {dimension_numbers = #tpu.dot_dimension_numbers<[1], [0], [0], [1], [0, 0, 1, 1], [], []>} : vector<16x16xf32>, vector<16x256xf32>, vector<16x256xf32> -> vector<16x256xf32>
    %163 = arith.addf %157, %162 : vector<16x256xf32>
    %c0_70 = arith.constant 0 : index
    %c0_71 = arith.constant 0 : index
    %164 = vector.load %arg7[%c0_70, %c0_71] : memref<16x1xf32, #tpu.memory_space<vmem>>, vector<16x1xf32>
    %165 = vector.broadcast %164 : vector<16x1xf32> to vector<16x256xf32>
    %166 = arith.addf %163, %165 : vector<16x256xf32>
    %cst_72 = arith.constant 5.000000e-01 : f32
    %167 = vector.broadcast %cst_72 : f32 to vector<16x256xf32>
    %168 = arith.mulf %167, %166 : vector<16x256xf32>
    %cst_73 = arith.constant 4.471500e-02 : f32
    %169 = vector.broadcast %cst_73 : f32 to vector<16x256xf32>
    %170 = arith.mulf %169, %166 : vector<16x256xf32>
    %171 = arith.mulf %170, %166 : vector<16x256xf32>
    %172 = arith.mulf %171, %166 : vector<16x256xf32>
    %173 = arith.addf %166, %172 : vector<16x256xf32>
    %cst_74 = arith.constant 0.797884583 : f32
    %174 = vector.broadcast %cst_74 : f32 to vector<16x256xf32>
    %175 = arith.mulf %174, %173 : vector<16x256xf32>
    %176 = math.tanh %175 : vector<16x256xf32>
    %cst_75 = arith.constant 1.000000e+00 : f32
    %177 = vector.broadcast %cst_75 : f32 to vector<16x256xf32>
    %178 = arith.addf %177, %176 : vector<16x256xf32>
    %179 = arith.mulf %168, %178 : vector<16x256xf32>
    %c0_76 = arith.constant 0 : index
    %c0_77 = arith.constant 0 : index
    %180 = vector.load %arg8[%c0_76, %c0_77] : memref<25x144xf32, #tpu.memory_space<vmem>>, vector<25x144xf32>
    %181 = vector.shape_cast %7 : vector<1x256xf32> to vector<1x256xf32>
    %182 = vector.broadcast %181 : vector<1x256xf32> to vector<16x256xf32>
    %cst_78 = arith.constant 5.000000e-01 : f32
    %183 = vector.broadcast %cst_78 : f32 to vector<16x256xf32>
    %184 = arith.cmpf ogt, %182, %183 : vector<16x256xf32>
    %185 = vector.shape_cast %8 : vector<1x256xf32> to vector<1x256xf32>
    %186 = vector.broadcast %185 : vector<1x256xf32> to vector<16x256xf32>
    %cst_79 = arith.constant 5.000000e-01 : f32
    %187 = vector.broadcast %cst_79 : f32 to vector<16x256xf32>
    %188 = arith.cmpf ogt, %186, %187 : vector<16x256xf32>
    %189 = vector.shape_cast %9 : vector<1x256xf32> to vector<1x256xf32>
    %190 = vector.broadcast %189 : vector<1x256xf32> to vector<16x256xf32>
    %cst_80 = arith.constant 5.000000e-01 : f32
    %191 = vector.broadcast %cst_80 : f32 to vector<16x256xf32>
    %192 = arith.cmpf ogt, %190, %191 : vector<16x256xf32>
    %193 = vector.shape_cast %10 : vector<1x256xf32> to vector<1x256xf32>
    %194 = vector.broadcast %193 : vector<1x256xf32> to vector<16x256xf32>
    %cst_81 = arith.constant 5.000000e-01 : f32
    %195 = vector.broadcast %cst_81 : f32 to vector<16x256xf32>
    %196 = arith.cmpf ogt, %194, %195 : vector<16x256xf32>
    %c241_i32_82 = arith.constant 241 : i32
    %197 = tpu.dynamic_rotate %179 by %c241_i32_82 dim 1 : vector<16x256xf32>, i32 -> vector<16x256xf32>
    %c1_i32_83 = arith.constant 1 : i32
    %198 = tpu.dynamic_rotate %179 by %c1_i32_83 dim 1 : vector<16x256xf32>, i32 -> vector<16x256xf32>
    %199 = arith.select %184, %197, %198 : vector<16x256xi1>, vector<16x256xf32>
    %c15_i32_84 = arith.constant 15 : i32
    %200 = tpu.dynamic_rotate %179 by %c15_i32_84 dim 1 : vector<16x256xf32>, i32 -> vector<16x256xf32>
    %c255_i32_85 = arith.constant 255 : i32
    %201 = tpu.dynamic_rotate %179 by %c255_i32_85 dim 1 : vector<16x256xf32>, i32 -> vector<16x256xf32>
    %202 = arith.select %188, %200, %201 : vector<16x256xi1>, vector<16x256xf32>
    %c16_i32_86 = arith.constant 16 : i32
    %203 = tpu.dynamic_rotate %199 by %c16_i32_86 dim 1 : vector<16x256xf32>, i32 -> vector<16x256xf32>
    %c16_i32_87 = arith.constant 16 : i32
    %204 = tpu.dynamic_rotate %199 by %c16_i32_87 dim 1 : vector<16x256xf32>, i32 -> vector<16x256xf32>
    %205 = arith.select %192, %203, %204 : vector<16x256xi1>, vector<16x256xf32>
    %206 = vector.extract_strided_slice %180 {offsets = [0, 0], sizes = [25, 16], strides = [1, 1]} : vector<25x144xf32> to vector<25x16xf32>
    %cst_88 = arith.constant dense<0.000000e+00> : vector<25x256xf32>
    %207 = tpu.matmul %206, %205, %cst_88 {dimension_numbers = #tpu.dot_dimension_numbers<[1], [0], [0], [1], [0, 0, 1, 1], [], []>} : vector<25x16xf32>, vector<16x256xf32>, vector<25x256xf32> -> vector<25x256xf32>
    %c16_i32_89 = arith.constant 16 : i32
    %208 = tpu.dynamic_rotate %179 by %c16_i32_89 dim 1 : vector<16x256xf32>, i32 -> vector<16x256xf32>
    %c16_i32_90 = arith.constant 16 : i32
    %209 = tpu.dynamic_rotate %179 by %c16_i32_90 dim 1 : vector<16x256xf32>, i32 -> vector<16x256xf32>
    %210 = arith.select %192, %208, %209 : vector<16x256xi1>, vector<16x256xf32>
    %211 = vector.extract_strided_slice %180 {offsets = [0, 16], sizes = [25, 16], strides = [1, 1]} : vector<25x144xf32> to vector<25x16xf32>
    %cst_91 = arith.constant dense<0.000000e+00> : vector<25x256xf32>
    %212 = tpu.matmul %211, %210, %cst_91 {dimension_numbers = #tpu.dot_dimension_numbers<[1], [0], [0], [1], [0, 0, 1, 1], [], []>} : vector<25x16xf32>, vector<16x256xf32>, vector<25x256xf32> -> vector<25x256xf32>
    %213 = arith.addf %207, %212 : vector<25x256xf32>
    %c16_i32_92 = arith.constant 16 : i32
    %214 = tpu.dynamic_rotate %202 by %c16_i32_92 dim 1 : vector<16x256xf32>, i32 -> vector<16x256xf32>
    %c16_i32_93 = arith.constant 16 : i32
    %215 = tpu.dynamic_rotate %202 by %c16_i32_93 dim 1 : vector<16x256xf32>, i32 -> vector<16x256xf32>
    %216 = arith.select %192, %214, %215 : vector<16x256xi1>, vector<16x256xf32>
    %217 = vector.extract_strided_slice %180 {offsets = [0, 32], sizes = [25, 16], strides = [1, 1]} : vector<25x144xf32> to vector<25x16xf32>
    %cst_94 = arith.constant dense<0.000000e+00> : vector<25x256xf32>
    %218 = tpu.matmul %217, %216, %cst_94 {dimension_numbers = #tpu.dot_dimension_numbers<[1], [0], [0], [1], [0, 0, 1, 1], [], []>} : vector<25x16xf32>, vector<16x256xf32>, vector<25x256xf32> -> vector<25x256xf32>
    %219 = arith.addf %213, %218 : vector<25x256xf32>
    %220 = vector.extract_strided_slice %180 {offsets = [0, 48], sizes = [25, 16], strides = [1, 1]} : vector<25x144xf32> to vector<25x16xf32>
    %cst_95 = arith.constant dense<0.000000e+00> : vector<25x256xf32>
    %221 = tpu.matmul %220, %199, %cst_95 {dimension_numbers = #tpu.dot_dimension_numbers<[1], [0], [0], [1], [0, 0, 1, 1], [], []>} : vector<25x16xf32>, vector<16x256xf32>, vector<25x256xf32> -> vector<25x256xf32>
    %222 = arith.addf %219, %221 : vector<25x256xf32>
    %223 = vector.extract_strided_slice %180 {offsets = [0, 64], sizes = [25, 16], strides = [1, 1]} : vector<25x144xf32> to vector<25x16xf32>
    %cst_96 = arith.constant dense<0.000000e+00> : vector<25x256xf32>
    %224 = tpu.matmul %223, %179, %cst_96 {dimension_numbers = #tpu.dot_dimension_numbers<[1], [0], [0], [1], [0, 0, 1, 1], [], []>} : vector<25x16xf32>, vector<16x256xf32>, vector<25x256xf32> -> vector<25x256xf32>
    %225 = arith.addf %222, %224 : vector<25x256xf32>
    %226 = vector.extract_strided_slice %180 {offsets = [0, 80], sizes = [25, 16], strides = [1, 1]} : vector<25x144xf32> to vector<25x16xf32>
    %cst_97 = arith.constant dense<0.000000e+00> : vector<25x256xf32>
    %227 = tpu.matmul %226, %202, %cst_97 {dimension_numbers = #tpu.dot_dimension_numbers<[1], [0], [0], [1], [0, 0, 1, 1], [], []>} : vector<25x16xf32>, vector<16x256xf32>, vector<25x256xf32> -> vector<25x256xf32>
    %228 = arith.addf %225, %227 : vector<25x256xf32>
    %c240_i32_98 = arith.constant 240 : i32
    %229 = tpu.dynamic_rotate %199 by %c240_i32_98 dim 1 : vector<16x256xf32>, i32 -> vector<16x256xf32>
    %c240_i32_99 = arith.constant 240 : i32
    %230 = tpu.dynamic_rotate %199 by %c240_i32_99 dim 1 : vector<16x256xf32>, i32 -> vector<16x256xf32>
    %231 = arith.select %196, %229, %230 : vector<16x256xi1>, vector<16x256xf32>
    %232 = vector.extract_strided_slice %180 {offsets = [0, 96], sizes = [25, 16], strides = [1, 1]} : vector<25x144xf32> to vector<25x16xf32>
    %cst_100 = arith.constant dense<0.000000e+00> : vector<25x256xf32>
    %233 = tpu.matmul %232, %231, %cst_100 {dimension_numbers = #tpu.dot_dimension_numbers<[1], [0], [0], [1], [0, 0, 1, 1], [], []>} : vector<25x16xf32>, vector<16x256xf32>, vector<25x256xf32> -> vector<25x256xf32>
    %234 = arith.addf %228, %233 : vector<25x256xf32>
    %c240_i32_101 = arith.constant 240 : i32
    %235 = tpu.dynamic_rotate %179 by %c240_i32_101 dim 1 : vector<16x256xf32>, i32 -> vector<16x256xf32>
    %c240_i32_102 = arith.constant 240 : i32
    %236 = tpu.dynamic_rotate %179 by %c240_i32_102 dim 1 : vector<16x256xf32>, i32 -> vector<16x256xf32>
    %237 = arith.select %196, %235, %236 : vector<16x256xi1>, vector<16x256xf32>
    %238 = vector.extract_strided_slice %180 {offsets = [0, 112], sizes = [25, 16], strides = [1, 1]} : vector<25x144xf32> to vector<25x16xf32>
    %cst_103 = arith.constant dense<0.000000e+00> : vector<25x256xf32>
    %239 = tpu.matmul %238, %237, %cst_103 {dimension_numbers = #tpu.dot_dimension_numbers<[1], [0], [0], [1], [0, 0, 1, 1], [], []>} : vector<25x16xf32>, vector<16x256xf32>, vector<25x256xf32> -> vector<25x256xf32>
    %240 = arith.addf %234, %239 : vector<25x256xf32>
    %c240_i32_104 = arith.constant 240 : i32
    %241 = tpu.dynamic_rotate %202 by %c240_i32_104 dim 1 : vector<16x256xf32>, i32 -> vector<16x256xf32>
    %c240_i32_105 = arith.constant 240 : i32
    %242 = tpu.dynamic_rotate %202 by %c240_i32_105 dim 1 : vector<16x256xf32>, i32 -> vector<16x256xf32>
    %243 = arith.select %196, %241, %242 : vector<16x256xi1>, vector<16x256xf32>
    %244 = vector.extract_strided_slice %180 {offsets = [0, 128], sizes = [25, 16], strides = [1, 1]} : vector<25x144xf32> to vector<25x16xf32>
    %cst_106 = arith.constant dense<0.000000e+00> : vector<25x256xf32>
    %245 = tpu.matmul %244, %243, %cst_106 {dimension_numbers = #tpu.dot_dimension_numbers<[1], [0], [0], [1], [0, 0, 1, 1], [], []>} : vector<25x16xf32>, vector<16x256xf32>, vector<25x256xf32> -> vector<25x256xf32>
    %246 = arith.addf %240, %245 : vector<25x256xf32>
    %c0_107 = arith.constant 0 : index
    %c0_108 = arith.constant 0 : index
    %247 = vector.load %arg9[%c0_107, %c0_108] : memref<25x1xf32, #tpu.memory_space<vmem>>, vector<25x1xf32>
    %248 = vector.broadcast %247 : vector<25x1xf32> to vector<25x256xf32>
    %249 = arith.addf %246, %248 : vector<25x256xf32>
    %250 = vector.extract_strided_slice %249 {offsets = [0, 0], sizes = [8, 256], strides = [1, 1]} : vector<25x256xf32> to vector<8x256xf32>
    %251 = vector.extract_strided_slice %249 {offsets = [8, 0], sizes = [8, 256], strides = [1, 1]} : vector<25x256xf32> to vector<8x256xf32>
    %252 = vector.extract_strided_slice %249 {offsets = [16, 0], sizes = [8, 256], strides = [1, 1]} : vector<25x256xf32> to vector<8x256xf32>
    %253 = vector.extract_strided_slice %249 {offsets = [24, 0], sizes = [1, 256], strides = [1, 1]} : vector<25x256xf32> to vector<1x256xf32>
    %cst_109 = arith.constant dense<0xFF800000> : vector<256xf32>
    %254 = vector.multi_reduction <maximumf>, %250, %cst_109 [0] : vector<8x256xf32> to vector<256xf32>
    %255 = vector.shape_cast %254 : vector<256xf32> to vector<1x256xf32>
    %256 = vector.broadcast %255 : vector<1x256xf32> to vector<8x256xf32>
    %257 = arith.subf %250, %256 : vector<8x256xf32>
    %258 = math.exp %257 : vector<8x256xf32>
    %cst_110 = arith.constant dense<0.000000e+00> : vector<256xf32>
    %259 = vector.multi_reduction <add>, %258, %cst_110 [0] : vector<8x256xf32> to vector<256xf32>
    %260 = vector.shape_cast %259 : vector<256xf32> to vector<1x256xf32>
    %261 = tpu.reciprocal %260 {approx = true} : vector<1x256xf32> -> vector<1x256xf32>
    %262 = arith.mulf %260, %261 : vector<1x256xf32>
    %cst_111 = arith.constant 2.000000e+00 : f32
    %263 = vector.broadcast %cst_111 : f32 to vector<1x256xf32>
    %264 = arith.subf %263, %262 : vector<1x256xf32>
    %265 = arith.mulf %261, %264 : vector<1x256xf32>
    %266 = vector.broadcast %265 : vector<1x256xf32> to vector<8x256xf32>
    %267 = arith.mulf %258, %266 : vector<8x256xf32>
    %cst_112 = arith.constant dense<0xFF800000> : vector<256xf32>
    %268 = vector.multi_reduction <maximumf>, %251, %cst_112 [0] : vector<8x256xf32> to vector<256xf32>
    %269 = vector.shape_cast %268 : vector<256xf32> to vector<1x256xf32>
    %270 = vector.broadcast %269 : vector<1x256xf32> to vector<8x256xf32>
    %271 = arith.subf %251, %270 : vector<8x256xf32>
    %272 = math.exp %271 : vector<8x256xf32>
    %cst_113 = arith.constant dense<0.000000e+00> : vector<256xf32>
    %273 = vector.multi_reduction <add>, %272, %cst_113 [0] : vector<8x256xf32> to vector<256xf32>
    %274 = vector.shape_cast %273 : vector<256xf32> to vector<1x256xf32>
    %275 = tpu.reciprocal %274 {approx = true} : vector<1x256xf32> -> vector<1x256xf32>
    %276 = arith.mulf %274, %275 : vector<1x256xf32>
    %cst_114 = arith.constant 2.000000e+00 : f32
    %277 = vector.broadcast %cst_114 : f32 to vector<1x256xf32>
    %278 = arith.subf %277, %276 : vector<1x256xf32>
    %279 = arith.mulf %275, %278 : vector<1x256xf32>
    %280 = vector.broadcast %279 : vector<1x256xf32> to vector<8x256xf32>
    %281 = arith.mulf %272, %280 : vector<8x256xf32>
    %cst_115 = arith.constant 0.000000e+00 : f32
    %282 = vector.broadcast %cst_115 : f32 to vector<8x256xf32>
    %283 = arith.maximumf %252, %282 : vector<8x256xf32>
    %284 = math.absf %252 : vector<8x256xf32>
    %cst_116 = arith.constant 0.000000e+00 : f32
    %285 = vector.broadcast %cst_116 : f32 to vector<8x256xf32>
    %286 = arith.subf %285, %284 : vector<8x256xf32>
    %287 = math.exp %286 : vector<8x256xf32>
    %cst_117 = arith.constant 1.000000e+00 : f32
    %288 = vector.broadcast %cst_117 : f32 to vector<8x256xf32>
    %289 = arith.addf %288, %287 : vector<8x256xf32>
    %290 = math.log %289 : vector<8x256xf32>
    %291 = arith.addf %283, %290 : vector<8x256xf32>
    %c0_118 = arith.constant 0 : index
    %c0_119 = arith.constant 0 : index
    %292 = vector.load %arg3[%c0_118, %c0_119] : memref<8x8xf32, #tpu.memory_space<vmem>>, vector<8x8xf32>
    %cst_120 = arith.constant dense<0.000000e+00> : vector<8x256xf32>
    %293 = tpu.matmul %292, %267, %cst_120 {dimension_numbers = #tpu.dot_dimension_numbers<[1], [0], [0], [1], [0, 0, 1, 1], [], []>} : vector<8x8xf32>, vector<8x256xf32>, vector<8x256xf32> -> vector<8x256xf32>
    %cst_121 = arith.constant 6.28318548 : f32
    %294 = vector.broadcast %cst_121 : f32 to vector<8x256xf32>
    %295 = arith.mulf %294, %293 : vector<8x256xf32>
    %cst_122 = arith.constant dense<0.000000e+00> : vector<8x256xf32>
    %296 = tpu.matmul %292, %281, %cst_122 {dimension_numbers = #tpu.dot_dimension_numbers<[1], [0], [0], [1], [0, 0, 1, 1], [], []>} : vector<8x8xf32>, vector<8x256xf32>, vector<8x256xf32> -> vector<8x256xf32>
    %cst_123 = arith.constant 6.28318548 : f32
    %297 = vector.broadcast %cst_123 : f32 to vector<8x256xf32>
    %298 = arith.mulf %297, %296 : vector<8x256xf32>
    %cst_124 = arith.constant 6.28318548 : f32
    %299 = vector.broadcast %cst_124 : f32 to vector<8x256xf32>
    %300 = arith.mulf %299, %267 : vector<8x256xf32>
    %301 = arith.subf %295, %300 : vector<8x256xf32>
    %cst_125 = arith.constant 6.28318548 : f32
    %302 = vector.broadcast %cst_125 : f32 to vector<8x256xf32>
    %303 = arith.mulf %302, %281 : vector<8x256xf32>
    %304 = arith.subf %298, %303 : vector<8x256xf32>
    %305 = vector.extract_strided_slice %291 {offsets = [1, 0], sizes = [7, 256], strides = [1, 1]} : vector<8x256xf32> to vector<7x256xf32>
    %306 = vector.extract_strided_slice %291 {offsets = [0, 0], sizes = [1, 256], strides = [1, 1]} : vector<8x256xf32> to vector<1x256xf32>
    %307 = tpu.concatenate %305, %306 in 0 : vector<7x256xf32>, vector<1x256xf32> -> vector<8x256xf32>
    %cst_126 = arith.constant 0.000000e+00 : f32
    %308 = vector.broadcast %cst_126 : f32 to vector<1x256xf32>
    %309 = arith.cmpf ogt, %5, %308 : vector<1x256xf32>
    %cst_127 = arith.constant 0.159154937 : f32
    %310 = vector.broadcast %cst_127 : f32 to vector<1x256xf32>
    %311 = arith.mulf %2, %310 : vector<1x256xf32>
    %312 = math.floor %311 : vector<1x256xf32>
    %cst_128 = arith.constant 6.28318548 : f32
    %313 = vector.broadcast %cst_128 : f32 to vector<1x256xf32>
    %314 = arith.mulf %313, %312 : vector<1x256xf32>
    %315 = arith.subf %2, %314 : vector<1x256xf32>
    %cst_129 = arith.constant 0.000000e+00 : f32
    %316 = vector.broadcast %cst_129 : f32 to vector<1x256xf32>
    %317 = arith.select %309, %315, %316 : vector<1x256xi1>, vector<1x256xf32>
    %318 = vector.extract_strided_slice %295 {offsets = [0, 0], sizes = [7, 256], strides = [1, 1]} : vector<8x256xf32> to vector<7x256xf32>
    %319 = vector.broadcast %317 : vector<1x256xf32> to vector<7x256xf32>
    %320 = arith.cmpf oge, %319, %318 : vector<7x256xf32>
    %321 = arith.extui %320 : vector<7x256xi1> to vector<7x256xi32>
    %322 = arith.sitofp %321 : vector<7x256xi32> to vector<7x256xf32>
    %323 = vector.extract_strided_slice %301 {offsets = [0, 0], sizes = [1, 256], strides = [1, 1]} : vector<8x256xf32> to vector<1x256xf32>
    %324 = vector.extract_strided_slice %301 {offsets = [1, 0], sizes = [7, 256], strides = [1, 1]} : vector<8x256xf32> to vector<7x256xf32>
    %325 = vector.extract_strided_slice %301 {offsets = [0, 0], sizes = [7, 256], strides = [1, 1]} : vector<8x256xf32> to vector<7x256xf32>
    %326 = arith.subf %324, %325 : vector<7x256xf32>
    %327 = arith.mulf %322, %326 : vector<7x256xf32>
    %cst_130 = arith.constant dense<0.000000e+00> : vector<256xf32>
    %328 = vector.multi_reduction <add>, %327, %cst_130 [0] : vector<7x256xf32> to vector<256xf32>
    %329 = vector.shape_cast %328 : vector<256xf32> to vector<1x256xf32>
    %330 = arith.addf %323, %329 : vector<1x256xf32>
    %331 = vector.extract_strided_slice %295 {offsets = [0, 0], sizes = [1, 256], strides = [1, 1]} : vector<8x256xf32> to vector<1x256xf32>
    %332 = vector.extract_strided_slice %295 {offsets = [1, 0], sizes = [7, 256], strides = [1, 1]} : vector<8x256xf32> to vector<7x256xf32>
    %333 = vector.extract_strided_slice %295 {offsets = [0, 0], sizes = [7, 256], strides = [1, 1]} : vector<8x256xf32> to vector<7x256xf32>
    %334 = arith.subf %332, %333 : vector<7x256xf32>
    %335 = arith.mulf %322, %334 : vector<7x256xf32>
    %cst_131 = arith.constant dense<0.000000e+00> : vector<256xf32>
    %336 = vector.multi_reduction <add>, %335, %cst_131 [0] : vector<7x256xf32> to vector<256xf32>
    %337 = vector.shape_cast %336 : vector<256xf32> to vector<1x256xf32>
    %338 = arith.addf %331, %337 : vector<1x256xf32>
    %339 = vector.extract_strided_slice %304 {offsets = [0, 0], sizes = [1, 256], strides = [1, 1]} : vector<8x256xf32> to vector<1x256xf32>
    %340 = vector.extract_strided_slice %304 {offsets = [1, 0], sizes = [7, 256], strides = [1, 1]} : vector<8x256xf32> to vector<7x256xf32>
    %341 = vector.extract_strided_slice %304 {offsets = [0, 0], sizes = [7, 256], strides = [1, 1]} : vector<8x256xf32> to vector<7x256xf32>
    %342 = arith.subf %340, %341 : vector<7x256xf32>
    %343 = arith.mulf %322, %342 : vector<7x256xf32>
    %cst_132 = arith.constant dense<0.000000e+00> : vector<256xf32>
    %344 = vector.multi_reduction <add>, %343, %cst_132 [0] : vector<7x256xf32> to vector<256xf32>
    %345 = vector.shape_cast %344 : vector<256xf32> to vector<1x256xf32>
    %346 = arith.addf %339, %345 : vector<1x256xf32>
    %347 = vector.extract_strided_slice %298 {offsets = [0, 0], sizes = [1, 256], strides = [1, 1]} : vector<8x256xf32> to vector<1x256xf32>
    %348 = vector.extract_strided_slice %298 {offsets = [1, 0], sizes = [7, 256], strides = [1, 1]} : vector<8x256xf32> to vector<7x256xf32>
    %349 = vector.extract_strided_slice %298 {offsets = [0, 0], sizes = [7, 256], strides = [1, 1]} : vector<8x256xf32> to vector<7x256xf32>
    %350 = arith.subf %348, %349 : vector<7x256xf32>
    %351 = arith.mulf %322, %350 : vector<7x256xf32>
    %cst_133 = arith.constant dense<0.000000e+00> : vector<256xf32>
    %352 = vector.multi_reduction <add>, %351, %cst_133 [0] : vector<7x256xf32> to vector<256xf32>
    %353 = vector.shape_cast %352 : vector<256xf32> to vector<1x256xf32>
    %354 = arith.addf %347, %353 : vector<1x256xf32>
    %355 = vector.extract_strided_slice %291 {offsets = [0, 0], sizes = [1, 256], strides = [1, 1]} : vector<8x256xf32> to vector<1x256xf32>
    %356 = vector.extract_strided_slice %291 {offsets = [1, 0], sizes = [7, 256], strides = [1, 1]} : vector<8x256xf32> to vector<7x256xf32>
    %357 = vector.extract_strided_slice %291 {offsets = [0, 0], sizes = [7, 256], strides = [1, 1]} : vector<8x256xf32> to vector<7x256xf32>
    %358 = arith.subf %356, %357 : vector<7x256xf32>
    %359 = arith.mulf %322, %358 : vector<7x256xf32>
    %cst_134 = arith.constant dense<0.000000e+00> : vector<256xf32>
    %360 = vector.multi_reduction <add>, %359, %cst_134 [0] : vector<7x256xf32> to vector<256xf32>
    %361 = vector.shape_cast %360 : vector<256xf32> to vector<1x256xf32>
    %362 = arith.addf %355, %361 : vector<1x256xf32>
    %363 = vector.extract_strided_slice %307 {offsets = [0, 0], sizes = [1, 256], strides = [1, 1]} : vector<8x256xf32> to vector<1x256xf32>
    %364 = vector.extract_strided_slice %307 {offsets = [1, 0], sizes = [7, 256], strides = [1, 1]} : vector<8x256xf32> to vector<7x256xf32>
    %365 = vector.extract_strided_slice %307 {offsets = [0, 0], sizes = [7, 256], strides = [1, 1]} : vector<8x256xf32> to vector<7x256xf32>
    %366 = arith.subf %364, %365 : vector<7x256xf32>
    %367 = arith.mulf %322, %366 : vector<7x256xf32>
    %cst_135 = arith.constant dense<0.000000e+00> : vector<256xf32>
    %368 = vector.multi_reduction <add>, %367, %cst_135 [0] : vector<7x256xf32> to vector<256xf32>
    %369 = vector.shape_cast %368 : vector<256xf32> to vector<1x256xf32>
    %370 = arith.addf %363, %369 : vector<1x256xf32>
    %371 = arith.subf %338, %330 : vector<1x256xf32>
    %cst_136 = arith.constant 9.99999996E-13 : f32
    %372 = vector.broadcast %cst_136 : f32 to vector<1x256xf32>
    %373 = arith.maximumf %371, %372 : vector<1x256xf32>
    %374 = arith.subf %354, %346 : vector<1x256xf32>
    %375 = tpu.reciprocal %373 {approx = true} : vector<1x256xf32> -> vector<1x256xf32>
    %376 = arith.mulf %373, %375 : vector<1x256xf32>
    %cst_137 = arith.constant 2.000000e+00 : f32
    %377 = vector.broadcast %cst_137 : f32 to vector<1x256xf32>
    %378 = arith.subf %377, %376 : vector<1x256xf32>
    %379 = arith.mulf %375, %378 : vector<1x256xf32>
    %380 = arith.mulf %374, %379 : vector<1x256xf32>
    %381 = arith.subf %317, %330 : vector<1x256xf32>
    %382 = arith.mulf %381, %379 : vector<1x256xf32>
    %cst_138 = arith.constant 1.000000e+00 : f32
    %383 = vector.broadcast %cst_138 : f32 to vector<1x256xf32>
    %384 = arith.subf %383, %382 : vector<1x256xf32>
    %385 = arith.addf %370, %362 : vector<1x256xf32>
    %cst_139 = arith.constant 2.000000e+00 : f32
    %386 = vector.broadcast %cst_139 : f32 to vector<1x256xf32>
    %387 = arith.mulf %386, %380 : vector<1x256xf32>
    %388 = arith.subf %385, %387 : vector<1x256xf32>
    %389 = arith.mulf %388, %382 : vector<1x256xf32>
    %390 = arith.mulf %389, %384 : vector<1x256xf32>
    %391 = arith.addf %380, %390 : vector<1x256xf32>
    %cst_140 = arith.constant 9.99999996E-13 : f32
    %392 = vector.broadcast %cst_140 : f32 to vector<1x256xf32>
    %393 = arith.maximumf %391, %392 : vector<1x256xf32>
    %394 = tpu.reciprocal %393 {approx = true} : vector<1x256xf32> -> vector<1x256xf32>
    %395 = arith.mulf %393, %394 : vector<1x256xf32>
    %cst_141 = arith.constant 2.000000e+00 : f32
    %396 = vector.broadcast %cst_141 : f32 to vector<1x256xf32>
    %397 = arith.subf %396, %395 : vector<1x256xf32>
    %398 = arith.mulf %394, %397 : vector<1x256xf32>
    %399 = arith.mulf %380, %382 : vector<1x256xf32>
    %400 = arith.mulf %399, %382 : vector<1x256xf32>
    %401 = arith.mulf %362, %382 : vector<1x256xf32>
    %402 = arith.mulf %401, %384 : vector<1x256xf32>
    %403 = arith.addf %400, %402 : vector<1x256xf32>
    %404 = arith.mulf %374, %403 : vector<1x256xf32>
    %405 = arith.mulf %404, %398 : vector<1x256xf32>
    %406 = arith.addf %346, %405 : vector<1x256xf32>
    %407 = arith.mulf %380, %380 : vector<1x256xf32>
    %408 = arith.mulf %370, %382 : vector<1x256xf32>
    %409 = arith.mulf %408, %382 : vector<1x256xf32>
    %cst_142 = arith.constant 2.000000e+00 : f32
    %410 = vector.broadcast %cst_142 : f32 to vector<1x256xf32>
    %411 = arith.mulf %410, %380 : vector<1x256xf32>
    %412 = arith.mulf %411, %382 : vector<1x256xf32>
    %413 = arith.mulf %412, %384 : vector<1x256xf32>
    %414 = arith.addf %409, %413 : vector<1x256xf32>
    %415 = arith.mulf %362, %384 : vector<1x256xf32>
    %416 = arith.mulf %415, %384 : vector<1x256xf32>
    %417 = arith.addf %414, %416 : vector<1x256xf32>
    %418 = arith.mulf %407, %417 : vector<1x256xf32>
    %419 = arith.mulf %418, %398 : vector<1x256xf32>
    %420 = arith.mulf %419, %398 : vector<1x256xf32>
    %421 = math.log %420 : vector<1x256xf32>
    %cst_143 = arith.constant 0.000000e+00 : f32
    %422 = vector.broadcast %cst_143 : f32 to vector<1x256xf32>
    %423 = arith.select %309, %421, %422 : vector<1x256xi1>, vector<1x256xf32>
    %424 = arith.addf %406, %253 : vector<1x256xf32>
    %cst_144 = arith.constant 0.159154937 : f32
    %425 = vector.broadcast %cst_144 : f32 to vector<1x256xf32>
    %426 = arith.mulf %424, %425 : vector<1x256xf32>
    %427 = math.floor %426 : vector<1x256xf32>
    %cst_145 = arith.constant 6.28318548 : f32
    %428 = vector.broadcast %cst_145 : f32 to vector<1x256xf32>
    %429 = arith.mulf %428, %427 : vector<1x256xf32>
    %430 = arith.subf %424, %429 : vector<1x256xf32>
    %431 = arith.select %309, %430, %2 : vector<1x256xi1>, vector<1x256xf32>
    %c0_146 = arith.constant 0 : index
    %c0_147 = arith.constant 0 : index
    %c0_148 = arith.constant 0 : index
    %432 = vector.load %arg10[%c0_146, %c0_147, %c0_148] : memref<1x1x256xf32, #tpu.memory_space<vmem>>, vector<1x1x256xf32>
    %433 = vector.shape_cast %432 : vector<1x1x256xf32> to vector<1x256xf32>
    %434 = vector.shape_cast %431 : vector<1x256xf32> to vector<1x1x256xf32>
    tpu.vector_store %arg10[%c0_146, %c0_147, %c0_148], %434 {strides = array<i32>} : memref<1x1x256xf32, #tpu.memory_space<vmem>>, vector<1x1x256xf32>,
    %c0_149 = arith.constant 0 : index
    %c0_150 = arith.constant 0 : index
    %c0_151 = arith.constant 0 : index
    %435 = vector.load %arg11[%c0_149, %c0_150, %c0_151] : memref<1x1x256xf32, #tpu.memory_space<vmem>>, vector<1x1x256xf32>
    %436 = vector.shape_cast %435 : vector<1x1x256xf32> to vector<1x256xf32>
    %437 = vector.shape_cast %423 : vector<1x256xf32> to vector<1x1x256xf32>
    tpu.vector_store %arg11[%c0_149, %c0_150, %c0_151], %437 {strides = array<i32>} : memref<1x1x256xf32, #tpu.memory_space<vmem>>, vector<1x1x256xf32>,
    return
  }
  func.func @transform_0(%arg0: i32) -> (i32, i32, i32) {
    %c0_i32 = arith.constant 0 : i32
    %c0_i32_0 = arith.constant 0 : i32
    %c0_i32_1 = arith.constant 0 : i32
    return %arg0, %c0_i32, %c0_i32_0 : i32, i32, i32
  }
  func.func @transform_1(%arg0: i32) -> (i32, i32) {
    %c0_i32 = arith.constant 0 : i32
    %c0_i32_0 = arith.constant 0 : i32
    %c0_i32_1 = arith.constant 0 : i32
    return %c0_i32, %c0_i32_0 : i32, i32
  }
  func.func @transform_2(%arg0: i32) -> (i32, i32) {
    %c0_i32 = arith.constant 0 : i32
    %c0_i32_0 = arith.constant 0 : i32
    %c0_i32_1 = arith.constant 0 : i32
    return %c0_i32, %c0_i32_0 : i32, i32
  }
  func.func @transform_3(%arg0: i32) -> (i32, i32) {
    %c0_i32 = arith.constant 0 : i32
    %c0_i32_0 = arith.constant 0 : i32
    %c0_i32_1 = arith.constant 0 : i32
    return %c0_i32, %c0_i32_0 : i32, i32
  }
  func.func @transform_4(%arg0: i32) -> (i32, i32) {
    %c0_i32 = arith.constant 0 : i32
    %c0_i32_0 = arith.constant 0 : i32
    %c0_i32_1 = arith.constant 0 : i32
    return %c0_i32, %c0_i32_0 : i32, i32
  }
  func.func @transform_5(%arg0: i32) -> (i32, i32) {
    %c0_i32 = arith.constant 0 : i32
    %c0_i32_0 = arith.constant 0 : i32
    %c0_i32_1 = arith.constant 0 : i32
    return %c0_i32, %c0_i32_0 : i32, i32
  }
  func.func @transform_6(%arg0: i32) -> (i32, i32) {
    %c0_i32 = arith.constant 0 : i32
    %c0_i32_0 = arith.constant 0 : i32
    %c0_i32_1 = arith.constant 0 : i32
    return %c0_i32, %c0_i32_0 : i32, i32
  }
  func.func @transform_7(%arg0: i32) -> (i32, i32) {
    %c0_i32 = arith.constant 0 : i32
    %c0_i32_0 = arith.constant 0 : i32
    %c0_i32_1 = arith.constant 0 : i32
    return %c0_i32, %c0_i32_0 : i32, i32
  }
  func.func @transform_8(%arg0: i32) -> (i32, i32) {
    %c0_i32 = arith.constant 0 : i32
    %c0_i32_0 = arith.constant 0 : i32
    %c0_i32_1 = arith.constant 0 : i32
    return %c0_i32, %c0_i32_0 : i32, i32
  }
  func.func @transform_9(%arg0: i32) -> (i32, i32, i32) {
    %c0_i32 = arith.constant 0 : i32
    %c0_i32_0 = arith.constant 0 : i32
    %c0_i32_1 = arith.constant 0 : i32
    return %arg0, %c0_i32, %c0_i32_0 : i32, i32, i32
  }
  func.func @transform_10(%arg0: i32) -> (i32, i32, i32) {
    %c0_i32 = arith.constant 0 : i32
    %c0_i32_0 = arith.constant 0 : i32
    %c0_i32_1 = arith.constant 0 : i32
    return %arg0, %c0_i32, %c0_i32_0 : i32, i32, i32
  }
}

</mosaic_0001>

<bundles_post_ra>
// kernel: tpu_custom_call.1
= control target key start
LH: loop header
LB: loop body
LE: loop exit
PB: predicated region body
PF: predicated region fallthrough
CT: control target
= control target key end

     0   :  { %s6509_s0 = inlined_call_operand.vmem [shape: f32[2,3,256], index: 0, kind: input, shape index: {}]   ;;  %s6510_s1 = inlined_call_operand.vmem [shape: f32[6,256], index: 1, kind: input, shape index: {}]   ;;  %s6511_s2 = inlined_call_operand.vmem [shape: f32[8,8], index: 2, kind: input, shape index: {}]   ;;  %s6512_s3 = inlined_call_operand.hbm [shape: f32[16,18], index: 3, kind: input, shape index: {}]   ;;  %s6513_s4 = inlined_call_operand.vmem [shape: f32[16,1], index: 4, kind: input, shape index: {}]   ;;  %s6514_s5 = inlined_call_operand.vmem [shape: f32[16,144], index: 5, kind: input, shape index: {}]   ;;  %s6515_s6 = inlined_call_operand.vmem [shape: f32[16,1], index: 6, kind: input, shape index: {}]   ;;  %s6516_s7 = inlined_call_operand.vmem [shape: f32[25,144], index: 7, kind: input, shape index: {}]   ;;  %s6517_s8 = inlined_call_operand.vmem [shape: f32[25,1], index: 8, kind: input, shape index: {}]   ;;  %s6518_s9 = inlined_call_operand.hbm [shape: f32[2,1,256], index: 9, kind: output, shape index: {0}]   ;;  %s6519_s10 = inlined_call_operand.hbm [shape: f32[2,1,256], index: 10, kind: output, shape index: {1}]  }
   0x1   :  { %6537 = sst [smem:[#allocation11_spill]] %s6509_s0 }
   0x2   :  { %6538 = sst [smem:[#allocation12_spill]] %s6510_s1 }
   0x3   :  { %6539 = sst [smem:[#allocation13_spill]] %s6511_s2 }
   0x4   :  { %16 = vsyncpa [#allocation3], 0 }
   0x5   :  { %17 = vsyncpa [#allocation4], 0 }
   0x6   :  { %19 = vsyncpa [#allocation4 + $0x1], 0 }
   0x7   :  { %20 = vsyncpa [#allocation7], 0 }
   0x8   :  { %22 = vsyncpa [#allocation7 + $0x1], 0  ;;  %s5272_s13 = smov 0   ;;  %s5274_s14 = smov 0  }
   0x9   :  { %s5276_s15 = smov 0   ;;  %s5278_s16 = smov 0  }
   0xa LB: > { %s5293_s17 = sadd.s32 4294967295, %s5189_s16   ;;  %s4409_s18 = sadd.s32 4294967294, %s5189_s16   ;;  %s5189_s16 = sphi %s5278_s16, %s6572_s16   ;;  %s5185_s15 = sphi %s5276_s15, %s6571_s15   ;;  %s5181_s14 = sphi %s5274_s14, %s6570_s14   ;;  %s5177_s13 = sphi %s5272_s13, %s6569_s13  }
   0xb   : > { %s5297_s19 = sadd.s32 1, %s5189_s16   ;;  %s229_s20 = sadd.s32 1, %s5185_s15 }
   0xc   : > { %s226_s21 = ssub.s32 %s5189_s16, %s5297_s19  ;;  %p239_p0 = scmp.ne.s32.totalorder %s5185_s15, %s5181_s14 }
   0xd   : > { %p227_p1 = scmp.eq.s32.totalorder %s226_s21, 0  ;;  %p240_p2 = scmp.eq.s32.totalorder %s5293_s17, 1 }
   0xe   : > { %p245_p3 = scmp.ne.s32.totalorder %s5181_s14, %s5177_s13  ;;  %p246_p4 = scmp.eq.s32.totalorder %s4409_s18, 1 }
   0xf   : > { %s5308_s22 = scalar_select %p227_p1, %s5185_s15, %s229_s20  }
  0x10   : > { %p5310_p5 = por %p240_p2, %p239_p0  ;;  %p5314_p6 = por %p246_p4, %p245_p3 }
  0x11   : > { %p4410_p7 = scmp.ge.s32.totalorder %s5189_s16, 1  ;;  %p279_p8 = scmp.lt.s32.totalorder %s5189_s16, 3 }
  0x12   : > { %s6540_s23 = scalar_select %p5310_p5, 1, 0 }
  0x13   : > { %s6541_s24 = scalar_select %p5314_p6, 1, 0 }
  0x14   : > { %p6520_p9 = scmp.eq.s32.totalorder %s5293_s17, 0  ;;  %p5321_p10 = pnand %p4410_p7, %p279_p8 }
  0x15   : > { %s5191_s26 = smov [#allocation2]   ;;  %s5063_s11 = scalar_lea.hbm %s6512_s3, 256 }
  0x16   : > { %s6542_s25 = scalar_select %p5321_p10, 1, 0 }
  0x17   : > { %s297_s27 = sshll.u32 %s5191_s26, 4  ;;  %p4737_p11 = pneg %p5321_p10  ;;  %s298_s27 = int_to_ptr.vmem [resolvable:$true] %s297_s27 }
  0x18   : > { %p5064_p13 = scmp.ne.s32.totalorder %s6512_s3, %s5063_s11  ;;  %p5070_p3 = scmp.lt.u32.totalorder %s5063_s11, %s6512_s3 }
  0x19   : > { %p5329_p12 = pnand %p6520_p9, %p4737_p11 }
  0x1b   : > { %p5065_p0 = pneg %p5329_p12 }
  0x1d   : > { %p5066_p1 = pnand %p5065_p0, %p5064_p13 }
  0x1f   : > { %p5067_p2 = pneg %p5066_p1 }
  0x21   : > { %p5072_p4 = pnand %p5070_p3, %p5067_p2 }
  0x23   : > { %5075 = shalt.err (!%p5072_p4)
}
  0x24   : > { %s5076_s26 = scalar_lea.vmem %s298_s27, 256  ;;  %p5084_p9 = scmp.lt.s32.totalorder %s298_s27, %s298_s27 }
  0x25   : > { %p5077_p7 = scmp.ne.s32.totalorder %s298_s27, %s5076_s26  ;;  %p5085_p6 = scmp.lt.s32.totalorder %s5076_s26, %s5076_s26 }
  0x27   : > { %p5079_p8 = pnand %p5077_p7, %p5065_p0  ;;  %p5086_p5 = por %p5085_p6, %p5084_p9 }
  0x29   : > { %p5080_p11 = pneg %p5079_p8 }
  0x2b   : > { %p5087_p10 = pnand %p5086_p5, %p5080_p11 }
  0x2d   : > { %5090 = shalt.err (!%p5087_p10)
}
  0x2e   : > { %s5192_s29 = smov 128   ;;  %s5193_s30 = smov 8  }
  0x2f   : > { %4740 = dma.hbm_to_vmem [thread:$0]  (!%p5329_p12), %s6512_s3, 256, %s298_s27, [#allocation3], %s5192_s29, %s5192_s29, %s5193_s30  }
  0x30   : > { %p6544_p13 = scmp.ne.s32.totalorder %s6542_s25, 0 }
  0x31   : > { %p6545_p1 = scmp.eq.s32.totalorder (!%p6544_p13), %s5293_s17, 0 }
  0x32   : > { %336 = sbr.rel (%p6544_p13) target bundleno = 2092 (0x82c), region = 56 }
  0x39   : > { %5164 = dma.done.wait (%p6545_p1), [#allocation3], 256   ;;  %p6546_p0 = pmov %p6545_p1 }
  0x3a   : > { %p379_p5 = scmp.lt.s32.totalorder %s5293_s17, 1  ;;  %v396_v0 = vlaneseq  ;;  %v5194_v1 = vmov 1966171168   ;;  %s6547_s0 = sld [smem:[#allocation11_spill]]  ;;  %vm442_vm0 = vcmask 1040384   ;;  %v5407_v22 = vld [vmem:[#allocation2] sm:$0xff] }
  0x3b   : > { %5166 = vsyncadd (%p6546_p0), [#allocation3], 4294967040  ;;  %v394_v2 = vunpack.c.l.s4 %v5194_v1  ;;  %s6548_s1 = sld [smem:[#allocation12_spill]]  ;;  %s5195_s29 = smov 1   ;;  %v5201_v23 = vmov 0.0   ;;  %vm531_vm10 = vcmask 1041408  }
  0x3c   : > { %s380_s28 = scalar_select %p379_p5, %s5293_s17, 1  ;;  %v397_v3 = vshrl.u32 %v396_v0, 7  ;;  %602 = vmatprep.mubr.f32.mxu0 %v5201_v23  ;;  %608 = vmatprep.mubr.f32.mxu1 %v5201_v23  ;;  %v5417_v25 = vand.u32 127, %v396_v0  ;;  %v446_v55 = vld [vmem:[#allocation2 + $0x8] sm:$0xff]  ;;  %vm526_vm11 = vcmask 15360   ;;  %v1392_v61 = vld [vmem:[%s6513_s4] sm:$0xff] }
  0x3d   : > { %v395_v4 = vunpack.c.0.s8 %v394_v2  ;;  %s5196_s30 = smov 113   ;;  %s5197_s12 = smov 15   ;;  %v5209_v62 = vmov 0   ;;  %v1393_v63 = vld [vmem:[%s6513_s4 + $0x8] sm:$0xff]  ;;  %vm1534_vm13 = vcmask 130048   ;;  %vm3678_vm14 = vcmask 64512  }
  0x3e   : > { %s4524_s27 = sshll.u32 %s380_s28, 3  ;;  %v5375_v12 = vsub.s32 0, %v397_v3  ;;  %v5377_v13 = vsub.s32 1, %v397_v3  ;;  %s6533_s18 = smov 127   ;;  %vm486_vm1 = vcmp.lt.s32.totalorder %v5417_v25, 1  ;;  %vm479_vm2 = vcmp.lt.s32.totalorder %v5417_v25, 113  ;;  %4807 = vset.pattern.permute.xlu0 %v5209_v62  ;;  %4808 = vset.pattern.permute.xlu1 %v5209_v62 }
  0x3f   : > { %v5363_v5 = vsub.s32 %v395_v4, %v397_v3  ;;  %s6523_s28 = smov 16   ;;  %vm495_vm5 = vcmp.lt.s32.totalorder %v5417_v25, 15  ;;  %vm502_vm6 = vcmp.lt.s32.totalorder %v5417_v25, 127  ;;  %vm511_vm9 = vcmp.lt.s32.totalorder %v5417_v25, 16  ;;  %s5202_s11 = smov 124  }
  0x40   : > { %s5361_s20 = scalar_lea.vmem %s6547_s0, %s4524_s27  ;;  %s5200_s27 = smov 126   ;;  %vm1092_vm12 = vcmp.lt.s32.totalorder %v5417_v25, 112 }
  0x41   : > { %v5062_v6 = vld.sshfl [vmem:[%s5361_s20] sm:$0x5f pattern:$0x75316420]  ;;  %s5203_s25 = smov 122   ;;  %s5204_s21 = smov 120  }
  0x42   : > { %v400_v7 = vcombine.high %v5062_v6, %v5062_v6  ;;  %v5367_v8 = vrot.slane %v5062_v6, %v5363_v5  ;;  %v4419_v9 = vld [vmem:[%s6548_s1 + $0x1] ss:$8 sm:$0x3]  ;;  %v4420_v24 = vld [vmem:[%s6548_s1 + $0x2] ss:$8 sm:$0x3] }
  0x43   : > { %v455_v26 = vrot.slane %v4420_v24, %v5377_v13  ;;  %v451_v27 = vrot.slane %v4420_v24, %v5375_v12  ;;  %v4421_v34 = vld [vmem:[%s6548_s1 + $0x3] ss:$8 sm:$0x3]  ;;  %s5205_s26 = smov 118   ;;  %s6564_s2 = sld [smem:[#allocation13_spill]] }
  0x44   : > { %v414_v10 = vrot.slane %v400_v7, %v5363_v5  ;;  %v417_v11 = vcombine.high %v5367_v8, %v5367_v8  ;;  %v468_v41 = vrot.slane %v4421_v34, %v5377_v13  ;;  %v464_v42 = vrot.slane %v4421_v34, %v5375_v12  ;;  %p6567_p9 = scmp.ne.s32.totalorder %s6540_s23, 0  ;;  %s5215_s0 = smov [#allocation5]  }
  0x45   : > { %vm5423_vm3 = vcmp.gt.f32.partialorder %v455_v26, 0.5  ;;  %vm5427_vm4 = vcmp.gt.f32.partialorder %v451_v27, 0.5 }
  0x46   : > { %v416_v14 = vmul.f32 %v4419_v9, %v414_v10  ;;  %v419_v15 = vmul.f32 %v4419_v9, %v417_v11  ;;  %vm5458_vm7 = vcmp.gt.f32.partialorder %v468_v41, 0.5  ;;  %vm5462_vm8 = vcmp.gt.f32.partialorder %v464_v42, 0.5 }
  0x48   : > { %v424_v16 = vrot.slane %v416_v14, %v5375_v12  ;;  %v435_v17 = vrot.slane %v419_v15, %v5375_v12  ;;  %v428_v18 = vrot.slane %v416_v14, %v5377_v13  ;;  %v439_v19 = vrot.slane %v419_v15, %v5377_v13 }
  0x4a   : > { %v5383_v20 = vsel %vm442_vm0, %v424_v16, %v435_v17  ;;  %v5389_v21 = vsel %vm442_vm0, %v428_v18, %v439_v19  ;;  %vm3842_vm0 = vcmask 1046528  }
  0x4b   : > { %482 = vrot.lane.b32.xlu1 %v5383_v20, %s5195_s29  ;;  %473 = vrot.lane.b32.xlu0 %v5383_v20, %s5196_s30 }
  0x4f   : > { %484 = vrot.lane.b32.xlu1 %v5389_v21, %s5195_s29  ;;  %475 = vrot.lane.b32.xlu0 %v5389_v21, %s5196_s30 }
  0x53   : > { %493 = vrot.lane.b32.xlu1 %v5389_v21, %s5197_s12  ;;  %491 = vrot.lane.b32.xlu0 %v5383_v20, %s5197_s12 }
  0x57   : > { %500 = vrot.lane.b32.xlu1 %v5389_v21, %s6533_s18  ;;  %498 = vrot.lane.b32.xlu0 %v5383_v20, %s6533_s18 }
  0x5b   : > { %516 = vrot.lane.b32.xlu1 %v5389_v21, %s6523_s28  ;;  %514 = vrot.lane.b32.xlu0 %v5383_v20, %s6523_s28 }
  0x5f   : > { %522 = vrot.lane.b32.xlu0 %v5407_v22, %s5200_s27 }
  0xbd   : > { %v483_v28 = vpop.permute.xlu1 %482  ;;  %v474_v29 = vpop.permute.xlu0 %473 }
  0xc1   : > { %v485_v32 = vpop.permute.xlu1 %484  ;;  %v476_v33 = vpop.permute.xlu0 %475 }
  0xc2   : > { %v487_v35 = vsel %vm486_vm1, %v483_v28, %v485_v32  ;;  %v488_v36 = vsel %vm486_vm1, %v485_v32, %v483_v28  ;;  %v480_v37 = vsel %vm479_vm2, %v474_v29, %v476_v33  ;;  %v481_v38 = vsel %vm479_vm2, %v476_v33, %v474_v29 }
  0xc3   : > { %v5444_v39 = vsel %vm5423_vm3, %v481_v38, %v487_v35  ;;  %v5448_v40 = vsel %vm5427_vm4, %v480_v37, %v488_v36 }
  0xc4   : > { %509 = vrot.lane.b32.xlu0 %v5444_v39, %s6523_s28  ;;  %507 = vrot.lane.b32.xlu1 %v5448_v40, %s6523_s28 }
  0xc5   : > { %v494_v43 = vpop.permute.xlu1 %493  ;;  %v492_v44 = vpop.permute.xlu0 %491 }
  0xc6   : > { %v496_v49 = vsel %vm495_vm5, %v492_v44, %v494_v43  ;;  %v497_v50 = vsel %vm495_vm5, %v494_v43, %v492_v44 }
  0xc9   : > { %v501_v47 = vpop.permute.xlu1 %500  ;;  %v499_v48 = vpop.permute.xlu0 %498 }
  0xca   : > { %v503_v51 = vsel %vm502_vm6, %v499_v48, %v501_v47  ;;  %v504_v52 = vsel %vm502_vm6, %v501_v47, %v499_v48 }
  0xcb   : > { %v5477_v53 = vsel %vm5458_vm7, %v496_v49, %v504_v52  ;;  %v5481_v54 = vsel %vm5462_vm8, %v497_v50, %v503_v51 }
  0xcc   : > { %704 = vrot.lane.b32.xlu0 %v5477_v53, %s6523_s28  ;;  %702 = vrot.lane.b32.xlu1 %v5481_v54, %s6523_s28  ;;  %s5207_s28 = smov 116  }
  0xcd   : > { %v517_v56 = vpop.permute.xlu1 %516  ;;  %v515_v57 = vpop.permute.xlu0 %514 }
  0xce   : > { %v518_v58 = vsel %vm511_vm9, %v515_v57, %v517_v56  ;;  %v519_v59 = vsel %vm511_vm9, %v517_v56, %v515_v57 }
  0xcf   : > { %4422 = vmatprep.subr.msk.mxu0 %vm531_vm10, %v518_v58  ;;  %4599 = vmatprep.subr.msk.mxu1 %vm531_vm10, %v518_v58 }
  0xd0   : > { %710 = vrot.lane.b32.xlu0 %v446_v55, %s5202_s11  ;;  %708 = vrot.lane.b32.xlu1 %v5407_v22, %s5202_s11  ;;  %s5206_s11 = smov 112  }
  0xd1   : > { %4423 = vmatpush1.msk.msra.mxu0 %vm531_vm10, %v519_v59  ;;  %4600 = vmatpush1.msk.msra.mxu1 %vm531_vm10, %v519_v59  ;;  %v523_v60 = vpop.permute.xlu0 %522 }
  0xd2   : > { %4424 = vmatmul.mubr.msk.f32.vlgmr.msra.gmra.mrb[0].mxu0 %vm526_vm11, %v523_v60 }
  0xd3   : > { %689 = vmatprep.mubr.f32.mxu0 %v5201_v23 }
  0xd4   : > { %805 = vrot.lane.b32.xlu0 %v446_v55, %s5203_s25  ;;  %803 = vrot.lane.b32.xlu1 %v5407_v22, %s5203_s25  ;;  %s5208_s25 = smov 114  }
  0xd8   : > { %900 = vrot.lane.b32.xlu0 %v446_v55, %s5204_s21  ;;  %898 = vrot.lane.b32.xlu1 %v5407_v22, %s5204_s21  ;;  %s6525_s21 = smov 80  }
  0xdc   : > { %995 = vrot.lane.b32.xlu0 %v446_v55, %s5205_s26  ;;  %993 = vrot.lane.b32.xlu1 %v5407_v22, %s5205_s26  ;;  %s6531_s26 = smov 64  }
  0xe0   : > { %1090 = vrot.lane.b32.xlu0 %v5444_v39, %s5206_s11  ;;  %1088 = vrot.lane.b32.xlu1 %v5448_v40, %s5206_s11 }
  0xe4   : > { %1097 = vrot.lane.b32.xlu0 %v446_v55, %s5207_s28  ;;  %1095 = vrot.lane.b32.xlu1 %v5407_v22, %s5207_s28  ;;  %s6527_s28 = smov 96  }
  0xe8   : > { %1192 = vrot.lane.b32.xlu0 %v5389_v21, %s5206_s11  ;;  %1190 = vrot.lane.b32.xlu1 %v5383_v20, %s5206_s11 }
  0xec   : > { %1198 = vrot.lane.b32.xlu0 %v446_v55, %s5208_s25  ;;  %1196 = vrot.lane.b32.xlu1 %v5407_v22, %s5208_s25  ;;  %s6529_s25 = smov 48  }
  0xf0   : > { %1293 = vrot.lane.b32.xlu0 %v5477_v53, %s5206_s11  ;;  %1291 = vrot.lane.b32.xlu1 %v5481_v54, %s5206_s11 }
  0xf4   : > { %1297 = vrot.lane.b32.xlu1 %v5407_v22, %s5206_s11  ;;  %524 = vrot.lane.b32.xlu0 %v446_v55, %s5200_s27  ;;  %s6557_s27 = smov 16  }
  0xf8   : > { %1299 = vrot.lane.b32.xlu1 %v446_v55, %s5206_s11  ;;  %1396 = vperm.xlu0 %4807, %v1392_v61  }
  0xfc   : > { %1401 = vperm.xlu1 %4808, %v1393_v63  }
 0x136   : > { %v508_v1 = vpop.permute.xlu1 %507  ;;  %v510_v2 = vpop.permute.xlu0 %509 }
 0x137   : > { %v513_v3 = vsel %vm511_vm9, %v510_v2, %v508_v1  ;;  %v512_v4 = vsel %vm511_vm9, %v508_v1, %v510_v2 }
 0x138   : > { %4426 = vmatprep.subr.msk.mxu0 %vm531_vm10, %v512_v4 }
 0x139   : > { %4427 = vmatpush1.msk.msra.mxu0 %vm531_vm10, %v513_v3 }
 0x13a   : > { %4428 = vmatmul.mubr.msk.f32.vlgmr.msra.gmra.mrb[0].mxu0 %vm526_vm11, %v5407_v22 }
 0x13b   : > { %695 = vmatprep.mubr.f32.mxu0 %v5201_v23 }
 0x13e   : > { %v703_v6 = vpop.permute.xlu1 %702  ;;  %v705_v7 = vpop.permute.xlu0 %704  ;;  %4429 = vmatmul.mubr.msk.f32.gmra.mrb[2].mxu0 %vm526_vm11, %v446_v55 }
 0x13f   : > { %v707_v9 = vsel %vm511_vm9, %v705_v7, %v703_v6  ;;  %v706_v10 = vsel %vm511_vm9, %v703_v6, %v705_v7  ;;  %786 = vmatprep.mubr.f32.mxu0 %v5201_v23 }
 0x140   : > { %4430 = vmatprep.subr.msk.mxu0 %vm531_vm10, %v706_v10 }
 0x141   : > { %4431 = vmatpush1.msk.msra.mxu0 %vm531_vm10, %v707_v9 }
 0x142   : > { %v709_v11 = vpop.permute.xlu1 %708  ;;  %4434 = vmatprep.subr.msk.mxu0 %vm531_vm10, %v5444_v39  ;;  %v711_v14 = vpop.permute.xlu0 %710 }
 0x143   : > { %4432 = vmatmul.mubr.msk.f32.vlgmr.msra.gmra.mrb[0].mxu0 %vm526_vm11, %v709_v11 }
 0x144   : > { %4435 = vmatpush1.msk.msra.mxu0 %vm531_vm10, %v5448_v40  ;;  %792 = vmatprep.mubr.f32.mxu0 %v5201_v23 }
 0x145   : > { %4438 = vmatprep.subr.msk.mxu0 %vm531_vm10, %v5389_v21 }
 0x146   : > { %v804_v15 = vpop.permute.xlu1 %803  ;;  %v806_v16 = vpop.permute.xlu0 %805 }
 0x147   : > { %4433 = vmatmul.mubr.msk.f32.gmra.mrb[2].mxu0 %vm526_vm11, %v711_v14 }
 0x148   : > { %881 = vmatprep.mubr.f32.mxu0 %v5201_v23 }
 0x14a   : > { %v899_v17 = vpop.permute.xlu1 %898  ;;  %v901_v18 = vpop.permute.xlu0 %900 }
 0x14b   : > { %4436 = vmatmul.mubr.msk.f32.vlgmr.msra.gmra.mrb[0].mxu0 %vm526_vm11, %v804_v15 }
 0x14c   : > { %4439 = vmatpush1.msk.msra.mxu0 %vm531_vm10, %v5383_v20  ;;  %887 = vmatprep.mubr.f32.mxu0 %v5201_v23 }
 0x14d   : > { %4442 = vmatprep.subr.msk.mxu0 %vm531_vm10, %v5477_v53 }
 0x14e   : > { %v994_v19 = vpop.permute.xlu1 %993  ;;  %v996_v21 = vpop.permute.xlu0 %995 }
 0x14f   : > { %4437 = vmatmul.mubr.msk.f32.gmra.mrb[2].mxu0 %vm526_vm11, %v806_v16 }
 0x150   : > { %976 = vmatprep.mubr.f32.mxu0 %v5201_v23 }
 0x152   : > { %v1089_v22 = vpop.permute.xlu1 %1088  ;;  %v1091_v24 = vpop.permute.xlu0 %1090 }
 0x153   : > { %4440 = vmatmul.mubr.msk.f32.vlgmr.msra.gmra.mrb[0].mxu0 %vm526_vm11, %v899_v17  ;;  %v1094_v20 = vsel %vm1092_vm12, %v1091_v24, %v1089_v22  ;;  %v1093_v32 = vsel %vm1092_vm12, %v1089_v22, %v1091_v24 }
 0x154   : > { %4443 = vmatpush1.msk.msra.mxu0 %vm531_vm10, %v5481_v54  ;;  %982 = vmatprep.mubr.f32.mxu0 %v5201_v23 }
 0x155   : > { %4446 = vmatprep.subr.msk.mxu0 %vm531_vm10, %v1094_v20 }
 0x156   : > { %v1096_v26 = vpop.permute.xlu1 %1095  ;;  %v1098_v27 = vpop.permute.xlu0 %1097 }
 0x157   : > { %4441 = vmatmul.mubr.msk.f32.gmra.mrb[2].mxu0 %vm526_vm11, %v901_v18 }
 0x158   : > { %1071 = vmatprep.mubr.f32.mxu0 %v5201_v23 }
 0x15a   : > { %v1191_v28 = vpop.permute.xlu1 %1190  ;;  %v1193_v29 = vpop.permute.xlu0 %1192 }
 0x15b   : > { %v1195_v33 = vsel %vm1092_vm12, %v1193_v29, %v1191_v28  ;;  %4444 = vmatmul.mubr.msk.f32.vlgmr.msra.gmra.mrb[0].mxu0 %vm526_vm11, %v994_v19  ;;  %v1194_v36 = vsel %vm1092_vm12, %v1191_v28, %v1193_v29 }
 0x15c   : > { %4447 = vmatpush1.msk.msra.mxu0 %vm531_vm10, %v1093_v32  ;;  %1077 = vmatprep.mubr.f32.mxu0 %v5201_v23 }
 0x15d   : > { %4450 = vmatprep.subr.msk.mxu0 %vm531_vm10, %v1195_v33 }
 0x15e   : > { %v1197_v34 = vpop.permute.xlu1 %1196  ;;  %v1199_v35 = vpop.permute.xlu0 %1198 }
 0x15f   : > { %4445 = vmatmul.mubr.msk.f32.gmra.mrb[2].mxu0 %vm526_vm11, %v996_v21 }
 0x160   : > { %1173 = vmatprep.mubr.f32.mxu0 %v5201_v23 }
 0x162   : > { %v1292_v37 = vpop.permute.xlu1 %1291  ;;  %v1294_v38 = vpop.permute.xlu0 %1293 }
 0x163   : > { %v1296_v39 = vsel %vm1092_vm12, %v1294_v38, %v1292_v37  ;;  %4448 = vmatmul.mubr.msk.f32.vlgmr.msra.gmra.mrb[0].mxu0 %vm526_vm11, %v1096_v26  ;;  %v1295_v41 = vsel %vm1092_vm12, %v1292_v37, %v1294_v38 }
 0x164   : > { %4451 = vmatpush1.msk.msra.mxu0 %vm531_vm10, %v1194_v36  ;;  %1179 = vmatprep.mubr.f32.mxu0 %v5201_v23 }
 0x165   : > { %4454 = vmatprep.subr.msk.mxu0 %vm531_vm10, %v1296_v39 }
 0x166   : > { %v525_v40 = vpop.permute.xlu0 %524  ;;  %v1298_v42 = vpop.permute.xlu1 %1297 }
 0x167   : > { %4449 = vmatmul.mubr.msk.f32.gmra.mrb[2].mxu0 %vm526_vm11, %v1098_v27  ;;  %4425 = vmatmul.mubr.msk.f32.vlgmr.msra.gmra.mrb[0].mxu1 %vm526_vm11, %v525_v40 }
 0x168   : > { %1274 = vmatprep.mubr.f32.mxu0 %v5201_v23  ;;  %1603 = vmatprep.mubr.f32.mxu1 %v5201_v23 }
 0x16a   : > { %v1300_v43 = vpop.permute.xlu1 %1299 }
 0x16b   : > { %4452 = vmatmul.mubr.msk.f32.vlgmr.msra.gmra.mrb[0].mxu0 %vm526_vm11, %v1197_v34 }
 0x16c   : > { %4455 = vmatpush1.msk.msra.mxu0 %vm531_vm10, %v1295_v41  ;;  %1280 = vmatprep.mubr.f32.mxu0 %v5201_v23 }
 0x16f   : > { %4453 = vmatmul.mubr.msk.f32.gmra.mrb[2].mxu0 %vm526_vm11, %v1199_v35 }
 0x170   : > { %1375 = vmatprep.mubr.f32.mxu0 %v5201_v23 }
 0x173   : > { %4456 = vmatmul.mubr.msk.f32.vlgmr.msra.gmra.mrb[0].mxu0 %vm526_vm11, %v1298_v42 }
 0x174   : > { %1381 = vmatprep.mubr.f32.mxu0 %v5201_v23 }
 0x177   : > { %4457 = vmatmul.mubr.msk.f32.gmra.mrb[2].mxu0 %vm526_vm11, %v1300_v43  ;;  %v1397_v48 = vpop.permute.xlu0 %1396 }
 0x178   : > { %3030 = vmatprep.mubr.f32.mxu0 %v5201_v23 }
 0x17b   : > { %v1402_v56 = vpop.permute.xlu1 %1401 }
 0x23a   : > { %v610_v44 = vpop.f32.mrb[0].mxu1 }
 0x23b   : > { %v612_v47 = vpop.f32.mrb[1].mxu1 }
 0x246   : > { %v1377_v49 = vpop.f32.mrb[0].mxu0 }
 0x247   : > { %v1404_v50 = vadd.f32 %v1397_v48, %v1377_v49  ;;  %v1379_v51 = vpop.f32.mrb[1].mxu0 }
 0x248   : > { %v1405_v52 = vadd.f32 %v1397_v48, %v1379_v51 }
 0x249   : > { %v1412_v53 = vmul.f32 0.044715, %v1404_v50  ;;  %v1408_v29 = vmul.f32 0.5, %v1404_v50 }
 0x24a   : > { %v1413_v54 = vmul.f32 0.044715, %v1405_v52  ;;  %v1383_v55 = vpop.f32.mrb[2].mxu0  ;;  %v1409_v34 = vmul.f32 0.5, %v1405_v52 }
 0x24b   : > { %v1416_v57 = vmul.f32 %v1412_v53, %v1404_v50  ;;  %v4601_v58 = vadd.f32 %v1383_v55, %v610_v44  ;;  %v1385_v59 = vpop.f32.mrb[3].mxu0 }
 0x24c   : > { %v1417_v60 = vmul.f32 %v1413_v54, %v1405_v52  ;;  %v4602_v61 = vadd.f32 %v1385_v59, %v612_v47  ;;  %v5646_v47 = vld [vmem:[%s6514_s5] sm:$0xff] }
 0x24d   : > { %v1420_v62 = vmul.f32 %v1416_v57, %v1404_v50  ;;  %v1406_v63 = vadd.f32 %v4601_v58, %v1402_v56 }
 0x24e   : > { %v1421_v1 = vmul.f32 %v1417_v60, %v1405_v52  ;;  %v1407_v2 = vadd.f32 %v4602_v61, %v1402_v56 }
 0x24f   : > { %v1424_v3 = vadd.f32 %v1420_v62, %v1404_v50  ;;  %v1414_v4 = vmul.f32 0.044715, %v1406_v63  ;;  %v1410_v32 = vmul.f32 0.5, %v1406_v63 }
 0x250   : > { %v1425_v6 = vadd.f32 %v1421_v1, %v1405_v52  ;;  %v1415_v7 = vmul.f32 0.044715, %v1407_v2  ;;  %v1411_v35 = vmul.f32 0.5, %v1407_v2 }
 0x251   : > { %v1428_v9 = vmul.f32 0.7978846, %v1424_v3  ;;  %v1418_v10 = vmul.f32 %v1414_v4, %v1406_v63 }
 0x252   : > { %v1429_v11 = vmul.f32 0.7978846, %v1425_v6  ;;  %v1419_v14 = vmul.f32 %v1415_v7, %v1407_v2 }
 0x253   : > { %v1422_v15 = vmul.f32 %v1418_v10, %v1406_v63  ;;  %5009 = vtanh.f32 %v1428_v9 }
 0x254   : > { %v1423_v16 = vmul.f32 %v1419_v14, %v1407_v2  ;;  %5011 = vtanh.f32 %v1429_v11 }
 0x255   : > { %v1426_v17 = vadd.f32 %v1422_v15, %v1406_v63 }
 0x256   : > { %v1427_v18 = vadd.f32 %v1423_v16, %v1407_v2 }
 0x257   : > { %v1430_v19 = vmul.f32 0.7978846, %v1426_v17 }
 0x258   : > { %v1431_v21 = vmul.f32 0.7978846, %v1427_v18 }
 0x259   : > { %5013 = vtanh.f32 %v1430_v19 }
 0x25a   : > { %5015 = vtanh.f32 %v1431_v21 }
 0x25d   : > { %v5010_v22 = vpop.eup %5009 }
 0x25e   : > { %v5012_v24 = vpop.eup %5011  ;;  %v1436_v20 = vadd.f32 1.0, %v5010_v22 }
 0x25f   : > { %v1437_v27 = vadd.f32 1.0, %v5012_v24 }
 0x260   : > { %v5603_v37 = vmul.f32 %v1436_v20, %v1408_v29 }
 0x261   : > { %v5607_v39 = vmul.f32 %v1437_v27, %v1409_v34 }
 0x263   : > { %v5014_v26 = vpop.eup %5013 }
 0x264   : > { %v5016_v28 = vpop.eup %5015  ;;  %v1438_v33 = vadd.f32 1.0, %v5014_v26 }
 0x265   : > { %v1439_v36 = vadd.f32 1.0, %v5016_v28 }
 0x266   : > { %v5605_v38 = vmul.f32 %v1438_v33, %v1410_v32 }
 0x267   : > { %v5609_v40 = vmul.f32 %v1439_v36, %v1411_v35 }
 0x268   : > { %v5613_v41 = vpack.i.bf16 %v5605_v38, %v5603_v37  ;;  %v4545_v44 = vpack.c.bf16 %v5605_v38, %v5603_v37 }
 0x269   : > { %v5617_v42 = vpack.i.bf16 %v5609_v40, %v5607_v39  ;;  %v4543_v43 = vpack.c.bf16 %v5609_v40, %v5607_v39 }
 0x26a   : > { %4810 = vrot.lane.b32.xlu1 %v5613_v41, %s5196_s30 }
 0x26b   : > { %4830 = vrot.lane.b32.xlu0 %v5617_v42, %s5196_s30 }
 0x26e   : > { %4815 = vrot.lane.b32.xlu1 %v5613_v41, %s5195_s29 }
 0x26f   : > { %4835 = vrot.lane.b32.xlu0 %v5617_v42, %s5195_s29 }
 0x272   : > { %4820 = vrot.lane.b32.xlu1 %v5613_v41, %s5197_s12 }
 0x273   : > { %4840 = vrot.lane.b32.xlu0 %v5617_v42, %s5197_s12 }
 0x276   : > { %4825 = vrot.lane.b32.xlu1 %v5613_v41, %s6533_s18 }
 0x277   : > { %4845 = vrot.lane.b32.xlu0 %v5617_v42, %s6533_s18  ;;  %s6558_s18 = smov 127  }
 0x27a   : > { %4850 = vrot.lane.b32.xlu1 %v5613_v41, %s6557_s27 }
 0x27b   : > { %4855 = vrot.lane.b32.xlu0 %v5617_v42, %s6557_s27 }
 0x27e   : > { %1530 = vrot.lane.b32.xlu1 %v5646_v47, %s5206_s11 }
 0x2dc   : > { %v4811_v48 = vpop.permute.xlu1 %4810 }
 0x2dd   : > { %v4831_v49 = vpop.permute.xlu0 %4830  ;;  %v4813_v50 = vunpack.i.h.bf16 %v4811_v48  ;;  %v4812_v51 = vunpack.i.l.bf16 %v4811_v48 }
 0x2de   : > { %v4833_v52 = vunpack.i.h.bf16 %v4831_v49  ;;  %v4832_v53 = vunpack.i.l.bf16 %v4831_v49 }
 0x2e0   : > { %v4816_v54 = vpop.permute.xlu1 %4815  ;;  %v1458_v60 = vsel %vm479_vm2, %v4832_v53, %v4812_v51  ;;  %v1459_v61 = vsel %vm479_vm2, %v4833_v52, %v4813_v50  ;;  %v1456_v4 = vsel %vm479_vm2, %v4812_v51, %v4832_v53  ;;  %v1457_v6 = vsel %vm479_vm2, %v4813_v50, %v4833_v52  ;;  %v5714_v53 = vld [vmem:[%s6514_s5 + $0x10] sm:$0xff] }
 0x2e1   : > { %v4818_v55 = vunpack.i.h.bf16 %v4816_v54  ;;  %v4817_v56 = vunpack.i.l.bf16 %v4816_v54  ;;  %v4836_v57 = vpop.permute.xlu0 %4835 }
 0x2e2   : > { %v4838_v58 = vunpack.i.h.bf16 %v4836_v57  ;;  %v4837_v59 = vunpack.i.l.bf16 %v4836_v57 }
 0x2e4   : > { %v1468_v62 = vsel %vm486_vm1, %v4817_v56, %v4837_v59  ;;  %v1469_v63 = vsel %vm486_vm1, %v4818_v55, %v4838_v58  ;;  %v1470_v1 = vsel %vm486_vm1, %v4837_v59, %v4817_v56  ;;  %v1471_v2 = vsel %vm486_vm1, %v4838_v58, %v4818_v55  ;;  %v4821_v3 = vpop.permute.xlu1 %4820 }
 0x2e5   : > { %v4841_v7 = vpop.permute.xlu0 %4840  ;;  %v5668_v9 = vsel %vm5423_vm3, %v1458_v60, %v1468_v62  ;;  %v5672_v10 = vsel %vm5423_vm3, %v1459_v61, %v1469_v63  ;;  %v4823_v11 = vunpack.i.h.bf16 %v4821_v3  ;;  %v4822_v14 = vunpack.i.l.bf16 %v4821_v3 }
 0x2e6   : > { %v5676_v15 = vpack.i.bf16 %v5672_v10, %v5668_v9  ;;  %v5680_v16 = vsel %vm5427_vm4, %v1456_v4, %v1470_v1  ;;  %v4843_v17 = vunpack.i.h.bf16 %v4841_v7  ;;  %v4842_v18 = vunpack.i.l.bf16 %v4841_v7 }
 0x2e7   : > { %v5684_v19 = vsel %vm5427_vm4, %v1457_v6, %v1471_v2  ;;  %v4539_v21 = vpack.c.bf16 %v5672_v10, %v5668_v9 }
 0x2e8   : > { %v4826_v22 = vpop.permute.xlu1 %4825  ;;  %4865 = vrot.lane.b32.xlu1 %v5676_v15, %s6557_s27  ;;  %v4859_v26 = vpack.i.bf16 %v5684_v19, %v5680_v16  ;;  %v4541_v32 = vpack.c.bf16 %v5684_v19, %v5680_v16  ;;  %v1484_v33 = vsel %vm495_vm5, %v4822_v14, %v4842_v18  ;;  %v1485_v34 = vsel %vm495_vm5, %v4823_v11, %v4843_v17 }
 0x2e9   : > { %v4828_v24 = vunpack.i.h.bf16 %v4826_v22  ;;  %v4827_v20 = vunpack.i.l.bf16 %v4826_v22  ;;  %v4846_v27 = vpop.permute.xlu0 %4845  ;;  %v1486_v35 = vsel %vm495_vm5, %v4842_v18, %v4822_v14  ;;  %v1487_v36 = vsel %vm495_vm5, %v4843_v17, %v4823_v11 }
 0x2ea   : > { %v4848_v28 = vunpack.i.h.bf16 %v4846_v27  ;;  %v4847_v29 = vunpack.i.l.bf16 %v4846_v27  ;;  %4860 = vrot.lane.b32.xlu0 %v4859_v26, %s6557_s27 }
 0x2ec   : > { %v1496_v48 = vsel %vm502_vm6, %v4827_v20, %v4847_v29  ;;  %v1497_v49 = vsel %vm502_vm6, %v4828_v24, %v4848_v28  ;;  %v1498_v50 = vsel %vm502_vm6, %v4847_v29, %v4827_v20  ;;  %v1499_v51 = vsel %vm502_vm6, %v4848_v28, %v4828_v24  ;;  %v4851_v52 = vpop.permute.xlu1 %4850 }
 0x2ed   : > { %v4853_v54 = vunpack.i.h.bf16 %v4851_v52  ;;  %v4852_v55 = vunpack.i.l.bf16 %v4851_v52  ;;  %v4856_v56 = vpop.permute.xlu0 %4855  ;;  %v5718_v57 = vsel %vm5462_vm8, %v1486_v35, %v1496_v48  ;;  %v5722_v58 = vsel %vm5462_vm8, %v1487_v36, %v1497_v49 }
 0x2ee   : > { %v4858_v59 = vunpack.i.h.bf16 %v4856_v56  ;;  %v4857_v60 = vunpack.i.l.bf16 %v4856_v56  ;;  %v4869_v61 = vpack.i.bf16 %v5722_v58, %v5718_v57  ;;  %v5728_v62 = vsel %vm5458_vm7, %v1484_v33, %v1498_v50  ;;  %1532 = vrot.lane.b32.xlu0 %v5714_v53, %s5206_s11 }
 0x2ef   : > { %v5734_v63 = vsel %vm5458_vm7, %v1485_v34, %v1499_v51  ;;  %v4549_v1 = vpack.c.bf16 %v5722_v58, %v5718_v57 }
 0x2f0   : > { %v1526_v2 = vsel %vm511_vm9, %v4857_v60, %v4852_v55  ;;  %v1527_v3 = vsel %vm511_vm9, %v4858_v59, %v4853_v54  ;;  %4870 = vrot.lane.b32.xlu1 %v4869_v61, %s6557_s27  ;;  %v4874_v4 = vpack.i.bf16 %v5734_v63, %v5728_v62  ;;  %v1524_v6 = vsel %vm511_vm9, %v4852_v55, %v4857_v60  ;;  %v1531_v18 = vpop.permute.xlu1 %1530 }
 0x2f1   : > { %v4529_v7 = vpack.c.bf16 %v1527_v3, %v1526_v2  ;;  %v1525_v11 = vsel %vm511_vm9, %v4853_v54, %v4858_v59  ;;  %v4547_v14 = vpack.c.bf16 %v5734_v63, %v5728_v62 }
 0x2f2   : > { %v4527_v17 = vpack.c.bf16 %v1525_v11, %v1524_v6  ;;  %4875 = vrot.lane.b32.xlu0 %v4874_v4, %s6557_s27 }
 0x2f4   : > { %4528 = vmatprep.subr.bf16.mxu1 %v4527_v17  ;;  %1709 = vrot.lane.b32.xlu1 %v5646_v47, %s6527_s28 }
 0x2f5   : > { %4530 = vmatpush1.bf16.msra.mxu1 %v4529_v7 }
 0x2f6   : > { %1711 = vrot.lane.b32.xlu0 %v5714_v53, %s6527_s28  ;;  %s6561_s28 = smov 32  }
 0x2f8   : > { %1798 = vrot.lane.b32.xlu1 %v5646_v47, %s6525_s21  ;;  %4458 = vmatmul.mubr.msk.f32.vlgmr.msra.gmra.mrb[2].mxu1 %vm1534_vm13, %v1531_v18 }
 0x2f9   : > { %1609 = vmatprep.mubr.f32.mxu1 %v5201_v23 }
 0x2fa   : > { %1800 = vrot.lane.b32.xlu0 %v5714_v53, %s6525_s21  ;;  %s6535_s21 = smov 32  }
 0x2fc   : > { %1887 = vrot.lane.b32.xlu1 %v5646_v47, %s6531_s26 }
 0x2fe   : > { %1889 = vrot.lane.b32.xlu0 %v5714_v53, %s6531_s26  ;;  %s6562_s26 = smov 96  }
 0x300   : > { %1976 = vrot.lane.b32.xlu1 %v5646_v47, %s6529_s25 }
 0x302   : > { %4880 = vrot.lane.b32.xlu0 %v4859_v26, %s5206_s11 }
 0x304   : > { %4885 = vrot.lane.b32.xlu1 %v5676_v15, %s5206_s11  ;;  %v2366_v15 = vld [vmem:[%s6515_s6] sm:$0xff] }
 0x306   : > { %1978 = vrot.lane.b32.xlu0 %v5714_v53, %s6529_s25  ;;  %s6563_s25 = smov 80  }
 0x308   : > { %2077 = vrot.lane.b32.xlu1 %v5646_v47, %s6535_s21 }
 0x30a   : > { %4890 = vrot.lane.b32.xlu0 %v5613_v41, %s5206_s11  ;;  %v2367_v41 = vld [vmem:[%s6515_s6 + $0x8] sm:$0xff] }
 0x30c   : > { %4895 = vrot.lane.b32.xlu1 %v5617_v42, %s5206_s11 }
 0x30e   : > { %2079 = vrot.lane.b32.xlu0 %v5714_v53, %s6535_s21  ;;  %s6560_s21 = smov 48  }
 0x310   : > { %2178 = vrot.lane.b32.xlu1 %v5646_v47, %s6557_s27 }
 0x312   : > { %4900 = vrot.lane.b32.xlu0 %v4869_v61, %s5206_s11 }
 0x314   : > { %4905 = vrot.lane.b32.xlu1 %v4874_v4, %s5206_s11 }
 0x316   : > { %2180 = vrot.lane.b32.xlu0 %v5714_v53, %s6557_s27 }
 0x318   : > { %2370 = vperm.xlu1 %4808, %v2366_v15  }
 0x31a   : > { %2375 = vperm.xlu0 %4807, %v2367_v41  }
 0x35a   : > { %v4866_v42 = vpop.permute.xlu1 %4865 }
 0x35b   : > { %v4868_v22 = vunpack.i.h.bf16 %v4866_v42  ;;  %v4867_v24 = vunpack.i.l.bf16 %v4866_v42 }
 0x35c   : > { %v4861_v20 = vpop.permute.xlu0 %4860 }
 0x35d   : > { %v4863_v26 = vunpack.i.h.bf16 %v4861_v20  ;;  %v4862_v27 = vunpack.i.l.bf16 %v4861_v20 }
 0x35f   : > { %v1515_v28 = vsel %vm511_vm9, %v4868_v22, %v4863_v26  ;;  %v1514_v29 = vsel %vm511_vm9, %v4867_v24, %v4862_v27  ;;  %v1512_v33 = vsel %vm511_vm9, %v4862_v27, %v4867_v24  ;;  %v1513_v34 = vsel %vm511_vm9, %v4863_v26, %v4868_v22 }
 0x360   : > { %v4533_v35 = vpack.c.bf16 %v1515_v28, %v1514_v29  ;;  %v1533_v36 = vpop.permute.xlu0 %1532  ;;  %v4531_v48 = vpack.c.bf16 %v1513_v34, %v1512_v33 }
 0x361   : > { %4459 = vmatmul.mubr.msk.f32.gmra.mrb[4].mxu1 %vm1534_vm13, %v1533_v36 }
 0x362   : > { %v4871_v49 = vpop.permute.xlu1 %4870  ;;  %4532 = vmatprep.subr.bf16.mxu1 %v4531_v48  ;;  %1684 = vmatprep.mubr.f32.mxu1 %v5201_v23 }
 0x363   : > { %4534 = vmatpush1.bf16.msra.mxu1 %v4533_v35  ;;  %v4873_v50 = vunpack.i.h.bf16 %v4871_v49  ;;  %v4872_v51 = vunpack.i.l.bf16 %v4871_v49 }
 0x364   : > { %v4876_v52 = vpop.permute.xlu0 %4875 }
 0x365   : > { %v4878_v54 = vunpack.i.h.bf16 %v4876_v52  ;;  %v4877_v55 = vunpack.i.l.bf16 %v4876_v52 }
 0x366   : > { %v1710_v56 = vpop.permute.xlu1 %1709  ;;  %4460 = vmatmul.mubr.msk.f32.vlgmr.msra.gmra.mrb[2].mxu1 %vm1534_vm13, %v5646_v47 }
 0x367   : > { %v1708_v59 = vsel %vm511_vm9, %v4878_v54, %v4873_v50  ;;  %v1707_v60 = vsel %vm511_vm9, %v4877_v55, %v4872_v51  ;;  %1690 = vmatprep.mubr.f32.mxu1 %v5201_v23  ;;  %v1705_v61 = vsel %vm511_vm9, %v4872_v51, %v4877_v55  ;;  %v1706_v2 = vsel %vm511_vm9, %v4873_v50, %v4878_v54 }
 0x368   : > { %v4537_v3 = vpack.c.bf16 %v1708_v59, %v1707_v60  ;;  %v1712_v4 = vpop.permute.xlu0 %1711  ;;  %v4535_v6 = vpack.c.bf16 %v1706_v2, %v1705_v61  ;;  %v1445_v59 = vld [vmem:[%s6514_s5 + $0x8] sm:$0xff]  ;;  %v1447_v60 = vld [vmem:[%s6514_s5 + $0x18] sm:$0xff] }
 0x36a   : > { %v1799_v7 = vpop.permute.xlu1 %1798  ;;  %4461 = vmatmul.mubr.msk.f32.gmra.mrb[4].mxu1 %vm1534_vm13, %v5714_v53  ;;  %4536 = vmatprep.subr.bf16.mxu1 %v4535_v6 }
 0x36b   : > { %4538 = vmatpush1.bf16.msra.mxu1 %v4537_v3  ;;  %1781 = vmatprep.mubr.f32.mxu1 %v5201_v23 }
 0x36c   : > { %v1801_v47 = vpop.permute.xlu0 %1800  ;;  %4540 = vmatprep.subr.bf16.mxu1 %v4539_v21 }
 0x36e   : > { %v1888_v11 = vpop.permute.xlu1 %1887  ;;  %4462 = vmatmul.mubr.msk.f32.vlgmr.msra.gmra.mrb[2].mxu1 %vm1534_vm13, %v1710_v56 }
 0x36f   : > { %4542 = vmatpush1.bf16.msra.mxu1 %v4541_v32  ;;  %1787 = vmatprep.mubr.f32.mxu1 %v5201_v23 }
 0x370   : > { %v1890_v17 = vpop.permute.xlu0 %1889  ;;  %4544 = vmatprep.subr.bf16.mxu1 %v4543_v43 }
 0x372   : > { %v1977_v53 = vpop.permute.xlu1 %1976  ;;  %4463 = vmatmul.mubr.msk.f32.gmra.mrb[4].mxu1 %vm1534_vm13, %v1712_v4 }
 0x373   : > { %1870 = vmatprep.mubr.f32.mxu1 %v5201_v23 }
 0x374   : > { %v4881_v9 = vpop.permute.xlu0 %4880 }
 0x375   : > { %v4883_v16 = vunpack.i.h.bf16 %v4881_v9  ;;  %v4882_v19 = vunpack.i.l.bf16 %v4881_v9 }
 0x376   : > { %v4886_v10 = vpop.permute.xlu1 %4885  ;;  %4464 = vmatmul.mubr.msk.f32.vlgmr.msra.gmra.mrb[2].mxu1 %vm1534_vm13, %v1799_v7 }
 0x377   : > { %v4888_v21 = vunpack.i.h.bf16 %v4886_v10  ;;  %v4887_v18 = vunpack.i.l.bf16 %v4886_v10  ;;  %4546 = vmatpush1.bf16.msra.mxu1 %v4545_v44  ;;  %1876 = vmatprep.mubr.f32.mxu1 %v5201_v23 }
 0x378   : > { %4548 = vmatprep.subr.bf16.mxu1 %v4547_v14  ;;  %v1979_v39 = vpop.permute.xlu0 %1978 }
 0x379   : > { %v2075_v43 = vsel %vm1092_vm12, %v4887_v18, %v4882_v19  ;;  %v2076_v32 = vsel %vm1092_vm12, %v4888_v21, %v4883_v16  ;;  %v2073_v20 = vsel %vm1092_vm12, %v4882_v19, %v4887_v18  ;;  %v2074_v26 = vsel %vm1092_vm12, %v4883_v16, %v4888_v21 }
 0x37a   : > { %v2078_v40 = vpop.permute.xlu1 %2077  ;;  %4465 = vmatmul.mubr.msk.f32.gmra.mrb[4].mxu1 %vm1534_vm13, %v1801_v47  ;;  %v4551_v38 = vpack.c.bf16 %v2076_v32, %v2075_v43 }
 0x37b   : > { %1959 = vmatprep.mubr.f32.mxu1 %v5201_v23 }
 0x37c   : > { %v4891_v37 = vpop.permute.xlu0 %4890 }
 0x37d   : > { %v4893_v63 = vunpack.i.h.bf16 %v4891_v37  ;;  %v4892_v14 = vunpack.i.l.bf16 %v4891_v37 }
 0x37e   : > { %v4896_v44 = vpop.permute.xlu1 %4895  ;;  %4466 = vmatmul.mubr.msk.f32.vlgmr.msra.gmra.mrb[2].mxu1 %vm1534_vm13, %v1888_v11 }
 0x37f   : > { %v4898_v15 = vunpack.i.h.bf16 %v4896_v44  ;;  %v4897_v62 = vunpack.i.l.bf16 %v4896_v44  ;;  %4550 = vmatpush1.bf16.msra.mxu1 %v4549_v1  ;;  %1965 = vmatprep.mubr.f32.mxu1 %v5201_v23  ;;  %v4553_v1 = vpack.c.bf16 %v2074_v26, %v2073_v20 }
 0x380   : > { %4552 = vmatprep.subr.bf16.mxu1 %v4551_v38  ;;  %v2080_v41 = vpop.permute.xlu0 %2079 }
 0x381   : > { %v2176_v22 = vsel %vm1092_vm12, %v4897_v62, %v4892_v14  ;;  %v2177_v24 = vsel %vm1092_vm12, %v4898_v15, %v4893_v63  ;;  %v2174_v48 = vsel %vm1092_vm12, %v4892_v14, %v4897_v62  ;;  %v2175_v49 = vsel %vm1092_vm12, %v4893_v63, %v4898_v15 }
 0x382   : > { %v2179_v42 = vpop.permute.xlu1 %2178  ;;  %4467 = vmatmul.mubr.msk.f32.gmra.mrb[4].mxu1 %vm1534_vm13, %v1890_v17  ;;  %v4555_v58 = vpack.c.bf16 %v2177_v24, %v2176_v22  ;;  %v4557_v51 = vpack.c.bf16 %v2175_v49, %v2174_v48 }
 0x383   : > { %2048 = vmatprep.mubr.f32.mxu1 %v5201_v23 }
 0x384   : > { %v4901_v57 = vpop.permute.xlu0 %4900 }
 0x385   : > { %v4903_v33 = vunpack.i.h.bf16 %v4901_v57  ;;  %v4902_v34 = vunpack.i.l.bf16 %v4901_v57 }
 0x386   : > { %v4906_v27 = vpop.permute.xlu1 %4905  ;;  %4468 = vmatmul.mubr.msk.f32.vlgmr.msra.gmra.mrb[2].mxu1 %vm1534_vm13, %v1977_v53 }
 0x387   : > { %v4908_v28 = vunpack.i.h.bf16 %v4906_v27  ;;  %v4907_v29 = vunpack.i.l.bf16 %v4906_v27  ;;  %4554 = vmatpush1.bf16.msra.mxu1 %v4553_v1  ;;  %2054 = vmatprep.mubr.f32.mxu1 %v5201_v23 }
 0x388   : > { %4556 = vmatprep.subr.bf16.mxu1 %v4555_v58  ;;  %v2181_v56 = vpop.permute.xlu0 %2180 }
 0x389   : > { %v2277_v35 = vsel %vm1092_vm12, %v4907_v29, %v4902_v34  ;;  %v2278_v36 = vsel %vm1092_vm12, %v4908_v28, %v4903_v33  ;;  %v2275_v52 = vsel %vm1092_vm12, %v4902_v34, %v4907_v29  ;;  %v2276_v54 = vsel %vm1092_vm12, %v4903_v33, %v4908_v28 }
 0x38a   : > { %4469 = vmatmul.mubr.msk.f32.gmra.mrb[4].mxu1 %vm1534_vm13, %v1979_v39  ;;  %v4559_v50 = vpack.c.bf16 %v2278_v36, %v2277_v35  ;;  %v4561_v55 = vpack.c.bf16 %v2276_v54, %v2275_v52 }
 0x38b   : > { %2149 = vmatprep.mubr.f32.mxu1 %v5201_v23 }
 0x38e   : > { %4470 = vmatmul.mubr.msk.f32.vlgmr.msra.gmra.mrb[2].mxu1 %vm1534_vm13, %v2078_v40 }
 0x38f   : > { %4558 = vmatpush1.bf16.msra.mxu1 %v4557_v51  ;;  %2155 = vmatprep.mubr.f32.mxu1 %v5201_v23 }
 0x390   : > { %4560 = vmatprep.subr.bf16.mxu1 %v4559_v50 }
 0x392   : > { %4471 = vmatmul.mubr.msk.f32.gmra.mrb[4].mxu1 %vm1534_vm13, %v2080_v41 }
 0x393   : > { %2250 = vmatprep.mubr.f32.mxu1 %v5201_v23 }
 0x396   : > { %4472 = vmatmul.mubr.msk.f32.vlgmr.msra.gmra.mrb[2].mxu1 %vm1534_vm13, %v2179_v42 }
 0x397   : > { %4562 = vmatpush1.bf16.msra.mxu1 %v4561_v55  ;;  %2256 = vmatprep.mubr.f32.mxu1 %v5201_v23  ;;  %v2371_v61 = vpop.permute.xlu1 %2370 }
 0x399   : > { %v2376_v47 = vpop.permute.xlu0 %2375 }
 0x39a   : > { %4473 = vmatmul.mubr.msk.f32.gmra.mrb[4].mxu1 %vm1534_vm13, %v2181_v56  ;;  %v5916_v56 = vld [vmem:[%s6516_s7] sm:$0xff] }
 0x39b   : > { %2349 = vmatprep.mubr.f32.mxu1 %v5201_v23 }
 0x39e   : > { %4474 = vmatmul.mubr.msk.f32.vlgmr.msra.gmra.mrb[2].mxu1 %vm1534_vm13, %v1445_v59  ;;  %v5921_v59 = vld [vmem:[%s6516_s7 + $0x10] sm:$0xff] }
 0x39f   : > { %2355 = vmatprep.mubr.f32.mxu1 %v5201_v23 }
 0x3a2   : > { %4475 = vmatmul.mubr.msk.f32.gmra.mrb[4].mxu1 %vm1534_vm13, %v1447_v60  ;;  %v5930_v60 = vld [vmem:[%s6516_s7 + $0x20] sm:$0xff] }
 0x3a3   : > { %2590 = vmatprep.mubr.f32.mxu1 %v5201_v23 }
 0x471   : > { %v2351_v2 = vpop.f32.mrb[2].mxu1 }
 0x472   : > { %v2378_v3 = vadd.f32 %v2371_v61, %v2351_v2  ;;  %v2353_v4 = vpop.f32.mrb[3].mxu1 }
 0x473   : > { %v2379_v6 = vadd.f32 %v2371_v61, %v2353_v4  ;;  %v5939_v61 = vld [vmem:[%s6516_s7 + $0x30] sm:$0x1] }
 0x474   : > { %v2386_v7 = vmul.f32 0.044715, %v2378_v3  ;;  %v2382_v27 = vmul.f32 0.5, %v2378_v3 }
 0x475   : > { %v2387_v11 = vmul.f32 0.044715, %v2379_v6  ;;  %v2357_v17 = vpop.f32.mrb[4].mxu1  ;;  %v2383_v33 = vmul.f32 0.5, %v2379_v6 }
 0x476   : > { %v2390_v53 = vmul.f32 %v2386_v7, %v2378_v3  ;;  %v2380_v9 = vadd.f32 %v2376_v47, %v2357_v17  ;;  %v2359_v10 = vpop.f32.mrb[5].mxu1 }
 0x477   : > { %v2391_v21 = vmul.f32 %v2387_v11, %v2379_v6  ;;  %v2381_v18 = vadd.f32 %v2376_v47, %v2359_v10 }
 0x478   : > { %v2394_v16 = vmul.f32 %v2390_v53, %v2378_v3  ;;  %v2388_v19 = vmul.f32 0.044715, %v2380_v9  ;;  %v2384_v28 = vmul.f32 0.5, %v2380_v9 }
 0x479   : > { %v2395_v39 = vmul.f32 %v2391_v21, %v2379_v6  ;;  %v2389_v40 = vmul.f32 0.044715, %v2381_v18  ;;  %v2385_v34 = vmul.f32 0.5, %v2381_v18 }
 0x47a   : > { %v2398_v43 = vadd.f32 %v2394_v16, %v2378_v3  ;;  %v2392_v32 = vmul.f32 %v2388_v19, %v2380_v9 }
 0x47b   : > { %v2399_v37 = vadd.f32 %v2395_v39, %v2379_v6  ;;  %v2393_v38 = vmul.f32 %v2389_v40, %v2381_v18 }
 0x47c   : > { %v2402_v44 = vmul.f32 0.7978846, %v2398_v43  ;;  %v2396_v15 = vmul.f32 %v2392_v32, %v2380_v9 }
 0x47d   : > { %v2403_v62 = vmul.f32 0.7978846, %v2399_v37  ;;  %v2397_v63 = vmul.f32 %v2393_v38, %v2381_v18 }
 0x47e   : > { %5017 = vtanh.f32 %v2402_v44  ;;  %v2400_v14 = vadd.f32 %v2396_v15, %v2380_v9 }
 0x47f   : > { %5019 = vtanh.f32 %v2403_v62  ;;  %v2401_v41 = vadd.f32 %v2397_v63, %v2381_v18 }
 0x480   : > { %v2404_v42 = vmul.f32 0.7978846, %v2400_v14 }
 0x481   : > { %v2405_v22 = vmul.f32 0.7978846, %v2401_v41 }
 0x482   : > { %5021 = vtanh.f32 %v2404_v42 }
 0x483   : > { %5023 = vtanh.f32 %v2405_v22 }
 0x488   : > { %v5018_v24 = vpop.eup %5017 }
 0x489   : > { %v5020_v20 = vpop.eup %5019  ;;  %v2410_v26 = vadd.f32 1.0, %v5018_v24 }
 0x48a   : > { %v2411_v58 = vadd.f32 1.0, %v5020_v20 }
 0x48b   : > { %v2414_v36 = vmul.f32 %v2410_v26, %v2382_v27 }
 0x48c   : > { %v5022_v57 = vpop.eup %5021  ;;  %v2415_v49 = vmul.f32 %v2411_v58, %v2383_v33 }
 0x48d   : > { %v5024_v1 = vpop.eup %5023  ;;  %v2412_v29 = vadd.f32 1.0, %v5022_v57 }
 0x48e   : > { %v2413_v35 = vadd.f32 1.0, %v5024_v1 }
 0x48f   : > { %v2416_v48 = vmul.f32 %v2412_v29, %v2384_v28 }
 0x490   : > { %v2417_v50 = vmul.f32 %v2413_v35, %v2385_v34 }
 0x491   : > { %v5893_v51 = vpack.i.bf16 %v2416_v48, %v2414_v36  ;;  %v4581_v52 = vpack.c.bf16 %v2416_v48, %v2414_v36 }
 0x492   : > { %v5895_v54 = vpack.i.bf16 %v2417_v50, %v2415_v49  ;;  %v4579_v55 = vpack.c.bf16 %v2417_v50, %v2415_v49 }
 0x493   : > { %4910 = vrot.lane.b32.xlu1 %v5893_v51, %s5196_s30 }
 0x494   : > { %4920 = vrot.lane.b32.xlu0 %v5895_v54, %s5196_s30  ;;  %4580 = vmatprep.subr.bf16.mxu0 %v4579_v55 }
 0x495   : > { %4582 = vmatpush1.bf16.msra.mxu0 %v4581_v52 }
 0x497   : > { %4915 = vrot.lane.b32.xlu1 %v5893_v51, %s5195_s29 }
 0x498   : > { %4925 = vrot.lane.b32.xlu0 %v5895_v54, %s5195_s29  ;;  %s6559_s29 = smov 64  }
 0x49b   : > { %4930 = vrot.lane.b32.xlu1 %v5893_v51, %s5197_s12 }
 0x49c   : > { %4940 = vrot.lane.b32.xlu0 %v5895_v54, %s5197_s12  ;;  %s4525_s12 = sshll.u32 %s5293_s17, 5 }
 0x49d   : > { %s6425_s17 = scalar_lea.hbm %s6518_s9, %s4525_s12 }
 0x49f   : > { %4935 = vrot.lane.b32.xlu1 %v5893_v51, %s6558_s18 }
 0x4a0   : > { %4945 = vrot.lane.b32.xlu0 %v5895_v54, %s6558_s18 }
 0x4a3   : > { %2950 = vrot.lane.b32.xlu1 %v5916_v56, %s6559_s29 }
 0x4a4   : > { %2952 = vrot.lane.b32.xlu0 %v5921_v59, %s6559_s29 }
 0x4a7   : > { %2954 = vrot.lane.b32.xlu1 %v5930_v60, %s6559_s29 }
 0x4a8   : > { %4950 = vrot.lane.b32.xlu0 %v5893_v51, %s6557_s27 }
 0x4ab   : > { %2510 = vrot.lane.b32.xlu1 %v5916_v56, %s5206_s11 }
 0x4ac   : > { %2956 = vrot.lane.b32.xlu0 %v5939_v61, %s6559_s29 }
 0x4af   : > { %2512 = vrot.lane.b32.xlu1 %v5921_v59, %s5206_s11 }
 0x4b0   : > { %3063 = vrot.lane.b32.xlu0 %v5916_v56, %s6560_s21 }
 0x4b3   : > { %4955 = vrot.lane.b32.xlu1 %v5895_v54, %s6557_s27 }
 0x4b4   : > { %3065 = vrot.lane.b32.xlu0 %v5921_v59, %s6560_s21 }
 0x4b7   : > { %2514 = vrot.lane.b32.xlu1 %v5930_v60, %s5206_s11 }
 0x4b8   : > { %3067 = vrot.lane.b32.xlu0 %v5930_v60, %s6560_s21 }
 0x4bb   : > { %2516 = vrot.lane.b32.xlu1 %v5939_v61, %s5206_s11 }
 0x4bc   : > { %3069 = vrot.lane.b32.xlu0 %v5939_v61, %s6560_s21 }
 0x505   : > { %v4911_v2 = vpop.permute.xlu1 %4910 }
 0x506   : > { %v4921_v3 = vpop.permute.xlu0 %4920  ;;  %v4913_v4 = vunpack.i.h.bf16 %v4911_v2  ;;  %v4912_v6 = vunpack.i.l.bf16 %v4911_v2 }
 0x507   : > { %v4923_v7 = vunpack.i.h.bf16 %v4921_v3  ;;  %v4922_v47 = vunpack.i.l.bf16 %v4921_v3 }
 0x509   : > { %v4916_v11 = vpop.permute.xlu1 %4915  ;;  %v2437_v18 = vsel %vm479_vm2, %v4923_v7, %v4913_v4  ;;  %v2436_v16 = vsel %vm479_vm2, %v4922_v47, %v4912_v6  ;;  %v2435_v37 = vsel %vm479_vm2, %v4913_v4, %v4923_v7  ;;  %v2434_v38 = vsel %vm479_vm2, %v4912_v6, %v4922_v47 }
 0x50a   : > { %v4918_v17 = vunpack.i.h.bf16 %v4916_v11  ;;  %v4917_v53 = vunpack.i.l.bf16 %v4916_v11  ;;  %v4926_v9 = vpop.permute.xlu0 %4925 }
 0x50b   : > { %v4928_v10 = vunpack.i.h.bf16 %v4926_v9  ;;  %v4927_v21 = vunpack.i.l.bf16 %v4926_v9 }
 0x50d   : > { %v2447_v19 = vsel %vm486_vm1, %v4918_v17, %v4928_v10  ;;  %v2449_v39 = vsel %vm486_vm1, %v4928_v10, %v4918_v17  ;;  %v2446_v40 = vsel %vm486_vm1, %v4917_v53, %v4927_v21  ;;  %v2448_v43 = vsel %vm486_vm1, %v4927_v21, %v4917_v53  ;;  %v4931_v32 = vpop.permute.xlu1 %4930 }
 0x50e   : > { %v4941_v44 = vpop.permute.xlu0 %4940  ;;  %v5979_v15 = vsel %vm5423_vm3, %v2436_v16, %v2446_v40  ;;  %v5983_v62 = vsel %vm5423_vm3, %v2437_v18, %v2447_v19  ;;  %v4933_v63 = vunpack.i.h.bf16 %v4931_v32  ;;  %v5989_v42 = vsel %vm5427_vm4, %v2434_v38, %v2448_v43 }
 0x50f   : > { %v4943_v14 = vunpack.i.h.bf16 %v4941_v44  ;;  %v4964_v41 = vpack.i.bf16 %v5983_v62, %v5979_v15  ;;  %v4932_v22 = vunpack.i.l.bf16 %v4931_v32  ;;  %v4942_v24 = vunpack.i.l.bf16 %v4941_v44 }
 0x510   : > { %v5993_v20 = vsel %vm5427_vm4, %v2435_v37, %v2449_v39  ;;  %v4575_v30 = vpack.c.bf16 %v5983_v62, %v5979_v15  ;;  %vm6415_vm3 = vcmp.lt.s32.totalorder %v396_v0, 256 }
 0x511   : > { %v4936_v26 = vpop.permute.xlu1 %4935  ;;  %4965 = vrot.lane.b32.xlu0 %v4964_v41, %s6557_s27  ;;  %v4959_v1 = vpack.i.bf16 %v5993_v20, %v5989_v42  ;;  %v2463_v28 = vsel %vm495_vm5, %v4933_v63, %v4943_v14  ;;  %v4577_v31 = vpack.c.bf16 %v5993_v20, %v5989_v42  ;;  %v2465_v34 = vsel %vm495_vm5, %v4943_v14, %v4933_v63 }
 0x512   : > { %v4938_v57 = vunpack.i.h.bf16 %v4936_v26  ;;  %v4937_v58 = vunpack.i.l.bf16 %v4936_v26  ;;  %v4946_v27 = vpop.permute.xlu0 %4945  ;;  %v2462_v35 = vsel %vm495_vm5, %v4932_v22, %v4942_v24  ;;  %v2464_v36 = vsel %vm495_vm5, %v4942_v24, %v4932_v22  ;;  %v3548_v26 = vld [vmem:[%s6517_s8 + $0x8] sm:$0xff] }
 0x513   : > { %v4948_v29 = vunpack.i.h.bf16 %v4946_v27  ;;  %v4947_v33 = vunpack.i.l.bf16 %v4946_v27  ;;  %4960 = vrot.lane.b32.xlu1 %v4959_v1, %s6557_s27 }
 0x515   : > { %v2475_v48 = vsel %vm502_vm6, %v4938_v57, %v4948_v29  ;;  %v2477_v49 = vsel %vm502_vm6, %v4948_v29, %v4938_v57  ;;  %v2474_v50 = vsel %vm502_vm6, %v4937_v58, %v4947_v33  ;;  %v2476_v52 = vsel %vm502_vm6, %v4947_v33, %v4937_v58  ;;  %v2951_v55 = vpop.permute.xlu1 %2950  ;;  %4975 = vrot.lane.b32.xlu0 %v4964_v41, %s5206_s11  ;;  %v3547_v57 = vld [vmem:[%s6517_s8] sm:$0xff]  ;;  %v3550_v58 = vld [vmem:[%s6517_s8 + $0x18] sm:$0x1] }
 0x516   : > { %v2478_v2 = vsel %vm5462_vm8, %v2464_v36, %v2474_v50  ;;  %v2480_v3 = vsel %vm5462_vm8, %v2465_v34, %v2475_v48  ;;  %v2953_v4 = vpop.permute.xlu0 %2952  ;;  %v2479_v6 = vsel %vm5458_vm7, %v2462_v35, %v2476_v52  ;;  %v2481_v7 = vsel %vm5458_vm7, %v2463_v28, %v2477_v49  ;;  %4492 = vmatmul.mubr.msk.f32.vlgmr.msra.gmra.mrb[4].mxu0 %vm1534_vm13, %v2951_v55 }
 0x517   : > { %v4583_v47 = vpack.c.bf16 %v2481_v7, %v2479_v6  ;;  %v4585_v11 = vpack.c.bf16 %v2480_v3, %v2478_v2  ;;  %3036 = vmatprep.mubr.f32.mxu0 %v5201_v23  ;;  %4970 = vrot.lane.b32.xlu1 %v4959_v1, %s5206_s11  ;;  %v4989_v21 = vpack.i.bf16 %v2480_v3, %v2478_v2  ;;  %v3549_v1 = vld [vmem:[%s6517_s8 + $0x10] sm:$0xff] }
 0x518   : > { %v4994_v18 = vpack.i.bf16 %v2481_v7, %v2479_v6 }
 0x519   : > { %v2955_v17 = vpop.permute.xlu1 %2954  ;;  %3190 = vrot.lane.b32.xlu0 %v5921_v59, %s6561_s28  ;;  %4584 = vmatprep.subr.bf16.mxu0 %v4583_v47 }
 0x51a   : > { %v4951_v46 = vpop.permute.xlu0 %4950  ;;  %4586 = vmatpush1.bf16.msra.mxu0 %v4585_v11 }
 0x51b   : > { %4493 = vmatmul.mubr.msk.f32.gmra.mrb[6].mxu0 %vm1534_vm13, %v2953_v4  ;;  %3188 = vrot.lane.b32.xlu1 %v5916_v56, %s6561_s28  ;;  %v4953_v16 = vunpack.i.h.bf16 %v4951_v46  ;;  %v4952_v19 = vunpack.i.l.bf16 %v4951_v46 }
 0x51c   : > { %3042 = vmatprep.mubr.f32.mxu0 %v5201_v23 }
 0x51d   : > { %v2511_v45 = vpop.permute.xlu1 %2510  ;;  %4980 = vrot.lane.b32.xlu0 %v5893_v51, %s5206_s11 }
 0x51e   : > { %v2957_v53 = vpop.permute.xlu0 %2956 }
 0x51f   : > { %4494 = vmatmul.mubr.msk.f32.gmra.mrb[8].mxu0 %vm1534_vm13, %v2955_v17  ;;  %3192 = vrot.lane.b32.xlu1 %v5930_v60, %s6561_s28 }
 0x520   : > { %3048 = vmatprep.mubr.f32.mxu0 %v5201_v23 }
 0x521   : > { %v2513_v9 = vpop.permute.xlu1 %2512  ;;  %3194 = vrot.lane.b32.xlu0 %v5939_v61, %s6561_s28 }
 0x522   : > { %v3064_v10 = vpop.permute.xlu0 %3063 }
 0x523   : > { %4495 = vmatmul.mubr.msk.f32.gmra.mrb[10].mxu0 %vm1534_vm13, %v2957_v53  ;;  %4985 = vrot.lane.b32.xlu1 %v5895_v54, %s5206_s11 }
 0x524   : > { %3143 = vmatprep.mubr.f32.mxu0 %v5201_v23 }
 0x525   : > { %v4956_v51 = vpop.permute.xlu1 %4955  ;;  %4990 = vrot.lane.b32.xlu0 %v4989_v21, %s6557_s27 }
 0x526   : > { %v4958_v39 = vunpack.i.h.bf16 %v4956_v51  ;;  %v4957_v40 = vunpack.i.l.bf16 %v4956_v51  ;;  %v3066_v43 = vpop.permute.xlu0 %3065 }
 0x527   : > { %4496 = vmatmul.mubr.msk.f32.vlgmr.msra.gmra.mrb[4].mxu0 %vm1534_vm13, %v3064_v10  ;;  %4995 = vrot.lane.b32.xlu1 %v4994_v18, %s6557_s27 }
 0x528   : > { %v2504_v32 = vsel %vm511_vm9, %v4957_v40, %v4952_v19  ;;  %v2505_v37 = vsel %vm511_vm9, %v4958_v39, %v4953_v16  ;;  %v2502_v54 = vsel %vm511_vm9, %v4952_v19, %v4957_v40  ;;  %v2503_v38 = vsel %vm511_vm9, %v4953_v16, %v4958_v39  ;;  %3149 = vmatprep.mubr.f32.mxu0 %v5201_v23 }
 0x529   : > { %v4565_v44 = vpack.c.bf16 %v2505_v37, %v2504_v32  ;;  %3313 = vrot.lane.b32.xlu0 %v5916_v56, %s6557_s27  ;;  %v4563_v63 = vpack.c.bf16 %v2503_v38, %v2502_v54  ;;  %v2515_v22 = vpop.permute.xlu1 %2514 }
 0x52a   : > { %v3068_v14 = vpop.permute.xlu0 %3067 }
 0x52b   : > { %4564 = vmatprep.subr.bf16.mxu1 %v4563_v63  ;;  %4497 = vmatmul.mubr.msk.f32.gmra.mrb[6].mxu0 %vm1534_vm13, %v3066_v43 }
 0x52c   : > { %2724 = vrot.lane.b32.xlu1 %v5916_v56, %s6562_s26  ;;  %4566 = vmatpush1.bf16.msra.mxu1 %v4565_v44 }
 0x52d   : > { %3315 = vrot.lane.b32.xlu0 %v5921_v59, %s6557_s27  ;;  %3155 = vmatprep.mubr.f32.mxu0 %v5201_v23  ;;  %v2517_v24 = vpop.permute.xlu1 %2516 }
 0x52e   : > { %v3070_v41 = vpop.permute.xlu0 %3069 }
 0x52f   : > { %4476 = vmatmul.mubr.msk.f32.vlgmr.msra.gmra.mrb[6].mxu1 %vm1534_vm13, %v2511_v45  ;;  %4498 = vmatmul.mubr.msk.f32.gmra.mrb[8].mxu0 %vm1534_vm13, %v3068_v14 }
 0x530   : > { %2726 = vrot.lane.b32.xlu1 %v5921_v59, %s6562_s26  ;;  %2596 = vmatprep.mubr.f32.mxu1 %v5201_v23 }
 0x531   : > { %3317 = vrot.lane.b32.xlu0 %v5930_v60, %s6557_s27  ;;  %3161 = vmatprep.mubr.f32.mxu0 %v5201_v23 }
 0x533   : > { %4477 = vmatmul.mubr.msk.f32.gmra.mrb[8].mxu1 %vm1534_vm13, %v2513_v9  ;;  %4499 = vmatmul.mubr.msk.f32.gmra.mrb[10].mxu0 %vm1534_vm13, %v3070_v41 }
 0x534   : > { %2728 = vrot.lane.b32.xlu1 %v5930_v60, %s6562_s26  ;;  %2602 = vmatprep.mubr.f32.mxu1 %v5201_v23 }
 0x535   : > { %5005 = vrot.lane.b32.xlu0 %v4994_v18, %s5206_s11  ;;  %3268 = vmatprep.mubr.f32.mxu0 %v5201_v23 }
 0x537   : > { %4478 = vmatmul.mubr.msk.f32.gmra.mrb[10].mxu1 %vm1534_vm13, %v2515_v22 }
 0x538   : > { %5000 = vrot.lane.b32.xlu1 %v4989_v21, %s5206_s11  ;;  %2608 = vmatprep.mubr.f32.mxu1 %v5201_v23 }
 0x539   : > { %3319 = vrot.lane.b32.xlu0 %v5939_v61, %s6557_s27 }
 0x53b   : > { %4479 = vmatmul.mubr.msk.f32.gmra.mrb[12].mxu1 %vm1534_vm13, %v2517_v24 }
 0x53c   : > { %2730 = vrot.lane.b32.xlu1 %v5939_v61, %s6562_s26  ;;  %2687 = vmatprep.mubr.f32.mxu1 %v5201_v23 }
 0x53d   : > { %2839 = vrot.lane.b32.xlu0 %v5921_v59, %s6563_s25 }
 0x540   : > { %2837 = vrot.lane.b32.xlu1 %v5916_v56, %s6563_s25 }
 0x541   : > { %3558 = vperm.xlu0 %4807, %v3548_v26  }
 0x544   : > { %3553 = vperm.xlu1 %4808, %v3547_v57  }
 0x545   : > { %2843 = vrot.lane.b32.xlu0 %v5939_v61, %s6563_s25 }
 0x548   : > { %2841 = vrot.lane.b32.xlu1 %v5930_v60, %s6563_s25  ;;  %s6408_s25 = sand.u32 1, %s5181_s14  }
 0x549   : > { %3568 = vperm.xlu0 %4807, %v3550_v58   ;;  %s4415_s29 = sshll.u32 %s6408_s25, 1  ;;  %s4273_s21 = scalar_lea.sflag [#allocation4], %s6408_s25 }
 0x54a   : > { %s371_s11 = scalar_lea.vmem [#allocation5], %s4415_s29  ;;  %s6419_s18 = scalar_lea.vmem [#allocation6], %s4415_s29 }
 0x54b   : > { %s4292_s27 = sshll.u32 %s371_s11, 4  ;;  %s4306_s30 = sshll.u32 %s6419_s18, 4  ;;  %s6427_s27 = int_to_ptr.vmem [resolvable:$true] %s4292_s27  ;;  %s6441_s30 = int_to_ptr.vmem [resolvable:$true] %s4306_s30 }
 0x54c   : > { %3563 = vperm.xlu1 %4808, %v3549_v1   ;;  %s6439_s29 = scalar_lea.hbm %s6519_s10, %s4525_s12  ;;  %s5091_s28 = scalar_lea.vmem %s6427_s27, 32 }
 0x54d   : > { %p5092_p6 = scmp.ne.s32.totalorder %s6427_s27, %s5091_s28 }
 0x54f   : > { %p5093_p10 = pnand %p5092_p6, %p6567_p9 }
 0x551   : > { %p5094_p12 = pneg %p5093_p10 }
 0x583   : > { %v4966_v27 = vpop.permute.xlu0 %4965 }
 0x584   : > { %v4968_v28 = vunpack.i.h.bf16 %v4966_v27  ;;  %v4967_v29 = vunpack.i.l.bf16 %v4966_v27 }
 0x585   : > { %v4961_v33 = vpop.permute.xlu1 %4960 }
 0x586   : > { %v4963_v34 = vunpack.i.h.bf16 %v4961_v33  ;;  %v4962_v35 = vunpack.i.l.bf16 %v4961_v33 }
 0x587   : > { %v4976_v36 = vpop.permute.xlu0 %4975 }
 0x588   : > { %v4978_v48 = vunpack.i.h.bf16 %v4976_v36  ;;  %v4977_v49 = vunpack.i.l.bf16 %v4976_v36  ;;  %v2493_v50 = vsel %vm511_vm9, %v4968_v28, %v4963_v34  ;;  %v2492_v52 = vsel %vm511_vm9, %v4967_v29, %v4962_v35 }
 0x589   : > { %v2490_v55 = vsel %vm511_vm9, %v4962_v35, %v4967_v29  ;;  %v2491_v2 = vsel %vm511_vm9, %v4963_v34, %v4968_v28  ;;  %v4569_v3 = vpack.c.bf16 %v2493_v50, %v2492_v52  ;;  %v4971_v4 = vpop.permute.xlu1 %4970 }
 0x58a   : > { %v4567_v6 = vpack.c.bf16 %v2491_v2, %v2490_v55  ;;  %v4973_v7 = vunpack.i.h.bf16 %v4971_v4  ;;  %v4972_v47 = vunpack.i.l.bf16 %v4971_v4 }
 0x58b   : > { %v3191_v11 = vpop.permute.xlu0 %3190 }
 0x58c   : > { %4568 = vmatprep.subr.bf16.mxu1 %v4567_v6  ;;  %v3185_v17 = vsel %vm1092_vm12, %v4973_v7, %v4978_v48  ;;  %v3184_v46 = vsel %vm1092_vm12, %v4972_v47, %v4977_v49  ;;  %v3186_v45 = vsel %vm1092_vm12, %v4977_v49, %v4972_v47  ;;  %v3187_v53 = vsel %vm1092_vm12, %v4978_v48, %v4973_v7  ;;  %v2419_v7 = vld [vmem:[%s6516_s7 + $0x8] sm:$0xff]  ;;  %v2421_v47 = vld [vmem:[%s6516_s7 + $0x18] sm:$0xff] }
 0x58d   : > { %4570 = vmatpush1.bf16.msra.mxu1 %v4569_v3  ;;  %v4589_v9 = vpack.c.bf16 %v3185_v17, %v3184_v46  ;;  %v3189_v10 = vpop.permute.xlu1 %3188  ;;  %v4587_v21 = vpack.c.bf16 %v3187_v53, %v3186_v45  ;;  %v2425_v17 = vld [vmem:[%s6516_s7 + $0x38] sm:$0x1] }
 0x58f   : > { %v4981_v51 = vpop.permute.xlu0 %4980  ;;  %4588 = vmatprep.subr.bf16.mxu0 %v4587_v21 }
 0x590   : > { %4480 = vmatmul.mubr.msk.f32.vlgmr.msra.gmra.mrb[6].mxu1 %vm1534_vm13, %v5916_v56  ;;  %4590 = vmatpush1.bf16.msra.mxu0 %v4589_v9  ;;  %v4983_v39 = vunpack.i.h.bf16 %v4981_v51  ;;  %v4982_v40 = vunpack.i.l.bf16 %v4981_v51 }
 0x591   : > { %2693 = vmatprep.mubr.f32.mxu1 %v5201_v23  ;;  %v3193_v18 = vpop.permute.xlu1 %3192 }
 0x593   : > { %v3195_v16 = vpop.permute.xlu0 %3194  ;;  %4500 = vmatmul.mubr.msk.f32.vlgmr.msra.gmra.mrb[4].mxu0 %vm1534_vm13, %v3189_v10 }
 0x594   : > { %4481 = vmatmul.mubr.msk.f32.gmra.mrb[8].mxu1 %vm1534_vm13, %v5921_v59  ;;  %3274 = vmatprep.mubr.f32.mxu0 %v5201_v23 }
 0x595   : > { %2699 = vmatprep.mubr.f32.mxu1 %v5201_v23  ;;  %v4986_v19 = vpop.permute.xlu1 %4985 }
 0x596   : > { %v4988_v43 = vunpack.i.h.bf16 %v4986_v19  ;;  %v4987_v32 = vunpack.i.l.bf16 %v4986_v19 }
 0x597   : > { %v4991_v56 = vpop.permute.xlu0 %4990  ;;  %4501 = vmatmul.mubr.msk.f32.gmra.mrb[6].mxu0 %vm1534_vm13, %v3191_v11  ;;  %v2423_v11 = vld [vmem:[%s6516_s7 + $0x28] sm:$0xff] }
 0x598   : > { %v4993_v37 = vunpack.i.h.bf16 %v4991_v56  ;;  %v4992_v54 = vunpack.i.l.bf16 %v4991_v56  ;;  %4482 = vmatmul.mubr.msk.f32.gmra.mrb[10].mxu1 %vm1534_vm13, %v5930_v60  ;;  %v3310_v59 = vsel %vm1092_vm12, %v4983_v39, %v4988_v43  ;;  %v3309_v38 = vsel %vm1092_vm12, %v4982_v40, %v4987_v32  ;;  %3280 = vmatprep.mubr.f32.mxu0 %v5201_v23 }
 0x599   : > { %v3311_v44 = vsel %vm1092_vm12, %v4987_v32, %v4982_v40  ;;  %v3312_v63 = vsel %vm1092_vm12, %v4988_v43, %v4983_v39  ;;  %v4593_v14 = vpack.c.bf16 %v3310_v59, %v3309_v38  ;;  %v4996_v41 = vpop.permute.xlu1 %4995  ;;  %2705 = vmatprep.mubr.f32.mxu1 %v5201_v23 }
 0x59a   : > { %v4591_v22 = vpack.c.bf16 %v3312_v63, %v3311_v44  ;;  %v4998_v60 = vunpack.i.h.bf16 %v4996_v41  ;;  %v4997_v24 = vunpack.i.l.bf16 %v4996_v41 }
 0x59b   : > { %v3314_v26 = vpop.permute.xlu0 %3313  ;;  %4502 = vmatmul.mubr.msk.f32.gmra.mrb[8].mxu0 %vm1534_vm13, %v3193_v18 }
 0x59c   : > { %4592 = vmatprep.subr.bf16.mxu0 %v4591_v22  ;;  %v2723_v57 = vsel %vm511_vm9, %v4998_v60, %v4993_v37  ;;  %v2722_v58 = vsel %vm511_vm9, %v4997_v24, %v4992_v54  ;;  %3286 = vmatprep.mubr.f32.mxu0 %v5201_v23  ;;  %v2720_v1 = vsel %vm511_vm9, %v4992_v54, %v4997_v24 }
 0x59d   : > { %4594 = vmatpush1.bf16.msra.mxu0 %v4593_v14  ;;  %v4573_v27 = vpack.c.bf16 %v2723_v57, %v2722_v58  ;;  %4483 = vmatmul.mubr.msk.f32.gmra.mrb[12].mxu1 %vm1534_vm13, %v5939_v61  ;;  %v2721_v29 = vsel %vm511_vm9, %v4993_v37, %v4998_v60 }
 0x59e   : > { %v2725_v28 = vpop.permute.xlu1 %2724  ;;  %v4571_v33 = vpack.c.bf16 %v2721_v29, %v2720_v1  ;;  %2804 = vmatprep.mubr.f32.mxu1 %v5201_v23 }
 0x59f   : > { %v3316_v34 = vpop.permute.xlu0 %3315  ;;  %4503 = vmatmul.mubr.msk.f32.gmra.mrb[10].mxu0 %vm1534_vm13, %v3195_v16 }
 0x5a0   : > { %4572 = vmatprep.subr.bf16.mxu1 %v4571_v33  ;;  %3393 = vmatprep.mubr.f32.mxu0 %v5201_v23 }
 0x5a1   : > { %4574 = vmatpush1.bf16.msra.mxu1 %v4573_v27 }
 0x5a2   : > { %v2727_v35 = vpop.permute.xlu1 %2726  ;;  %4576 = vmatprep.subr.bf16.mxu1 %v4575_v30 }
 0x5a3   : > { %v3318_v36 = vpop.permute.xlu0 %3317  ;;  %4504 = vmatmul.mubr.msk.f32.vlgmr.msra.gmra.mrb[4].mxu0 %vm1534_vm13, %v3314_v26 }
 0x5a4   : > { %4484 = vmatmul.mubr.msk.f32.vlgmr.msra.gmra.mrb[6].mxu1 %vm1534_vm13, %v2725_v28  ;;  %3399 = vmatprep.mubr.f32.mxu0 %v5201_v23 }
 0x5a5   : > { %4578 = vmatpush1.bf16.msra.mxu1 %v4577_v31  ;;  %2810 = vmatprep.mubr.f32.mxu1 %v5201_v23 }
 0x5a6   : > { %v2729_v61 = vpop.permute.xlu1 %2728 }
 0x5a7   : > { %v5006_v48 = vpop.permute.xlu0 %5005  ;;  %4505 = vmatmul.mubr.msk.f32.gmra.mrb[6].mxu0 %vm1534_vm13, %v3316_v34 }
 0x5a8   : > { %4485 = vmatmul.mubr.msk.f32.gmra.mrb[8].mxu1 %vm1534_vm13, %v2727_v35  ;;  %v5008_v15 = vunpack.i.h.bf16 %v5006_v48  ;;  %v5007_v62 = vunpack.i.l.bf16 %v5006_v48  ;;  %3405 = vmatprep.mubr.f32.mxu0 %v5201_v23 }
 0x5a9   : > { %2816 = vmatprep.mubr.f32.mxu1 %v5201_v23 }
 0x5aa   : > { %v5001_v30 = vpop.permute.xlu1 %5000 }
 0x5ab   : > { %v5003_v49 = vunpack.i.h.bf16 %v5001_v30  ;;  %v5002_v50 = vunpack.i.l.bf16 %v5001_v30  ;;  %4506 = vmatmul.mubr.msk.f32.gmra.mrb[8].mxu0 %vm1534_vm13, %v3318_v36  ;;  %v3320_v31 = vpop.permute.xlu0 %3319 }
 0x5ac   : > { %4486 = vmatmul.mubr.msk.f32.gmra.mrb[10].mxu1 %vm1534_vm13, %v2729_v61  ;;  %3411 = vmatprep.mubr.f32.mxu0 %v5201_v23 }
 0x5ad   : > { %v3435_v42 = vsel %vm1092_vm12, %v5003_v49, %v5008_v15  ;;  %v3434_v20 = vsel %vm1092_vm12, %v5002_v50, %v5007_v62  ;;  %v3436_v52 = vsel %vm1092_vm12, %v5007_v62, %v5002_v50  ;;  %2822 = vmatprep.mubr.f32.mxu1 %v5201_v23  ;;  %v3437_v3 = vsel %vm1092_vm12, %v5008_v15, %v5003_v49 }
 0x5ae   : > { %v4597_v55 = vpack.c.bf16 %v3435_v42, %v3434_v20  ;;  %v2731_v2 = vpop.permute.xlu1 %2730  ;;  %v4595_v4 = vpack.c.bf16 %v3437_v3, %v3436_v52 }
 0x5af   : > { %4507 = vmatmul.mubr.msk.f32.gmra.mrb[10].mxu0 %vm1534_vm13, %v3320_v31  ;;  %v2840_v25 = vpop.permute.xlu0 %2839 }
 0x5b0   : > { %4487 = vmatmul.mubr.msk.f32.gmra.mrb[12].mxu1 %vm1534_vm13, %v2731_v2  ;;  %4596 = vmatprep.subr.bf16.mxu0 %v4595_v4 }
 0x5b1   : > { %4598 = vmatpush1.bf16.msra.mxu0 %v4597_v55  ;;  %2917 = vmatprep.mubr.f32.mxu1 %v5201_v23 }
 0x5b2   : > { %v2838_v6 = vpop.permute.xlu1 %2837  ;;  %3514 = vmatprep.mubr.f32.mxu0 %v5201_v23 }
 0x5b4   : > { %4488 = vmatmul.mubr.msk.f32.vlgmr.msra.gmra.mrb[6].mxu1 %vm1534_vm13, %v2838_v6  ;;  %4508 = vmatmul.mubr.msk.f32.vlgmr.msra.gmra.mrb[4].mxu0 %vm1534_vm13, %v2419_v7 }
 0x5b5   : > { %2923 = vmatprep.mubr.f32.mxu1 %v5201_v23  ;;  %3520 = vmatprep.mubr.f32.mxu0 %v5201_v23 }
 0x5b8   : > { %4489 = vmatmul.mubr.msk.f32.gmra.mrb[8].mxu1 %vm1534_vm13, %v2840_v25  ;;  %4509 = vmatmul.mubr.msk.f32.gmra.mrb[6].mxu0 %vm1534_vm13, %v2421_v47 }
 0x5b9   : > { %3526 = vmatprep.mubr.f32.mxu0 %v5201_v23  ;;  %2929 = vmatprep.mubr.f32.mxu1 %v5201_v23 }
 0x5bc   : > { %4510 = vmatmul.mubr.msk.f32.gmra.mrb[8].mxu0 %vm1534_vm13, %v2423_v11 }
 0x5bd   : > { %3532 = vmatprep.mubr.f32.mxu0 %v5201_v23 }
 0x5c0   : > { %4511 = vmatmul.mubr.msk.f32.gmra.mrb[10].mxu0 %vm1534_vm13, %v2425_v17  ;;  %v3559_v45 = vpop.permute.xlu0 %3558 }
 0x5c3   : > { %v3554_v46 = vpop.permute.xlu1 %3553 }
 0x5c4   : > { %v2844_v9 = vpop.permute.xlu0 %2843 }
 0x5c7   : > { %v2842_v53 = vpop.permute.xlu1 %2841 }
 0x5c8   : > { %4490 = vmatmul.mubr.msk.f32.gmra.mrb[10].mxu1 %vm1534_vm13, %v2842_v53 }
 0x5c9   : > { %2935 = vmatprep.mubr.f32.mxu1 %v5201_v23 }
 0x5cc   : > { %4491 = vmatmul.mubr.msk.f32.gmra.mrb[12].mxu1 %vm1534_vm13, %v2844_v9 }
 0x5cd   : > { %3746 = vmatprep.mubr.f32.mxu1 %v5201_v23 }
 0x687   : > { %v2919_v10 = vpop.f32.mrb[6].mxu1  ;;  %v3516_v21 = vpop.f32.mrb[4].mxu0 }
 0x688   : > { %v4603_v51 = vadd.f32 %v3516_v21, %v2919_v10  ;;  %v2921_v18 = vpop.f32.mrb[7].mxu1  ;;  %v3518_v16 = vpop.f32.mrb[5].mxu0 }
 0x689   : > { %v4604_v19 = vadd.f32 %v3518_v16, %v2921_v18 }
 0x68a   : > { %v3571_v39 = vadd.f32 %v4603_v51, %v3554_v46 }
 0x68b   : > { %v3572_v40 = vadd.f32 %v4604_v19, %v3554_v46  ;;  %v2925_v43 = vpop.f32.mrb[8].mxu1  ;;  %v3522_v32 = vpop.f32.mrb[6].mxu0 }
 0x68c   : > { %v3579_v56 = vrot.slane %v3571_v39, 4  ;;  %v4605_v37 = vadd.f32 %v3522_v32, %v2925_v43  ;;  %v2927_v54 = vpop.f32.mrb[9].mxu1  ;;  %v3524_v59 = vpop.f32.mrb[7].mxu0 }
 0x68d   : > { %v3585_v38 = vrot.slane %v3572_v40, 4  ;;  %v4606_v44 = vadd.f32 %v3524_v59, %v2927_v54 }
 0x68e   : > { %v3580_v63 = vmax.f32 %v3571_v39, %v3579_v56  ;;  %v3573_v14 = vadd.f32 %v4605_v37, %v3559_v45 }
 0x68f   : > { %v3586_v41 = vmax.f32 %v3572_v40, %v3585_v38  ;;  %v3574_v22 = vadd.f32 %v4606_v44, %v3559_v45  ;;  %v3528_v60 = vpop.f32.mrb[8].mxu0 }
 0x690   : > { %v3581_v24 = vrot.slane %v3580_v63, 2  ;;  %v3619_v26 = vrot.slane %v3573_v14, 4  ;;  %v3530_v57 = vpop.f32.mrb[9].mxu0 }
 0x691   : > { %v3587_v58 = vrot.slane %v3586_v41, 2  ;;  %v3625_v1 = vrot.slane %v3574_v22, 4 }
 0x692   : > { %v3582_v27 = vmax.f32 %v3580_v63, %v3581_v24  ;;  %v3620_v28 = vmax.f32 %v3573_v14, %v3619_v26 }
 0x693   : > { %v3588_v29 = vmax.f32 %v3586_v41, %v3587_v58  ;;  %v3626_v33 = vmax.f32 %v3574_v22, %v3625_v1  ;;  %v3534_v34 = vpop.f32.mrb[10].mxu0 }
 0x694   : > { %v3583_v35 = vrot.slane %v3582_v27, 1  ;;  %v3621_v36 = vrot.slane %v3620_v28, 2  ;;  %v3536_v61 = vpop.f32.mrb[11].mxu0 }
 0x695   : > { %v3589_v48 = vrot.slane %v3588_v29, 1  ;;  %v3627_v15 = vrot.slane %v3626_v33, 2 }
 0x696   : > { %v3584_v62 = vmax.f32 %v3582_v27, %v3583_v35  ;;  %v3622_v30 = vmax.f32 %v3620_v28, %v3621_v36 }
 0x697   : > { %v3590_v49 = vmax.f32 %v3588_v29, %v3589_v48  ;;  %v3628_v50 = vmax.f32 %v3626_v33, %v3627_v15 }
 0x698   : > { %v3591_v42 = vsub.f32 %v3571_v39, %v3584_v62  ;;  %v3623_v20 = vrot.slane %v3622_v30, 1 }
 0x699   : > { %v3592_v31 = vsub.f32 %v3572_v40, %v3590_v49  ;;  %v3629_v52 = vrot.slane %v3628_v50, 1 }
 0x69a   : > { %v3593_v55 = vmul.f32 1.442695, %v3591_v42  ;;  %v3624_v2 = vmax.f32 %v3622_v30, %v3623_v20 }
 0x69b   : > { %v2931_v3 = vpop.f32.mrb[10].mxu1  ;;  %v3595_v4 = vmul.f32 1.442695, %v3592_v31  ;;  %v3630_v6 = vmax.f32 %v3628_v50, %v3629_v52 }
 0x69c   : > { %v6222_v7 = vadd.f32 %v3528_v60, %v2931_v3  ;;  %v2933_v25 = vpop.f32.mrb[11].mxu1  ;;  %5025 = vpow2.f32 %v3593_v55  ;;  %v3631_v47 = vsub.f32 %v3573_v14, %v3624_v2  ;;  %v3677_v3 = vld [vmem:[%s6564_s2] sm:$0xff] }
 0x69d   : > { %v6224_v11 = vadd.f32 %v3530_v57, %v2933_v25  ;;  %5027 = vpow2.f32 %v3595_v4  ;;  %v3632_v17 = vsub.f32 %v3574_v22, %v3630_v6 }
 0x69e   : > { %v3633_v46 = vmul.f32 1.442695, %v3631_v47 }
 0x69f   : > { %v2937_v45 = vpop.f32.mrb[12].mxu1  ;;  %v3635_v53 = vmul.f32 1.442695, %v3632_v17  ;;  %v3564_v17 = vpop.permute.xlu1 %3563 }
 0x6a0   : > { %v6226_v9 = vadd.f32 %v3534_v34, %v2937_v45  ;;  %v2939_v10 = vpop.f32.mrb[13].mxu1  ;;  %5029 = vpow2.f32 %v3633_v46  ;;  %v3575_v46 = vadd.f32 %v6222_v7, %v3564_v17  ;;  %v3576_v45 = vadd.f32 %v6224_v11, %v3564_v17 }
 0x6a1   : > { %v6228_v21 = vadd.f32 %v3536_v61, %v2939_v10  ;;  %5031 = vpow2.f32 %v3635_v53 }
 0x6a2   : > { %v3661_v53 = vand.u32 2147483647, %v3575_v46  ;;  %v3662_v10 = vand.u32 2147483647, %v3576_v45 }
 0x6a6   : > { %v5026_v51 = vpop.eup %5025 }
 0x6a7   : > { %v5028_v18 = vpop.eup %5027  ;;  %v3597_v16 = vrot.slane %v5026_v51, 4 }
 0x6a8   : > { %v3603_v19 = vrot.slane %v5028_v18, 4 }
 0x6a9   : > { %v3598_v39 = vadd.f32 %v5026_v51, %v3597_v16 }
 0x6aa   : > { %v5030_v40 = vpop.eup %5029  ;;  %v3604_v43 = vadd.f32 %v5028_v18, %v3603_v19 }
 0x6ab   : > { %v5032_v32 = vpop.eup %5031  ;;  %v3599_v56 = vrot.slane %v3598_v39, 2  ;;  %v3637_v37 = vrot.slane %v5030_v40, 4 }
 0x6ac   : > { %v3605_v54 = vrot.slane %v3604_v43, 2  ;;  %v3643_v59 = vrot.slane %v5032_v32, 4 }
 0x6ad   : > { %v3600_v38 = vadd.f32 %v3599_v56, %v3598_v39  ;;  %v3638_v44 = vadd.f32 %v5030_v40, %v3637_v37  ;;  %v5061_v56 = vld [vmem:[%s5361_s20] sm:$0x77] }
 0x6ae   : > { %v3606_v63 = vadd.f32 %v3605_v54, %v3604_v43  ;;  %v3644_v14 = vadd.f32 %v5032_v32, %v3643_v59  ;;  %v3846_v37 = vmul.f32 0.15915494, %v5061_v56 }
 0x6af   : > { %v3601_v41 = vrot.slane %v3600_v38, 1  ;;  %v3639_v22 = vrot.slane %v3638_v44, 2 }
 0x6b0   : > { %v3607_v60 = vrot.slane %v3606_v63, 1  ;;  %v3645_v24 = vrot.slane %v3644_v14, 2  ;;  %v3847_v7 = vfloor.f32 %v3846_v37 }
 0x6b1   : > { %v3602_v26 = vadd.f32 %v3601_v41, %v3600_v38  ;;  %v3640_v57 = vadd.f32 %v3639_v22, %v3638_v44 }
 0x6b2   : > { %v3608_v58 = vadd.f32 %v3607_v60, %v3606_v63  ;;  %v3646_v1 = vadd.f32 %v3645_v24, %v3644_v14  ;;  %v3848_v11 = vmul.f32 6.2831855, %v3847_v7  ;;  %v3659_v63 = vmax.f32 %v3575_v46, 0.0 }
 0x6b3   : > { %v3641_v27 = vrot.slane %v3640_v57, 1  ;;  %v3660_v14 = vmax.f32 %v3576_v45, 0.0 }
 0x6b4   : > { %5033 = vrcp.f32 %v3608_v58  ;;  %v3647_v28 = vrot.slane %v3646_v1, 1  ;;  %v3849_v41 = vsub.f32 %v5061_v56, %v3848_v11 }
 0x6b5   : > { %5035 = vrcp.f32 %v3602_v26  ;;  %v3642_v29 = vadd.f32 %v3641_v27, %v3640_v57 }
 0x6b6   : > { %v3648_v33 = vadd.f32 %v3647_v28, %v3646_v1 }
 0x6b7   : > { %5037 = vrcp.f32 %v3642_v29 }
 0x6b8   : > { %5039 = vrcp.f32 %v3648_v33 }
 0x6be   : > { %v5034_v34 = vpop.eup %5033 }
 0x6bf   : > { %v5036_v35 = vpop.eup %5035  ;;  %v3612_v36 = vmul.f32 %v5034_v34, %v3608_v58  ;;  %v6257_v58 = vld [vmem:[%s6548_s1] ss:$8 sm:$0x3]  ;;  %s5095_s1 = sshll.u32 %s5215_s0, 4  ;;  %s5096_s1 = int_to_ptr.vmem [resolvable:$false] %s5095_s1 }
 0x6c0   : > { %v3611_v61 = vmul.f32 %v5036_v35, %v3602_v26  ;;  %v3857_v26 = vrot.slane %v3849_v41, %v5363_v5  ;;  %vm3845_vm15 = vcmp.gt.f32.partialorder %v6257_v58, 0.0  ;;  %s5097_s2 = scalar_lea.vmem %s5096_s1, 64  ;;  %p5098_p2 = scmp.lt.s32.totalorder %s6427_s27, %s5096_s1 }
 0x6c1   : > { %v5038_v48 = vpop.eup %5037  ;;  %v3614_v15 = vsub.f32 2.0, %v3612_v36  ;;  %p5099_p3 = scmp.lt.s32.totalorder %s5097_s2, %s5091_s28 }
 0x6c2   : > { %v5040_v62 = vpop.eup %5039  ;;  %v3613_v30 = vsub.f32 2.0, %v3611_v61  ;;  %v3651_v49 = vmul.f32 %v5038_v48, %v3642_v29  ;;  %v3864_v29 = vrot.slane %v3857_v26, %v5363_v5 }
 0x6c3   : > { %v3616_v50 = vmul.f32 %v5034_v34, %v3614_v15  ;;  %v3652_v42 = vmul.f32 %v5040_v62, %v3648_v33  ;;  %p5100_p4 = por %p5099_p3, %p5098_p2 }
 0x6c4   : > { %v3615_v20 = vmul.f32 %v5036_v35, %v3613_v30  ;;  %v3653_v31 = vsub.f32 2.0, %v3651_v49  ;;  %v6272_v61 = vsel %vm3845_vm15, %v3864_v29, 0.0 }
 0x6c5   : > { %v6230_v52 = vmul.f32 %v5028_v18, %v3616_v50  ;;  %v3654_v55 = vsub.f32 2.0, %v3652_v42  ;;  %v3664_v18 = vsub.f32 0.0, %v3662_v10  ;;  %p5101_p7 = pnand %p5100_p4, %p5094_p12 }
 0x6c6   : > { %v6232_v2 = vmul.f32 %v5026_v51, %v3615_v20  ;;  %v3655_v4 = vmul.f32 %v5038_v48, %v3653_v31  ;;  %v3663_v51 = vsub.f32 0.0, %v3661_v53  ;;  %v3875_v20 = vrot.slane %v6272_v61, %v5377_v13 }
 0x6c7   : > { %3682 = vmatprep.subr.mxu1 %v6230_v52  ;;  %v3656_v6 = vmul.f32 %v5040_v62, %v3654_v55  ;;  %v3667_v19 = vmul.f32 1.442695, %v3664_v18  ;;  %v3871_v62 = vrot.slane %v6272_v61, %v5375_v12  ;;  %v3829_v50 = vmul.f32 6.2831855, %v6230_v52 }
 0x6c8   : > { %3683 = vmatpush1.msra.mxu1 %v6232_v2  ;;  %v3657_v47 = vmul.f32 %v5030_v40, %v3655_v4  ;;  %v3665_v16 = vmul.f32 1.442695, %v3663_v51  ;;  %v3828_v55 = vmul.f32 6.2831855, %v6232_v2 }
 0x6c9   : > { %4512 = vmatmul.mubr.msk.f32.vlgmr.msra.gmra.mrb[14].mxu1 %vm3678_vm14, %v3677_v3  ;;  %v3658_v25 = vmul.f32 %v5032_v32, %v3656_v6 }
 0x6ca   : > { %3819 = vmatprep.mubr.f32.mxu1 %v5201_v23  ;;  %5041 = vpow2.f32 %v3665_v16  ;;  %v3832_v17 = vmul.f32 6.2831855, %v3657_v47 }
 0x6cb   : > { %3755 = vmatprep.subr.mxu1 %v3658_v25  ;;  %5043 = vpow2.f32 %v3667_v19  ;;  %v6287_v6 = vmul.f32 6.2831855, %v3658_v25 }
 0x6cc   : > { %3756 = vmatpush1.msra.mxu1 %v3657_v47 }
 0x6cd   : > { %4513 = vmatmul.mubr.msk.f32.vlgmr.msra.gmra.mrb[16].mxu1 %vm3678_vm14, %v3677_v3 }
 0x6d4   : > { %v5042_v39 = vpop.eup %5041 }
 0x6d5   : > { %v5044_v40 = vpop.eup %5043  ;;  %v3669_v43 = vadd.f32 1.0, %v5042_v39 }
 0x6d6   : > { %v3670_v32 = vadd.f32 1.0, %v5044_v40 }
 0x6d7   : > { %5045 = vlog2.f32 %v3669_v43 }
 0x6d8   : > { %5047 = vlog2.f32 %v3670_v32 }
 0x6e1   : > { %v5046_v54 = vpop.eup %5045 }
 0x6e2   : > { %v5048_v59 = vpop.eup %5047  ;;  %v3672_v38 = vmul.f32 0.6931472, %v5046_v54 }
 0x6e3   : > { %v3674_v44 = vmul.f32 0.6931472, %v5048_v59 }
 0x6e4   : > { %v6243_v22 = vadd.f32 %v3672_v38, %v3659_v63 }
 0x6e5   : > { %v6245_v60 = vadd.f32 %v3674_v44, %v3660_v14 }
 0x6e6   : > { %v6248_v24 = vrot.slane %v6243_v22, 1  ;;  %v4012_v1 = vrot.slane %v6243_v22, 7 }
 0x6e7   : > { %v6252_v57 = vrot.slane %v6245_v60, 1  ;;  %v4013_v28 = vrot.slane %v6245_v60, 7 }
 0x6e8   : > { %v4044_v27 = vrot.slane %v6248_v24, 7  ;;  %v4016_v34 = vsub.f32 %v6243_v22, %v4012_v1 }
 0x6e9   : > { %v4045_v33 = vrot.slane %v6252_v57, 7  ;;  %v6268_v36 = vsub.f32 %v6245_v60, %v4013_v28 }
 0x6ea   : > { %v4048_v35 = vsub.f32 %v6248_v24, %v4044_v27  ;;  %v4020_v15 = vrot.slane %v4016_v34, 1 }
 0x6eb   : > { %v6275_v48 = vsub.f32 %v6252_v57, %v4045_v33  ;;  %v4021_v49 = vrot.slane %v6268_v36, 1 }
 0x6ec   : > { %v4052_v30 = vrot.slane %v4048_v35, 1 }
 0x6ed   : > { %v4053_v31 = vrot.slane %v6275_v48, 1 }
 0x79c   : > { %v3748_v42 = vpop.f32.mrb[14].mxu1 }
 0x79d   : > { %v6285_v3 = vmul.f32 6.2831855, %v3748_v42  ;;  %v3750_v4 = vpop.f32.mrb[15].mxu1 }
 0x79e   : > { %v6289_v46 = vmul.f32 6.2831855, %v3750_v4 }
 0x79f   : > { %v6292_v45 = vsub.f32 %v6285_v3, %v3828_v55  ;;  %v3918_v52 = vrot.slane %v6285_v3, 7  ;;  %vm3878_vm1 = vcmp.ge.f32.partialorder %v3871_v62, %v6285_v3 }
 0x7a0   : > { %v6297_v53 = vsub.f32 %v6289_v46, %v3829_v50  ;;  %v3919_v2 = vrot.slane %v6289_v46, 7  ;;  %v3821_v10 = vpop.f32.mrb[16].mxu1  ;;  %vm3879_vm2 = vcmp.ge.f32.partialorder %v3875_v20, %v6289_v46  ;;  %v4514_v25 = vsel %vm3878_vm1, 1.0, %v5201_v23 }
 0x7a1   : > { %v3886_v47 = vrot.slane %v6292_v45, 7  ;;  %v3922_v51 = vsub.f32 %v6285_v3, %v3918_v52  ;;  %v6304_v18 = vmul.f32 6.2831855, %v3821_v10  ;;  %v6307_v16 = vsel %vm3879_vm2, 1.0, %v5201_v23  ;;  %v6309_v19 = vpop.f32.mrb[17].mxu1 }
 0x7a2   : > { %v3887_v39 = vrot.slane %v6297_v53, 7  ;;  %v3923_v40 = vsub.f32 %v6289_v46, %v3919_v2  ;;  %v4024_v43 = vmul.f32 %v4514_v25, %v4020_v15  ;;  %v4056_v32 = vmul.f32 %v4514_v25, %v4052_v30 }
 0x7a3   : > { %v3890_v56 = vsub.f32 %v6292_v45, %v3886_v47  ;;  %v3926_v37 = vrot.slane %v3922_v51, 1  ;;  %v6315_v7 = vsub.f32 %v6304_v18, %v3832_v17  ;;  %v3982_v54 = vrot.slane %v6304_v18, 7 }
 0x7a4   : > { %v3891_v59 = vsub.f32 %v6297_v53, %v3887_v39  ;;  %v3927_v23 = vrot.slane %v3923_v40, 1  ;;  %v4026_v11 = vsel %vm3842_vm0, %v4024_v43, 0.0  ;;  %v4058_v38 = vsel %vm3842_vm0, %v4056_v32, 0.0 }
 0x7a5   : > { %v3894_v44 = vrot.slane %v3890_v56, 1  ;;  %v3930_v63 = vmul.f32 %v4514_v25, %v3926_v37  ;;  %v3950_v14 = vrot.slane %v6315_v7, 7  ;;  %v3986_v41 = vsub.f32 %v6304_v18, %v3982_v54 }
 0x7a6   : > { %v3895_v26 = vrot.slane %v3891_v59, 1  ;;  %v3931_v1 = vmul.f32 %v6307_v16, %v3927_v23  ;;  %v4027_v27 = vrot.slane %v4026_v11, 4  ;;  %v4059_v28 = vrot.slane %v4058_v38, 4 }
 0x7a7   : > { %v3898_v29 = vmul.f32 %v4514_v25, %v3894_v44  ;;  %v3932_v33 = vsel %vm3842_vm0, %v3930_v63, 0.0  ;;  %v3954_v34 = vsub.f32 %v6315_v7, %v3950_v14  ;;  %v3990_v35 = vrot.slane %v3986_v41, 1 }
 0x7a8   : > { %v3899_v15 = vmul.f32 %v6307_v16, %v3895_v26  ;;  %v3933_v62 = vrot.slane %v3932_v33, 4  ;;  %v3939_v30 = vsel %vm3842_vm0, %v3931_v1, 0.0  ;;  %v4028_v50 = vadd.f32 %v4027_v27, %v4026_v11 }
 0x7a9   : > { %v3900_v42 = vsel %vm3842_vm0, %v3898_v29, 0.0  ;;  %v3940_v20 = vrot.slane %v3939_v30, 4  ;;  %v3958_v55 = vrot.slane %v3954_v34, 1  ;;  %v3994_v4 = vmul.f32 %v4514_v25, %v3990_v35 }
 0x7aa   : > { %v3901_v17 = vrot.slane %v3900_v42, 4  ;;  %v3907_v52 = vsel %vm3842_vm0, %v3899_v15, 0.0  ;;  %v3934_v2 = vadd.f32 %v3933_v62, %v3932_v33  ;;  %v4029_v10 = vrot.slane %v4028_v50, 2 }
 0x7ab   : > { %v3908_v47 = vrot.slane %v3907_v52, 4  ;;  %v3941_v51 = vadd.f32 %v3940_v20, %v3939_v30  ;;  %v3962_v39 = vmul.f32 %v4514_v25, %v3958_v55  ;;  %v3996_v40 = vsel %vm3842_vm0, %v3994_v4, 0.0 }
 0x7ac   : > { %v3902_v43 = vadd.f32 %v3901_v17, %v3900_v42  ;;  %v3935_v32 = vrot.slane %v3934_v2, 2  ;;  %v3997_v56 = vrot.slane %v3996_v40, 4  ;;  %v4030_v37 = vadd.f32 %v4029_v10, %v4028_v50 }
 0x7ad   : > { %v3909_v54 = vadd.f32 %v3908_v47, %v3907_v52  ;;  %v3942_v59 = vrot.slane %v3941_v51, 2  ;;  %v3964_v23 = vsel %vm3842_vm0, %v3962_v39, 0.0  ;;  %v4060_v11 = vadd.f32 %v4059_v28, %v4058_v38 }
 0x7ae   : > { %v3903_v44 = vrot.slane %v3902_v43, 2  ;;  %v3936_v63 = vadd.f32 %v3935_v32, %v3934_v2  ;;  %v3965_v14 = vrot.slane %v3964_v23, 4  ;;  %v3998_v41 = vadd.f32 %v3997_v56, %v3996_v40 }
 0x7af   : > { %v3910_v26 = vrot.slane %v3909_v54, 2  ;;  %v3943_v1 = vadd.f32 %v3942_v59, %v3941_v51  ;;  %v4031_v27 = vrot.slane %v4030_v37, 1  ;;  %v4061_v29 = vrot.slane %v4060_v11, 2 }
 0x7b0   : > { %v3904_v25 = vadd.f32 %v3903_v44, %v3902_v43  ;;  %v3937_v33 = vrot.slane %v3936_v63, 1  ;;  %v3966_v34 = vadd.f32 %v3965_v14, %v3964_v23  ;;  %v3999_v35 = vrot.slane %v3998_v41, 2 }
 0x7b1   : > { %v3911_v15 = vadd.f32 %v3910_v26, %v3909_v54  ;;  %v3944_v62 = vrot.slane %v3943_v1, 1  ;;  %v4032_v30 = vadd.f32 %v4031_v27, %v4030_v37  ;;  %v4062_v50 = vadd.f32 %v4061_v29, %v4060_v11 }
 0x7b2   : > { %v3905_v42 = vrot.slane %v3904_v25, 1  ;;  %v3938_v20 = vadd.f32 %v3937_v33, %v3936_v63  ;;  %v3967_v55 = vrot.slane %v3966_v34, 2  ;;  %v4000_v38 = vadd.f32 %v3999_v35, %v3998_v41 }
 0x7b3   : > { %v3912_v28 = vrot.slane %v3911_v15, 1  ;;  %v3945_v4 = vadd.f32 %v3944_v62, %v3943_v1  ;;  %v6333_v17 = vadd.f32 %v4032_v30, %v6243_v22  ;;  %v4063_v52 = vrot.slane %v4062_v50, 1 }
 0x7b4   : > { %v3906_v2 = vadd.f32 %v3905_v42, %v3904_v25  ;;  %v3946_v10 = vadd.f32 %v3938_v20, %v6285_v3  ;;  %v3968_v47 = vadd.f32 %v3967_v55, %v3966_v34  ;;  %v4001_v51 = vrot.slane %v4000_v38, 1 }
 0x7b5   : > { %v3913_v39 = vadd.f32 %v3912_v28, %v3911_v15  ;;  %v3947_v40 = vadd.f32 %v3945_v4, %v6289_v46  ;;  %v4064_v43 = vadd.f32 %v4063_v52, %v4062_v50  ;;  %v6338_v32 = vmul.f32 6.2831855, %v6309_v19 }
 0x7b6   : > { %v3914_v56 = vadd.f32 %v3906_v2, %v6292_v45  ;;  %v3969_v37 = vrot.slane %v3968_v47, 1  ;;  %v4002_v54 = vadd.f32 %v4001_v51, %v4000_v38  ;;  %v4025_v22 = vmul.f32 %v6307_v16, %v4021_v49 }
 0x7b7   : > { %v3915_v59 = vadd.f32 %v3913_v39, %v6297_v53  ;;  %v6346_v3 = vadd.f32 %v4064_v43, %v6248_v24  ;;  %v6350_v46 = vsub.f32 %v6338_v32, %v6287_v6  ;;  %v3983_v19 = vrot.slane %v6338_v32, 7 }
 0x7b8   : > { %v3970_v23 = vadd.f32 %v3969_v37, %v3968_v47  ;;  %v4010_v45 = vadd.f32 %v4002_v54, %v6304_v18  ;;  %v4074_v11 = vsub.f32 %v3946_v10, %v3914_v56  ;;  %v4033_v44 = vsel %vm3842_vm0, %v4025_v22, 0.0 }
 0x7b9   : > { %v4075_v36 = vsub.f32 %v3947_v40, %v3915_v59  ;;  %v4092_v63 = vcombine.low %v3914_v56, %v3915_v59  ;;  %v6357_v49 = vadd.f32 %v6346_v3, %v6333_v17  ;;  %v3951_v24 = vrot.slane %v6350_v46, 7 }
 0x7ba   : > { %v6361_v53 = vadd.f32 %v3970_v23, %v6315_v7  ;;  %v4076_v6 = vmax.f32 %v4074_v11, 1e-12  ;;  %v3987_v14 = vsub.f32 %v6338_v32, %v3983_v19  ;;  %v4034_v41 = vrot.slane %v4033_v44, 4 }
 0x7bb   : > { %v4077_v26 = vmax.f32 %v4075_v36, 1e-12  ;;  %v4099_v18 = vrot.slane %v4092_v63, %v5363_v5  ;;  %v3955_v1 = vsub.f32 %v6350_v46, %v3951_v24  ;;  %v4057_v27 = vmul.f32 %v6307_v16, %v4053_v31 }
 0x7bc   : > { %v6370_v29 = vsub.f32 %v4010_v45, %v6361_v53  ;;  %5049 = vrcp.f32 %v4076_v6  ;;  %v3991_v25 = vrot.slane %v3987_v14, 1  ;;  %v4035_v7 = vadd.f32 %v4034_v41, %v4033_v44 }
 0x7bd   : > { %5051 = vrcp.f32 %v4077_v26  ;;  %v4106_v33 = vrot.slane %v4099_v18, %v5363_v5  ;;  %v3959_v34 = vrot.slane %v3955_v1, 1  ;;  %v4065_v35 = vsel %vm3842_vm0, %v4057_v27, 0.0 }
 0x7be   : > { %v3995_v15 = vmul.f32 %v6307_v16, %v3991_v25  ;;  %v4036_v62 = vrot.slane %v4035_v7, 2  ;;  %v4066_v30 = vrot.slane %v4065_v35, 4 }
 0x7bf   : > { %v4108_v48 = vsub.f32 %v6272_v61, %v4106_v33  ;;  %v3963_v31 = vmul.f32 %v6307_v16, %v3959_v34 }
 0x7c0   : > { %v4003_v50 = vsel %vm3842_vm0, %v3995_v15, 0.0  ;;  %v4037_v42 = vadd.f32 %v4036_v62, %v4035_v7  ;;  %v4067_v20 = vadd.f32 %v4066_v30, %v4065_v35 }
 0x7c1   : > { %v3971_v55 = vsel %vm3842_vm0, %v3963_v31, 0.0  ;;  %v4004_v38 = vrot.slane %v4003_v50, 4 }
 0x7c2   : > { %v3972_v28 = vrot.slane %v3971_v55, 4  ;;  %v4038_v4 = vrot.slane %v4037_v42, 1  ;;  %v4068_v52 = vrot.slane %v4067_v20, 2 }
 0x7c3   : > { %v4005_v2 = vadd.f32 %v4004_v38, %v4003_v50 }
 0x7c4   : > { %v3973_v10 = vadd.f32 %v3972_v28, %v3971_v55  ;;  %v4039_v47 = vadd.f32 %v4038_v4, %v4037_v42  ;;  %v4069_v51 = vadd.f32 %v4068_v52, %v4067_v20 }
 0x7c5   : > { %v4006_v39 = vrot.slane %v4005_v2, 2 }
 0x7c6   : > { %v5050_v40 = vpop.eup %5049  ;;  %v3974_v43 = vrot.slane %v3973_v10, 2  ;;  %v6380_v61 = vadd.f32 %v4039_v47, %v6245_v60  ;;  %v4070_v16 = vrot.slane %v4069_v51, 1 }
 0x7c7   : > { %v5052_v56 = vpop.eup %5051  ;;  %v4082_v37 = vmul.f32 %v5050_v40, %v4076_v6  ;;  %v4007_v54 = vadd.f32 %v4006_v39, %v4005_v2 }
 0x7c8   : > { %v4083_v22 = vmul.f32 %v5052_v56, %v4077_v26  ;;  %v3975_v59 = vadd.f32 %v3974_v43, %v3973_v10  ;;  %v4071_v19 = vadd.f32 %v4070_v16, %v4069_v51 }
 0x7c9   : > { %v4084_v23 = vsub.f32 2.0, %v4082_v37  ;;  %v4008_v45 = vrot.slane %v4007_v54, 1 }
 0x7ca   : > { %v4085_v11 = vsub.f32 2.0, %v4083_v22  ;;  %v3976_v44 = vrot.slane %v3975_v59, 1  ;;  %v4073_v36 = vadd.f32 %v4071_v19, %v6252_v57 }
 0x7cb   : > { %v4086_v63 = vmul.f32 %v5050_v40, %v4084_v23  ;;  %v4009_v24 = vadd.f32 %v4008_v45, %v4007_v54 }
 0x7cc   : > { %v4087_v14 = vmul.f32 %v5052_v56, %v4085_v11  ;;  %v3977_v41 = vadd.f32 %v3976_v44, %v3975_v59  ;;  %v4130_v60 = vadd.f32 %v4073_v36, %v6380_v61 }
 0x7cd   : > { %v4088_v18 = vmul.f32 %v4086_v63, %v6370_v29  ;;  %v4011_v6 = vadd.f32 %v4009_v24, %v6338_v32 }
 0x7ce   : > { %v4111_v1 = vcombine.low %v4086_v63, %v4087_v14  ;;  %v6387_v26 = vadd.f32 %v3977_v41, %v6350_v46 }
 0x7cf   : > { %v4131_v27 = vmul.f32 2.0, %v4088_v18  ;;  %v4189_v46 = vmul.f32 %v4088_v18, %v4088_v18 }
 0x7d0   : > { %v4118_v25 = vrot.slane %v4111_v1, %v5363_v5  ;;  %v4079_v7 = vsub.f32 %v4011_v6, %v6387_v26 }
 0x7d1   : > { %v4133_v57 = vsub.f32 %v6357_v49, %v4131_v27 }
 0x7d2   : > { %v4125_v33 = vrot.slane %v4118_v25, %v5363_v5  ;;  %v4089_v34 = vmul.f32 %v4087_v14, %v4079_v7 }
 0x7d4   : > { %v4127_v35 = vmul.f32 %v4125_v33, %v4108_v48  ;;  %v4132_v15 = vmul.f32 2.0, %v4089_v34  ;;  %v4190_v6 = vmul.f32 %v4089_v34, %v4089_v34 }
 0x7d6   : > { %v4128_v62 = vsub.f32 1.0, %v4127_v35  ;;  %v4139_v30 = vrot.slane %v4127_v35, %v5375_v12  ;;  %v4143_v32 = vrot.slane %v4127_v35, %v5377_v13  ;;  %v4134_v31 = vsub.f32 %v4130_v60, %v4132_v15 }
 0x7d8   : > { %v4146_v50 = vmul.f32 %v4139_v30, %v4133_v57  ;;  %v4152_v42 = vrot.slane %v4128_v62, %v5375_v12  ;;  %v4173_v20 = vmul.f32 %v4139_v30, %v4088_v18  ;;  %v4177_v55 = vmul.f32 %v4139_v30, %v6333_v17 }
 0x7d9   : > { %v4191_v49 = vmul.f32 %v4139_v30, %v6346_v3  ;;  %v4195_v38 = vmul.f32 %v4139_v30, %v4131_v27  ;;  %v4147_v28 = vmul.f32 %v4143_v32, %v4134_v31  ;;  %v4156_v48 = vrot.slane %v4128_v62, %v5377_v13 }
 0x7da   : > { %v4159_v4 = vmul.f32 %v4152_v42, %v4146_v50  ;;  %v4175_v52 = vmul.f32 %v4173_v20, %v4139_v30  ;;  %v4179_v2 = vmul.f32 %v4177_v55, %v4152_v42  ;;  %v4201_v10 = vmul.f32 %v4152_v42, %v6333_v17 }
 0x7db   : > { %v4193_v47 = vmul.f32 %v4191_v49, %v4139_v30  ;;  %v4197_v51 = vmul.f32 %v4195_v38, %v4152_v42  ;;  %v4160_v39 = vmul.f32 %v4156_v48, %v4147_v28  ;;  %v4174_v40 = vmul.f32 %v4143_v32, %v4089_v34 }
 0x7dc   : > { %v4161_v43 = vadd.f32 %v4159_v4, %v4088_v18  ;;  %v4181_v12 = vadd.f32 %v4179_v2, %v4175_v52  ;;  %v4203_v16 = vmul.f32 %v4201_v10, %v4152_v42  ;;  %v4178_v56 = vmul.f32 %v4143_v32, %v6380_v61 }
 0x7dd   : > { %v4199_v37 = vadd.f32 %v4197_v51, %v4193_v47  ;;  %v4162_v3 = vadd.f32 %v4160_v39, %v4089_v34  ;;  %v4176_v54 = vmul.f32 %v4174_v40, %v4143_v32  ;;  %v4192_v22 = vmul.f32 %v4143_v32, %v4073_v36 }
 0x7de   : > { %v4163_v59 = vmax.f32 %v4161_v43, 1e-12  ;;  %v4183_v13 = vmul.f32 %v4181_v12, %v6370_v29  ;;  %v4180_v19 = vmul.f32 %v4178_v56, %v4156_v48  ;;  %v4196_v23 = vmul.f32 %v4143_v32, %v4132_v15 }
 0x7df   : > { %v4205_v45 = vadd.f32 %v4203_v16, %v4199_v37  ;;  %v4164_v17 = vmax.f32 %v4162_v3, 1e-12  ;;  %v4194_v11 = vmul.f32 %v4192_v22, %v4143_v32  ;;  %v4202_v44 = vmul.f32 %v4156_v48, %v6380_v61  ;;  %v3569_v32 = vpop.permute.xlu0 %3568 }
 0x7e0   : > { %5053 = vrcp.f32 %v4163_v59  ;;  %v4182_v63 = vadd.f32 %v4180_v19, %v4176_v54  ;;  %v4198_v24 = vmul.f32 %v4196_v23, %v4156_v48  ;;  %v3578_v42 = vadd.f32 %v6228_v21, %v3569_v32 }
 0x7e1   : > { %v4207_v14 = vmul.f32 %v4205_v45, %v4189_v46  ;;  %5055 = vrcp.f32 %v4164_v17  ;;  %v4204_v41 = vmul.f32 %v4202_v44, %v4156_v48 }
 0x7e2   : > { %v4184_v60 = vmul.f32 %v4182_v63, %v4079_v7  ;;  %v4200_v18 = vadd.f32 %v4198_v24, %v4194_v11  ;;  %v3577_v7 = vadd.f32 %v6226_v9, %v3569_v32 }
 0x7e4   : > { %v4206_v36 = vadd.f32 %v4204_v41, %v4200_v18 }
 0x7e6   : > { %v4208_v1 = vmul.f32 %v4206_v36, %v4190_v6 }
 0x7ea   : > { %v5054_v27 = vpop.eup %5053 }
 0x7eb   : > { %v5056_v29 = vpop.eup %5055  ;;  %v4167_v25 = vmul.f32 %v5054_v27, %v4163_v59 }
 0x7ec   : > { %v4168_v57 = vmul.f32 %v5056_v29, %v4164_v17 }
 0x7ed   : > { %v4169_v33 = vsub.f32 2.0, %v4167_v25 }
 0x7ee   : > { %v4170_v35 = vsub.f32 2.0, %v4168_v57 }
 0x7ef   : > { %v4171_v15 = vmul.f32 %v5054_v27, %v4169_v33 }
 0x7f0   : > { %v4172_v62 = vmul.f32 %v5056_v29, %v4170_v35 }
 0x7f1   : > { %v4185_v61 = vmul.f32 %v4183_v13, %v4171_v15  ;;  %v4209_v30 = vmul.f32 %v4207_v14, %v4171_v15 }
 0x7f2   : > { %v4186_v31 = vmul.f32 %v4184_v60, %v4172_v62  ;;  %v4210_v46 = vmul.f32 %v4208_v1, %v4172_v62 }
 0x7f3   : > { %v4187_v34 = vadd.f32 %v4185_v61, %v6361_v53  ;;  %v4211_v50 = vmul.f32 %v4209_v30, %v4171_v15 }
 0x7f4   : > { %v4188_v20 = vadd.f32 %v4186_v31, %v6387_v26  ;;  %v4212_v55 = vmul.f32 %v4210_v46, %v4172_v62 }
 0x7f5   : > { %v4236_v49 = vadd.f32 %v4187_v34, %v3577_v7  ;;  %5057 = vlog2.f32 %v4211_v50 }
 0x7f6   : > { %v4237_v38 = vadd.f32 %v4188_v20, %v3578_v42  ;;  %5059 = vlog2.f32 %v4212_v55 }
 0x7f7   : > { %v4238_v28 = vmul.f32 0.15915494, %v4236_v49 }
 0x7f8   : > { %v4239_v48 = vmul.f32 0.15915494, %v4237_v38 }
 0x7f9   : > { %v4240_v4 = vfloor.f32 %v4238_v28 }
 0x7fa   : > { %v4241_v52 = vfloor.f32 %v4239_v48 }
 0x7fb   : > { %v4242_v2 = vmul.f32 6.2831855, %v4240_v4 }
 0x7fc   : > { %v4243_v9 = vmul.f32 6.2831855, %v4241_v52 }
 0x7fd   : > { %v4244_v53 = vsub.f32 %v4236_v49, %v4242_v2 }
 0x7fe   : > { %v4245_v10 = vsub.f32 %v4237_v38, %v4243_v9 }
 0x7ff   : > { %v5058_v21 = vpop.eup %5057 }
 0x800   : > { %v5060_v26 = vpop.eup %5059  ;;  %v4248_v47 = vcombine.low %v4244_v53, %v4245_v10  ;;  %v4214_v51 = vmul.f32 0.6931472, %v5058_v21 }
 0x801   : > { %v4216_v39 = vmul.f32 0.6931472, %v5060_v26 }
 0x802   : > { %v4255_v40 = vrot.slane %v4248_v47, %v5363_v5 }
 0x803   : > { %v4219_v43 = vcombine.low %v4214_v51, %v4216_v39 }
 0x804   : > { %v4262_v12 = vrot.slane %v4255_v40, %v5363_v5 }
 0x805   : > { %v4226_v56 = vrot.slane %v4219_v43, %v5363_v5 }
 0x806   : > { %v4265_v0 = vsel %vm3845_vm15, %v4262_v12, %v5367_v8 }
 0x807   : > { %4270 = vst.msk [vmem:[%s371_s11] sm:$0x3] %vm6415_vm3, %v4265_v0  ;;  %v4233_v37 = vrot.slane %v4226_v56, %v5363_v5 }
 0x808   : > { %5104 = shalt.err (!%p5101_p7)
}
 0x809   : > { %s5105_s12 = scalar_lea.hbm %s6425_s17, 32  ;;  %s5109_s0 = scalar_lea.hbm %s6518_s9, 64 }
 0x80a   : > { %p5106_p8 = scmp.ne.s32.totalorder %s6425_s17, %s5105_s12  ;;  %p5110_p1 = scmp.lt.u32.totalorder %s6425_s17, %s6518_s9 }
 0x80b   : > { %p5111_p0 = scmp.lt.u32.totalorder %s5109_s0, %s5105_s12  ;;  %p5113_p6 = scmp.lt.u32.totalorder %s5105_s12, %s6425_s17 }
 0x80c   : > { %p5107_p11 = pnand %p5106_p8, %p6567_p9 }
 0x80d   : > { %p5112_p5 = por %p5111_p0, %p5110_p1 }
 0x80e   : > { %p5108_p13 = pneg %p5107_p11 }
 0x80f   : > { %p5114_p10 = por %p5113_p6, %p5112_p5 }
 0x811   : > { %p5115_p12 = pnand %p5114_p10, %p5108_p13 }
 0x813   : > { %5118 = shalt.err (!%p5115_p12)
}
 0x814   : > { %4733 = dma.vmem_to_hbm [thread:$0]  (%p6567_p9), %s6427_s27, 32, %s6425_s17, %s4273_s21   ;;  %v4235_v5 = vsel %vm3845_vm15, %v4233_v37, 0.0 }
 0x815   : > { %4271 = vst.msk [vmem:[%s6419_s18] sm:$0x3] %vm6415_vm3, %v4235_v5  ;;  %s4278_s2 = scalar_lea.sflag [#allocation7], %s6408_s25  ;;  %s5119_s28 = scalar_lea.vmem %s6441_s30, 32 }
 0x816   : > { %p5120_p2 = scmp.ne.s32.totalorder %s6441_s30, %s5119_s28  ;;  %s5216_s12 = smov [#allocation6]  }
 0x817   : > { %s5123_s11 = sshll.u32 %s5216_s12, 4  ;;  %s5124_s11 = int_to_ptr.vmem [resolvable:$false] %s5123_s11 }
 0x818   : > { %p5121_p3 = pnand %p5120_p2, %p6567_p9  ;;  %s5125_s20 = scalar_lea.vmem %s5124_s11, 64 }
 0x819   : > { %p5126_p7 = scmp.lt.s32.totalorder %s6441_s30, %s5124_s11  ;;  %p5127_p8 = scmp.lt.s32.totalorder %s5125_s20, %s5119_s28 }
 0x81a   : > { %p5122_p4 = pneg %p5121_p3 }
 0x81b   : > { %p5128_p11 = por %p5127_p8, %p5126_p7 }
 0x81d   : > { %p5129_p13 = pnand %p5128_p11, %p5122_p4 }
 0x81f   : > { %5132 = shalt.err (!%p5129_p13)
}
 0x820   : > { %s5133_s25 = scalar_lea.hbm %s6439_s29, 32  ;;  %s5137_s17 = scalar_lea.hbm %s6519_s10, 64 }
 0x821   : > { %p5134_p1 = scmp.ne.s32.totalorder %s6439_s29, %s5133_s25  ;;  %p5138_p6 = scmp.lt.u32.totalorder %s6439_s29, %s6519_s10 }
 0x822   : > { %p5139_p10 = scmp.lt.u32.totalorder %s5137_s17, %s5133_s25  ;;  %p5141_p2 = scmp.lt.u32.totalorder %s5133_s25, %s6439_s29 }
 0x823   : > { %p5135_p0 = pnand %p5134_p1, %p6567_p9 }
 0x824   : > { %p5140_p12 = por %p5139_p10, %p5138_p6 }
 0x825   : > { %p5136_p5 = pneg %p5135_p0 }
 0x826   : > { %p5142_p3 = por %p5141_p2, %p5140_p12 }
 0x828   : > { %p5143_p4 = pnand %p5142_p3, %p5136_p5 }
 0x82a   : > { %5146 = shalt.err (!%p5143_p4)
}
 0x82b   : > { %4734 = dma.vmem_to_hbm [thread:$0]  (%p6567_p9), %s6441_s30, 32, %s6439_s29, %s4278_s2  }
 0x82c PF: > { %p4750_p7 = scmp.ge.s32.totalorder %s5189_s16, 2  ;;  %s4318_s26 = sand.u32 1, %s5177_s13  }
 0x82d   : > { %p6568_p8 = scmp.ne.s32.totalorder %s6541_s24, 0  ;;  %s4319_s1 = scalar_lea.sflag [#allocation4], %s4318_s26 }
 0x82f   : > { %p4742_p11 = pnand %p4750_p7, %p6568_p8 }
 0x831   : > { %5168 = dma.done.wait (!%p4742_p11), %s4319_s1, 32  }
 0x832   : > { %5170 = vsyncadd (!%p4742_p11), %s4319_s1, 4294967264  ;;  %s4328_s28 = scalar_lea.sflag [#allocation7], %s4318_s26 }
 0x833   : > { %5172 = dma.done.wait (!%p4742_p11), %s4328_s28, 32  }
 0x834   : > { %5174 = vsyncadd (!%p4742_p11), %s4328_s28, 4294967264  ;;  %p25_p9 = scmp.ge.s32.totalorder %s5297_s19, 4   ;;  %s6569_s13 = smov %s5181_s14 }
 0x835   : > { %s6570_s14 = smov %s5185_s15  ;;  %s6571_s15 = smov %s5308_s22 }
 0x836   : > { %s6572_s16 = smov %s5297_s19  ;;  %27 = sbr.rel (!%p25_p9) target bundleno = 10 (0xa), region = 116 }
 0x83d   :  { %4333 = vsyncpa [#allocation3], 1 }
 0x83e   :  { %4335 = vsyncpa [#allocation3 + $0x1], 1 }
 0x83f   :  { %4336 = vsyncpa [#allocation4], 1 }
 0x840   :  { %4338 = vsyncpa [#allocation4 + $0x1], 1 }
 0x841   :  { %4339 = vsyncpa [#allocation7], 1 }
 0x842   :  { %4341 = vsyncpa [#allocation7 + $0x1], 1 }

</bundles_post_ra>
